<compile_context>
chip_gen: v6e
topology: v6e:2x2x1
jax: 0.10.0
libtpu: 0.0.40
codegen_flags: <defaults>
</compile_context>

<pallas_src>
import functools

import jax
import jax.numpy as jnp
from jax.experimental import pallas as pl
from jax.experimental.pallas import tpu as pltpu


def global_head_kernel(
    x_ref,        # (nb, S, E)  f32
    wqkv_ref,     # (E, 3E)     bf16
    bqkv_ref,     # (1, 3E)     f32
    wo_ref,       # (E, E)      bf16
    bo_ref,       # (1, E)      f32
    ln1_g_ref,    # (1, E)
    ln1_b_ref,    # (1, E)
    ln2_g_ref,    # (1, E)
    ln2_b_ref,    # (1, E)
    ff1_w_ref,    # (E, F)      bf16
    ff1_b_ref,    # (1, F)      f32
    ff2_w_ref,    # (F, E)      bf16
    ff2_b_ref,    # (1, E)      f32
    tail_w_ref,   # (E, L)      f32   (fc_global o fc_language, folded)
    tail_b_ref,   # (1, L)      f32
    o_ref,        # (1, nb, L)
    *,
    eps: float,
    num_heads: int,
    ff_chunk: int,
):
    nb, S, E = x_ref.shape
    H = num_heads
    dh = E // H
    T = nb * S
    scale = 1.0 / (float(dh) ** 0.5)

    # Flatten the batch block into one token slab; all big matmuls run on it.
    x = x_ref[...].astype(jnp.float32).reshape(T, E)            # (T, E)

    # ---- fused QKV projection: one lane-dense matmul ----------------------
    qkv = jnp.dot(x.astype(jnp.bfloat16), wqkv_ref[...],
                  preferred_element_type=jnp.float32) + bqkv_ref[...]   # (T, 3E)

    # ---- per-head attention (tiny S x S work), batched over nb ------------
    # Heads only matter for the O(S^2 * dh) score/context einsums; the
    # expensive projections above/below stay dense.
    ctx_heads = []
    for h in range(H):                                         # static unroll
        qh = qkv[:, h * dh:(h + 1) * dh].reshape(nb, S, dh)
        kh = qkv[:, E + h * dh:E + (h + 1) * dh].reshape(nb, S, dh)
        vh = qkv[:, 2 * E + h * dh:2 * E + (h + 1) * dh].reshape(nb, S, dh)

        s = jnp.einsum("bqd,bkd->bqk", qh * scale, kh,
                       preferred_element_type=jnp.float32)      # (nb, S, S)
        s = s - jnp.max(s, axis=-1, keepdims=True)
        p = jnp.exp(s)
        p = p * pl.reciprocal(jnp.sum(p, axis=-1, keepdims=True), approx=True)
        ch = jnp.einsum("bqk,bkd->bqd", p, vh,
                        preferred_element_type=jnp.float32)     # (nb, S, dh)
        ctx_heads.append(ch.reshape(T, dh))
    ctx = jnp.concatenate(ctx_heads, axis=-1)                   # (T, E)

    # ---- dense output projection -------------------------------------------
    attn = jnp.dot(ctx.astype(jnp.bfloat16), wo_ref[...],
                   preferred_element_type=jnp.float32) + bo_ref[...]    # (T, E)

    # ---- residual + LayerNorm 1 (post-norm) --------------------------------
    h1 = x + attn
    mu1 = jnp.mean(h1, axis=-1, keepdims=True)
    var1 = jnp.mean(jnp.square(h1 - mu1), axis=-1, keepdims=True)
    h1 = (h1 - mu1) * jax.lax.rsqrt(var1 + eps)
    h1 = h1 * ln1_g_ref[...] + ln1_b_ref[...]

    # ---- feed-forward (Linear -> ReLU -> Linear), chunked over F -----------
    F = ff1_w_ref.shape[1]
    n_chunks = F // ff_chunk
    h1b = h1.astype(jnp.bfloat16)

    def ff_body(c, acc):
        start = pl.multiple_of(c * ff_chunk, ff_chunk)
        w1c = ff1_w_ref[:, pl.ds(start, ff_chunk)]              # (E, Fc) bf16
        b1c = ff1_b_ref[:, pl.ds(start, ff_chunk)]              # (1, Fc) f32
        w2c = ff2_w_ref[pl.ds(start, ff_chunk), :]              # (Fc, E) bf16
        f1 = jnp.dot(h1b, w1c, preferred_element_type=jnp.float32) + b1c
        f1 = jnp.maximum(f1, 0.0)
        return acc + jnp.dot(f1.astype(jnp.bfloat16), w2c,
                             preferred_element_type=jnp.float32)

    f2 = jax.lax.fori_loop(0, n_chunks, ff_body,
                           jnp.zeros((T, E), jnp.float32),
                           unroll=True) + ff2_b_ref[...]

    # ---- residual + LayerNorm 2 ---------------------------------------------
    h2 = h1 + f2
    mu2 = jnp.mean(h2, axis=-1, keepdims=True)
    var2 = jnp.mean(jnp.square(h2 - mu2), axis=-1, keepdims=True)
    h2 = (h2 - mu2) * jax.lax.rsqrt(var2 + eps)
    h2 = h2 * ln2_g_ref[...] + ln2_b_ref[...]

    # ---- seq-mean -> fused (fc_global o fc_language) tail ------------------
    gm = jnp.mean(h2.reshape(nb, S, E), axis=1)                 # (nb, E)
    out = jnp.dot(gm, tail_w_ref[...],
                  preferred_element_type=jnp.float32) + tail_b_ref[...]  # (nb, L)
    o_ref[0] = out.astype(o_ref.dtype)


def prepare_kernel_params(p, *, num_heads, weight_dtype=jnp.bfloat16):
    """One-time host-side repack of PyTorch (out,in)-layout params:
       * all weights transposed to MXU-friendly (in, out) layout,
       * Wq/Wk/Wv kept fused as one (E, 3E) matrix,
       * fc_global o fc_language folded into a single (E, L) affine map,
       * heavy weights stored bf16 (matmul inputs only)."""
    E = p["out_w"].shape[0]
    assert E % num_heads == 0
    in_w = p["in_w"]                         # (3E, E) (out, in)
    in_b = p["in_b"].reshape(-1)             # (3E,)

    # y = ((x @ Wg^T + bg) @ Wl^T + bl)  =  x @ (Wg^T Wl^T) + (bg Wl^T + bl)
    fcl_wt = p["fcl_w"].T                    # (M, L)
    tail_w = p["fcg_w"].T @ fcl_wt           # (E, L)
    tail_b = p["fcg_b"].reshape(1, -1) @ fcl_wt + p["fcl_b"].reshape(1, -1)

    return {
        "wqkv": in_w.T.astype(weight_dtype),          # (E, 3E)
        "bqkv": in_b.reshape(1, -1),                  # (1, 3E) f32
        "wo": p["out_w"].T.astype(weight_dtype),      # (E, E)
        "bo": p["out_b"].reshape(1, E),
        "ln1_g": p["ln1_g"].reshape(1, E),
        "ln1_b": p["ln1_b"].reshape(1, E),
        "ln2_g": p["ln2_g"].reshape(1, E),
        "ln2_b": p["ln2_b"].reshape(1, E),
        "ff1_w": p["ff1_w"].T.astype(weight_dtype),   # (E, F)
        "ff1_b": p["ff1_b"].reshape(1, -1),
        "ff2_w": p["ff2_w"].T.astype(weight_dtype),   # (F, E)
        "ff2_b": p["ff2_b"].reshape(1, -1),
        "tail_w": tail_w.astype(jnp.float32),         # (E, L)
        "tail_b": tail_b.astype(jnp.float32),         # (1, L)
    }


def _pick_nb(B, S, token_target=256):
    """Pick batch-block size: aim for ~token_target tokens per grid step,
    nb must divide B, and keep >=2 grid steps when possible (v7x 2-TC)."""
    target = max(1, -(-token_target // S))
    divs = [d for d in range(1, B + 1) if B % d == 0]
    cands = [d for d in divs if d <= target]
    nb = max(cands) if cands else 1
    if B >= 2 and B // nb < 2:
        smaller = [d for d in divs if B // d >= 2]
        if smaller:
            nb = max(smaller)
    return nb


def global_head_forward(C, Ca, Ce, kp, *, num_heads=8, eps=1e-5,
                        nb=None, ff_chunk=512):
    """concat (cheap, host-side) + batch-block-gridded Pallas kernel."""
    # torch.cat([C, Ce, Ca], dim=1)  -- note the Ce-before-Ca order.
    x = jnp.concatenate([C, Ce, Ca], axis=1)
    B, S, E = x.shape
    L = kp["tail_b"].shape[-1]
    F = kp["ff1_w"].shape[-1]

    if nb is None:
        nb = _pick_nb(B, S)
    assert B % nb == 0, "batch must be divisible by the batch block size"
    G = B // nb
    ff_chunk = min(ff_chunk, F)
    assert F % ff_chunk == 0, "dim_feedforward must be divisible by ff_chunk"

    weights = (
        kp["wqkv"], kp["bqkv"], kp["wo"], kp["bo"],
        kp["ln1_g"], kp["ln1_b"], kp["ln2_g"], kp["ln2_b"],
        kp["ff1_w"], kp["ff1_b"], kp["ff2_w"], kp["ff2_b"],
        kp["tail_w"], kp["tail_b"],
    )

    def const_spec(a):
        # whole-array block, constant index map -> fetched once across the grid
        return pl.BlockSpec(a.shape, lambda g, _nd=a.ndim: (0,) * _nd)

    in_specs = [pl.BlockSpec((nb, S, E), lambda g: (g, 0, 0))]
    in_specs += [const_spec(a) for a in weights]
    # 3-D output so the per-step block equals the full trailing dims (nb, L).
    out_specs = pl.BlockSpec((1, nb, L), lambda g: (g, 0, 0))

    out = pl.pallas_call(
        functools.partial(global_head_kernel, eps=eps,
                          num_heads=num_heads, ff_chunk=ff_chunk),
        out_shape=jax.ShapeDtypeStruct((G, nb, L), jnp.float32),
        grid=(G,),
        in_specs=in_specs,
        out_specs=out_specs,
        compiler_params=pltpu.CompilerParams(
            dimension_semantics=("parallel",)),
    )(x, *weights)
    return out.reshape(B, L)


def init_params(key, embed_dim, model_dim, language_dim, ff_dim):
    """Deterministic synthetic parameters in PyTorch (out, in) layout."""
    ks = jax.random.split(key, 12)
    s = 0.02

    def w(k, shape):
        return jax.random.normal(k, shape, jnp.float32) * s

    return {
        "in_w":  w(ks[0], (3 * embed_dim, embed_dim)),
        "in_b":  w(ks[1], (1, 3 * embed_dim)),
        "out_w": w(ks[2], (embed_dim, embed_dim)),
        "out_b": w(ks[3], (1, embed_dim)),
        "ln1_g": jnp.ones((1, embed_dim), jnp.float32),
        "ln1_b": jnp.zeros((1, embed_dim), jnp.float32),
        "ln2_g": jnp.ones((1, embed_dim), jnp.float32),
        "ln2_b": jnp.zeros((1, embed_dim), jnp.float32),
        "ff1_w": w(ks[4], (ff_dim, embed_dim)),
        "ff1_b": w(ks[5], (1, ff_dim)),
        "ff2_w": w(ks[6], (embed_dim, ff_dim)),
        "ff2_b": w(ks[7], (1, embed_dim)),
        "fcg_w": w(ks[8], (model_dim, embed_dim)),
        "fcg_b": w(ks[9], (1, model_dim)),
        "fcl_w": w(ks[10], (language_dim, model_dim)),
        "fcl_b": w(ks[11], (1, language_dim)),
        # TODO(synk): fc_output (language_dim -> 1) exists in __init__ but is
        # unused in forward(), so it is intentionally not materialized/computed.
    }


if __name__ == "__main__":
    # Small config consistent with the module: embed_dim divisible by nhead=8.
    embed_dim, model_dim, language_dim = 32, 64, 32
    ff_dim = 2048          # nn.TransformerEncoderLayer default dim_feedforward
    num_heads = 8
    B, seq = 2, 8

    key = jax.random.PRNGKey(0)
    k_c, k_ca, k_ce, k_p = jax.random.split(key, 4)
    C = jax.random.normal(k_c, (B, seq, embed_dim), jnp.float32)
    Ca = jax.random.normal(k_ca, (B, seq, embed_dim), jnp.float32)
    Ce = jax.random.normal(k_ce, (B, seq, embed_dim), jnp.float32)

    torch_layout_params = init_params(k_p, embed_dim, model_dim,
                                      language_dim, ff_dim)
    kparams = prepare_kernel_params(torch_layout_params, num_heads=num_heads)

    out = global_head_forward(C, Ca, Ce, kparams, num_heads=num_heads)
    out = jax.block_until_ready(out)
    assert out.shape == (B, language_dim)
    assert bool(jnp.all(jnp.isfinite(out)))
    print("KERNEL_OK")
</pallas_src>

<mosaic_0001>
module attributes {stable_mosaic.version = 11 : i64} {
  func.func @global_head_kernel(%arg0: i32, %arg1: memref<1x24x32xf32, #tpu.memory_space<vmem>>, %arg2: memref<32x96xbf16, #tpu.memory_space<vmem>>, %arg3: memref<1x96xf32, #tpu.memory_space<vmem>>, %arg4: memref<32x32xbf16, #tpu.memory_space<vmem>>, %arg5: memref<1x32xf32, #tpu.memory_space<vmem>>, %arg6: memref<1x32xf32, #tpu.memory_space<vmem>>, %arg7: memref<1x32xf32, #tpu.memory_space<vmem>>, %arg8: memref<1x32xf32, #tpu.memory_space<vmem>>, %arg9: memref<1x32xf32, #tpu.memory_space<vmem>>, %arg10: memref<32x2048xbf16, #tpu.memory_space<vmem>>, %arg11: memref<1x2048xf32, #tpu.memory_space<vmem>>, %arg12: memref<2048x32xbf16, #tpu.memory_space<vmem>>, %arg13: memref<1x32xf32, #tpu.memory_space<vmem>>, %arg14: memref<32x32xf32, #tpu.memory_space<vmem>>, %arg15: memref<1x32xf32, #tpu.memory_space<vmem>>, %arg16: memref<1x1x32xf32, #tpu.memory_space<vmem>>) attributes {dimension_semantics = [#tpu.dimension_semantics<parallel>], iteration_bounds = array<i64: 2>, scalar_prefetch = 0 : i64, scratch_operands = 0 : i64, tpu.core_type = #tpu.core_type<tc>, window_params = [{transform_indices = @transform_0, window_bounds = array<i64: 1, 24, 32>}, {pipeline_mode = #tpu.pipeline_mode<synchronous>, transform_indices = @transform_1, window_bounds = array<i64: 32, 96>}, {pipeline_mode = #tpu.pipeline_mode<synchronous>, transform_indices = @transform_2, window_bounds = array<i64: 1, 96>}, {pipeline_mode = #tpu.pipeline_mode<synchronous>, transform_indices = @transform_3, window_bounds = array<i64: 32, 32>}, {pipeline_mode = #tpu.pipeline_mode<synchronous>, transform_indices = @transform_4, window_bounds = array<i64: 1, 32>}, {pipeline_mode = #tpu.pipeline_mode<synchronous>, transform_indices = @transform_5, window_bounds = array<i64: 1, 32>}, {pipeline_mode = #tpu.pipeline_mode<synchronous>, transform_indices = @transform_6, window_bounds = array<i64: 1, 32>}, {pipeline_mode = #tpu.pipeline_mode<synchronous>, transform_indices = @transform_7, window_bounds = array<i64: 1, 32>}, {pipeline_mode = #tpu.pipeline_mode<synchronous>, transform_indices = @transform_8, window_bounds = array<i64: 1, 32>}, {pipeline_mode = #tpu.pipeline_mode<synchronous>, transform_indices = @transform_9, window_bounds = array<i64: 32, 2048>}, {pipeline_mode = #tpu.pipeline_mode<synchronous>, transform_indices = @transform_10, window_bounds = array<i64: 1, 2048>}, {pipeline_mode = #tpu.pipeline_mode<synchronous>, transform_indices = @transform_11, window_bounds = array<i64: 2048, 32>}, {pipeline_mode = #tpu.pipeline_mode<synchronous>, transform_indices = @transform_12, window_bounds = array<i64: 1, 32>}, {pipeline_mode = #tpu.pipeline_mode<synchronous>, transform_indices = @transform_13, window_bounds = array<i64: 32, 32>}, {pipeline_mode = #tpu.pipeline_mode<synchronous>, transform_indices = @transform_14, window_bounds = array<i64: 1, 32>}, {transform_indices = @transform_15, window_bounds = array<i64: 1, 1, 32>}]} {
    %c0 = arith.constant 0 : index
    %c0_0 = arith.constant 0 : index
    %c0_1 = arith.constant 0 : index
    %0 = vector.load %arg1[%c0, %c0_0, %c0_1] : memref<1x24x32xf32, #tpu.memory_space<vmem>>, vector<1x24x32xf32>
    %1 = vector.shape_cast %0 : vector<1x24x32xf32> to vector<24x32xf32>
    %2 = arith.truncf %1 : vector<24x32xf32> to vector<24x32xbf16>
    %c0_2 = arith.constant 0 : index
    %c0_3 = arith.constant 0 : index
    %3 = vector.load %arg2[%c0_2, %c0_3] : memref<32x96xbf16, #tpu.memory_space<vmem>>, vector<32x96xbf16>
    %cst = arith.constant dense<0.000000e+00> : vector<24x96xf32>
    %4 = tpu.matmul %2, %3, %cst {dimension_numbers = #tpu.dot_dimension_numbers<[1], [0], [0], [1], [0, 0, 1, 1], [], []>} : vector<24x32xbf16>, vector<32x96xbf16>, vector<24x96xf32> -> vector<24x96xf32>
    %c0_4 = arith.constant 0 : index
    %c0_5 = arith.constant 0 : index
    %5 = vector.load %arg3[%c0_4, %c0_5] : memref<1x96xf32, #tpu.memory_space<vmem>>, vector<1x96xf32>
    %6 = vector.broadcast %5 : vector<1x96xf32> to vector<24x96xf32>
    %7 = arith.addf %4, %6 : vector<24x96xf32>
    %8 = vector.extract_strided_slice %7 {offsets = [0, 0], sizes = [24, 4], strides = [1, 1]} : vector<24x96xf32> to vector<24x4xf32>
    %9 = vector.shape_cast %8 : vector<24x4xf32> to vector<1x24x4xf32>
    %10 = vector.extract_strided_slice %7 {offsets = [0, 32], sizes = [24, 4], strides = [1, 1]} : vector<24x96xf32> to vector<24x4xf32>
    %11 = vector.shape_cast %10 : vector<24x4xf32> to vector<1x24x4xf32>
    %12 = vector.extract_strided_slice %7 {offsets = [0, 64], sizes = [24, 4], strides = [1, 1]} : vector<24x96xf32> to vector<24x4xf32>
    %13 = vector.shape_cast %12 : vector<24x4xf32> to vector<1x24x4xf32>
    %cst_6 = arith.constant 5.000000e-01 : f32
    %14 = vector.broadcast %cst_6 : f32 to vector<1x24x4xf32>
    %15 = arith.mulf %9, %14 : vector<1x24x4xf32>
    "tpu.trace_start"() <{level = 10 : i32, message = "bqd,bkd->bqk"}> : () -> ()
    %cst_7 = arith.constant dense<0.000000e+00> : vector<1x24x24xf32>
    %16 = tpu.matmul %15, %11, %cst_7 {dimension_numbers = #tpu.dot_dimension_numbers<[2], [2], [1], [1], [0, 0, 0, 1, 1, 1], [0], [0]>} : vector<1x24x4xf32>, vector<1x24x4xf32>, vector<1x24x24xf32> -> vector<1x24x24xf32>
    "tpu.trace_stop"() : () -> ()
    %cst_8 = arith.constant dense<0xFF800000> : vector<1x24xf32>
    %17 = vector.multi_reduction <maximumf>, %16, %cst_8 [2] : vector<1x24x24xf32> to vector<1x24xf32>
    %18 = vector.shape_cast %17 : vector<1x24xf32> to vector<1x24x1xf32>
    %19 = vector.broadcast %18 : vector<1x24x1xf32> to vector<1x24x24xf32>
    %20 = arith.subf %16, %19 : vector<1x24x24xf32>
    %21 = math.exp %20 : vector<1x24x24xf32>
    %cst_9 = arith.constant dense<0.000000e+00> : vector<1x24xf32>
    %22 = vector.multi_reduction <add>, %21, %cst_9 [2] : vector<1x24x24xf32> to vector<1x24xf32>
    %23 = vector.shape_cast %22 : vector<1x24xf32> to vector<1x24x1xf32>
    %24 = tpu.reciprocal %23 {approx = true} : vector<1x24x1xf32> -> vector<1x24x1xf32>
    %25 = vector.broadcast %24 : vector<1x24x1xf32> to vector<1x24x24xf32>
    %26 = arith.mulf %21, %25 : vector<1x24x24xf32>
    "tpu.trace_start"() <{level = 10 : i32, message = "bqk,bkd->bqd"}> : () -> ()
    %cst_10 = arith.constant dense<0.000000e+00> : vector<1x24x4xf32>
    %27 = tpu.matmul %26, %13, %cst_10 {dimension_numbers = #tpu.dot_dimension_numbers<[2], [1], [1], [2], [0, 0, 0, 1, 1, 2], [0], [0]>} : vector<1x24x24xf32>, vector<1x24x4xf32>, vector<1x24x4xf32> -> vector<1x24x4xf32>
    "tpu.trace_stop"() : () -> ()
    %28 = vector.shape_cast %27 : vector<1x24x4xf32> to vector<24x4xf32>
    %29 = vector.extract_strided_slice %7 {offsets = [0, 4], sizes = [24, 4], strides = [1, 1]} : vector<24x96xf32> to vector<24x4xf32>
    %30 = vector.shape_cast %29 : vector<24x4xf32> to vector<1x24x4xf32>
    %31 = vector.extract_strided_slice %7 {offsets = [0, 36], sizes = [24, 4], strides = [1, 1]} : vector<24x96xf32> to vector<24x4xf32>
    %32 = vector.shape_cast %31 : vector<24x4xf32> to vector<1x24x4xf32>
    %33 = vector.extract_strided_slice %7 {offsets = [0, 68], sizes = [24, 4], strides = [1, 1]} : vector<24x96xf32> to vector<24x4xf32>
    %34 = vector.shape_cast %33 : vector<24x4xf32> to vector<1x24x4xf32>
    %cst_11 = arith.constant 5.000000e-01 : f32
    %35 = vector.broadcast %cst_11 : f32 to vector<1x24x4xf32>
    %36 = arith.mulf %30, %35 : vector<1x24x4xf32>
    "tpu.trace_start"() <{level = 10 : i32, message = "bqd,bkd->bqk"}> : () -> ()
    %cst_12 = arith.constant dense<0.000000e+00> : vector<1x24x24xf32>
    %37 = tpu.matmul %36, %32, %cst_12 {dimension_numbers = #tpu.dot_dimension_numbers<[2], [2], [1], [1], [0, 0, 0, 1, 1, 1], [0], [0]>} : vector<1x24x4xf32>, vector<1x24x4xf32>, vector<1x24x24xf32> -> vector<1x24x24xf32>
    "tpu.trace_stop"() : () -> ()
    %cst_13 = arith.constant dense<0xFF800000> : vector<1x24xf32>
    %38 = vector.multi_reduction <maximumf>, %37, %cst_13 [2] : vector<1x24x24xf32> to vector<1x24xf32>
    %39 = vector.shape_cast %38 : vector<1x24xf32> to vector<1x24x1xf32>
    %40 = vector.broadcast %39 : vector<1x24x1xf32> to vector<1x24x24xf32>
    %41 = arith.subf %37, %40 : vector<1x24x24xf32>
    %42 = math.exp %41 : vector<1x24x24xf32>
    %cst_14 = arith.constant dense<0.000000e+00> : vector<1x24xf32>
    %43 = vector.multi_reduction <add>, %42, %cst_14 [2] : vector<1x24x24xf32> to vector<1x24xf32>
    %44 = vector.shape_cast %43 : vector<1x24xf32> to vector<1x24x1xf32>
    %45 = tpu.reciprocal %44 {approx = true} : vector<1x24x1xf32> -> vector<1x24x1xf32>
    %46 = vector.broadcast %45 : vector<1x24x1xf32> to vector<1x24x24xf32>
    %47 = arith.mulf %42, %46 : vector<1x24x24xf32>
    "tpu.trace_start"() <{level = 10 : i32, message = "bqk,bkd->bqd"}> : () -> ()
    %cst_15 = arith.constant dense<0.000000e+00> : vector<1x24x4xf32>
    %48 = tpu.matmul %47, %34, %cst_15 {dimension_numbers = #tpu.dot_dimension_numbers<[2], [1], [1], [2], [0, 0, 0, 1, 1, 2], [0], [0]>} : vector<1x24x24xf32>, vector<1x24x4xf32>, vector<1x24x4xf32> -> vector<1x24x4xf32>
    "tpu.trace_stop"() : () -> ()
    %49 = vector.shape_cast %48 : vector<1x24x4xf32> to vector<24x4xf32>
    %50 = vector.extract_strided_slice %7 {offsets = [0, 8], sizes = [24, 4], strides = [1, 1]} : vector<24x96xf32> to vector<24x4xf32>
    %51 = vector.shape_cast %50 : vector<24x4xf32> to vector<1x24x4xf32>
    %52 = vector.extract_strided_slice %7 {offsets = [0, 40], sizes = [24, 4], strides = [1, 1]} : vector<24x96xf32> to vector<24x4xf32>
    %53 = vector.shape_cast %52 : vector<24x4xf32> to vector<1x24x4xf32>
    %54 = vector.extract_strided_slice %7 {offsets = [0, 72], sizes = [24, 4], strides = [1, 1]} : vector<24x96xf32> to vector<24x4xf32>
    %55 = vector.shape_cast %54 : vector<24x4xf32> to vector<1x24x4xf32>
    %cst_16 = arith.constant 5.000000e-01 : f32
    %56 = vector.broadcast %cst_16 : f32 to vector<1x24x4xf32>
    %57 = arith.mulf %51, %56 : vector<1x24x4xf32>
    "tpu.trace_start"() <{level = 10 : i32, message = "bqd,bkd->bqk"}> : () -> ()
    %cst_17 = arith.constant dense<0.000000e+00> : vector<1x24x24xf32>
    %58 = tpu.matmul %57, %53, %cst_17 {dimension_numbers = #tpu.dot_dimension_numbers<[2], [2], [1], [1], [0, 0, 0, 1, 1, 1], [0], [0]>} : vector<1x24x4xf32>, vector<1x24x4xf32>, vector<1x24x24xf32> -> vector<1x24x24xf32>
    "tpu.trace_stop"() : () -> ()
    %cst_18 = arith.constant dense<0xFF800000> : vector<1x24xf32>
    %59 = vector.multi_reduction <maximumf>, %58, %cst_18 [2] : vector<1x24x24xf32> to vector<1x24xf32>
    %60 = vector.shape_cast %59 : vector<1x24xf32> to vector<1x24x1xf32>
    %61 = vector.broadcast %60 : vector<1x24x1xf32> to vector<1x24x24xf32>
    %62 = arith.subf %58, %61 : vector<1x24x24xf32>
    %63 = math.exp %62 : vector<1x24x24xf32>
    %cst_19 = arith.constant dense<0.000000e+00> : vector<1x24xf32>
    %64 = vector.multi_reduction <add>, %63, %cst_19 [2] : vector<1x24x24xf32> to vector<1x24xf32>
    %65 = vector.shape_cast %64 : vector<1x24xf32> to vector<1x24x1xf32>
    %66 = tpu.reciprocal %65 {approx = true} : vector<1x24x1xf32> -> vector<1x24x1xf32>
    %67 = vector.broadcast %66 : vector<1x24x1xf32> to vector<1x24x24xf32>
    %68 = arith.mulf %63, %67 : vector<1x24x24xf32>
    "tpu.trace_start"() <{level = 10 : i32, message = "bqk,bkd->bqd"}> : () -> ()
    %cst_20 = arith.constant dense<0.000000e+00> : vector<1x24x4xf32>
    %69 = tpu.matmul %68, %55, %cst_20 {dimension_numbers = #tpu.dot_dimension_numbers<[2], [1], [1], [2], [0, 0, 0, 1, 1, 2], [0], [0]>} : vector<1x24x24xf32>, vector<1x24x4xf32>, vector<1x24x4xf32> -> vector<1x24x4xf32>
    "tpu.trace_stop"() : () -> ()
    %70 = vector.shape_cast %69 : vector<1x24x4xf32> to vector<24x4xf32>
    %71 = vector.extract_strided_slice %7 {offsets = [0, 12], sizes = [24, 4], strides = [1, 1]} : vector<24x96xf32> to vector<24x4xf32>
    %72 = vector.shape_cast %71 : vector<24x4xf32> to vector<1x24x4xf32>
    %73 = vector.extract_strided_slice %7 {offsets = [0, 44], sizes = [24, 4], strides = [1, 1]} : vector<24x96xf32> to vector<24x4xf32>
    %74 = vector.shape_cast %73 : vector<24x4xf32> to vector<1x24x4xf32>
    %75 = vector.extract_strided_slice %7 {offsets = [0, 76], sizes = [24, 4], strides = [1, 1]} : vector<24x96xf32> to vector<24x4xf32>
    %76 = vector.shape_cast %75 : vector<24x4xf32> to vector<1x24x4xf32>
    %cst_21 = arith.constant 5.000000e-01 : f32
    %77 = vector.broadcast %cst_21 : f32 to vector<1x24x4xf32>
    %78 = arith.mulf %72, %77 : vector<1x24x4xf32>
    "tpu.trace_start"() <{level = 10 : i32, message = "bqd,bkd->bqk"}> : () -> ()
    %cst_22 = arith.constant dense<0.000000e+00> : vector<1x24x24xf32>
    %79 = tpu.matmul %78, %74, %cst_22 {dimension_numbers = #tpu.dot_dimension_numbers<[2], [2], [1], [1], [0, 0, 0, 1, 1, 1], [0], [0]>} : vector<1x24x4xf32>, vector<1x24x4xf32>, vector<1x24x24xf32> -> vector<1x24x24xf32>
    "tpu.trace_stop"() : () -> ()
    %cst_23 = arith.constant dense<0xFF800000> : vector<1x24xf32>
    %80 = vector.multi_reduction <maximumf>, %79, %cst_23 [2] : vector<1x24x24xf32> to vector<1x24xf32>
    %81 = vector.shape_cast %80 : vector<1x24xf32> to vector<1x24x1xf32>
    %82 = vector.broadcast %81 : vector<1x24x1xf32> to vector<1x24x24xf32>
    %83 = arith.subf %79, %82 : vector<1x24x24xf32>
    %84 = math.exp %83 : vector<1x24x24xf32>
    %cst_24 = arith.constant dense<0.000000e+00> : vector<1x24xf32>
    %85 = vector.multi_reduction <add>, %84, %cst_24 [2] : vector<1x24x24xf32> to vector<1x24xf32>
    %86 = vector.shape_cast %85 : vector<1x24xf32> to vector<1x24x1xf32>
    %87 = tpu.reciprocal %86 {approx = true} : vector<1x24x1xf32> -> vector<1x24x1xf32>
    %88 = vector.broadcast %87 : vector<1x24x1xf32> to vector<1x24x24xf32>
    %89 = arith.mulf %84, %88 : vector<1x24x24xf32>
    "tpu.trace_start"() <{level = 10 : i32, message = "bqk,bkd->bqd"}> : () -> ()
    %cst_25 = arith.constant dense<0.000000e+00> : vector<1x24x4xf32>
    %90 = tpu.matmul %89, %76, %cst_25 {dimension_numbers = #tpu.dot_dimension_numbers<[2], [1], [1], [2], [0, 0, 0, 1, 1, 2], [0], [0]>} : vector<1x24x24xf32>, vector<1x24x4xf32>, vector<1x24x4xf32> -> vector<1x24x4xf32>
    "tpu.trace_stop"() : () -> ()
    %91 = vector.shape_cast %90 : vector<1x24x4xf32> to vector<24x4xf32>
    %92 = vector.extract_strided_slice %7 {offsets = [0, 16], sizes = [24, 4], strides = [1, 1]} : vector<24x96xf32> to vector<24x4xf32>
    %93 = vector.shape_cast %92 : vector<24x4xf32> to vector<1x24x4xf32>
    %94 = vector.extract_strided_slice %7 {offsets = [0, 48], sizes = [24, 4], strides = [1, 1]} : vector<24x96xf32> to vector<24x4xf32>
    %95 = vector.shape_cast %94 : vector<24x4xf32> to vector<1x24x4xf32>
    %96 = vector.extract_strided_slice %7 {offsets = [0, 80], sizes = [24, 4], strides = [1, 1]} : vector<24x96xf32> to vector<24x4xf32>
    %97 = vector.shape_cast %96 : vector<24x4xf32> to vector<1x24x4xf32>
    %cst_26 = arith.constant 5.000000e-01 : f32
    %98 = vector.broadcast %cst_26 : f32 to vector<1x24x4xf32>
    %99 = arith.mulf %93, %98 : vector<1x24x4xf32>
    "tpu.trace_start"() <{level = 10 : i32, message = "bqd,bkd->bqk"}> : () -> ()
    %cst_27 = arith.constant dense<0.000000e+00> : vector<1x24x24xf32>
    %100 = tpu.matmul %99, %95, %cst_27 {dimension_numbers = #tpu.dot_dimension_numbers<[2], [2], [1], [1], [0, 0, 0, 1, 1, 1], [0], [0]>} : vector<1x24x4xf32>, vector<1x24x4xf32>, vector<1x24x24xf32> -> vector<1x24x24xf32>
    "tpu.trace_stop"() : () -> ()
    %cst_28 = arith.constant dense<0xFF800000> : vector<1x24xf32>
    %101 = vector.multi_reduction <maximumf>, %100, %cst_28 [2] : vector<1x24x24xf32> to vector<1x24xf32>
    %102 = vector.shape_cast %101 : vector<1x24xf32> to vector<1x24x1xf32>
    %103 = vector.broadcast %102 : vector<1x24x1xf32> to vector<1x24x24xf32>
    %104 = arith.subf %100, %103 : vector<1x24x24xf32>
    %105 = math.exp %104 : vector<1x24x24xf32>
    %cst_29 = arith.constant dense<0.000000e+00> : vector<1x24xf32>
    %106 = vector.multi_reduction <add>, %105, %cst_29 [2] : vector<1x24x24xf32> to vector<1x24xf32>
    %107 = vector.shape_cast %106 : vector<1x24xf32> to vector<1x24x1xf32>
    %108 = tpu.reciprocal %107 {approx = true} : vector<1x24x1xf32> -> vector<1x24x1xf32>
    %109 = vector.broadcast %108 : vector<1x24x1xf32> to vector<1x24x24xf32>
    %110 = arith.mulf %105, %109 : vector<1x24x24xf32>
    "tpu.trace_start"() <{level = 10 : i32, message = "bqk,bkd->bqd"}> : () -> ()
    %cst_30 = arith.constant dense<0.000000e+00> : vector<1x24x4xf32>
    %111 = tpu.matmul %110, %97, %cst_30 {dimension_numbers = #tpu.dot_dimension_numbers<[2], [1], [1], [2], [0, 0, 0, 1, 1, 2], [0], [0]>} : vector<1x24x24xf32>, vector<1x24x4xf32>, vector<1x24x4xf32> -> vector<1x24x4xf32>
    "tpu.trace_stop"() : () -> ()
    %112 = vector.shape_cast %111 : vector<1x24x4xf32> to vector<24x4xf32>
    %113 = vector.extract_strided_slice %7 {offsets = [0, 20], sizes = [24, 4], strides = [1, 1]} : vector<24x96xf32> to vector<24x4xf32>
    %114 = vector.shape_cast %113 : vector<24x4xf32> to vector<1x24x4xf32>
    %115 = vector.extract_strided_slice %7 {offsets = [0, 52], sizes = [24, 4], strides = [1, 1]} : vector<24x96xf32> to vector<24x4xf32>
    %116 = vector.shape_cast %115 : vector<24x4xf32> to vector<1x24x4xf32>
    %117 = vector.extract_strided_slice %7 {offsets = [0, 84], sizes = [24, 4], strides = [1, 1]} : vector<24x96xf32> to vector<24x4xf32>
    %118 = vector.shape_cast %117 : vector<24x4xf32> to vector<1x24x4xf32>
    %cst_31 = arith.constant 5.000000e-01 : f32
    %119 = vector.broadcast %cst_31 : f32 to vector<1x24x4xf32>
    %120 = arith.mulf %114, %119 : vector<1x24x4xf32>
    "tpu.trace_start"() <{level = 10 : i32, message = "bqd,bkd->bqk"}> : () -> ()
    %cst_32 = arith.constant dense<0.000000e+00> : vector<1x24x24xf32>
    %121 = tpu.matmul %120, %116, %cst_32 {dimension_numbers = #tpu.dot_dimension_numbers<[2], [2], [1], [1], [0, 0, 0, 1, 1, 1], [0], [0]>} : vector<1x24x4xf32>, vector<1x24x4xf32>, vector<1x24x24xf32> -> vector<1x24x24xf32>
    "tpu.trace_stop"() : () -> ()
    %cst_33 = arith.constant dense<0xFF800000> : vector<1x24xf32>
    %122 = vector.multi_reduction <maximumf>, %121, %cst_33 [2] : vector<1x24x24xf32> to vector<1x24xf32>
    %123 = vector.shape_cast %122 : vector<1x24xf32> to vector<1x24x1xf32>
    %124 = vector.broadcast %123 : vector<1x24x1xf32> to vector<1x24x24xf32>
    %125 = arith.subf %121, %124 : vector<1x24x24xf32>
    %126 = math.exp %125 : vector<1x24x24xf32>
    %cst_34 = arith.constant dense<0.000000e+00> : vector<1x24xf32>
    %127 = vector.multi_reduction <add>, %126, %cst_34 [2] : vector<1x24x24xf32> to vector<1x24xf32>
    %128 = vector.shape_cast %127 : vector<1x24xf32> to vector<1x24x1xf32>
    %129 = tpu.reciprocal %128 {approx = true} : vector<1x24x1xf32> -> vector<1x24x1xf32>
    %130 = vector.broadcast %129 : vector<1x24x1xf32> to vector<1x24x24xf32>
    %131 = arith.mulf %126, %130 : vector<1x24x24xf32>
    "tpu.trace_start"() <{level = 10 : i32, message = "bqk,bkd->bqd"}> : () -> ()
    %cst_35 = arith.constant dense<0.000000e+00> : vector<1x24x4xf32>
    %132 = tpu.matmul %131, %118, %cst_35 {dimension_numbers = #tpu.dot_dimension_numbers<[2], [1], [1], [2], [0, 0, 0, 1, 1, 2], [0], [0]>} : vector<1x24x24xf32>, vector<1x24x4xf32>, vector<1x24x4xf32> -> vector<1x24x4xf32>
    "tpu.trace_stop"() : () -> ()
    %133 = vector.shape_cast %132 : vector<1x24x4xf32> to vector<24x4xf32>
    %134 = vector.extract_strided_slice %7 {offsets = [0, 24], sizes = [24, 4], strides = [1, 1]} : vector<24x96xf32> to vector<24x4xf32>
    %135 = vector.shape_cast %134 : vector<24x4xf32> to vector<1x24x4xf32>
    %136 = vector.extract_strided_slice %7 {offsets = [0, 56], sizes = [24, 4], strides = [1, 1]} : vector<24x96xf32> to vector<24x4xf32>
    %137 = vector.shape_cast %136 : vector<24x4xf32> to vector<1x24x4xf32>
    %138 = vector.extract_strided_slice %7 {offsets = [0, 88], sizes = [24, 4], strides = [1, 1]} : vector<24x96xf32> to vector<24x4xf32>
    %139 = vector.shape_cast %138 : vector<24x4xf32> to vector<1x24x4xf32>
    %cst_36 = arith.constant 5.000000e-01 : f32
    %140 = vector.broadcast %cst_36 : f32 to vector<1x24x4xf32>
    %141 = arith.mulf %135, %140 : vector<1x24x4xf32>
    "tpu.trace_start"() <{level = 10 : i32, message = "bqd,bkd->bqk"}> : () -> ()
    %cst_37 = arith.constant dense<0.000000e+00> : vector<1x24x24xf32>
    %142 = tpu.matmul %141, %137, %cst_37 {dimension_numbers = #tpu.dot_dimension_numbers<[2], [2], [1], [1], [0, 0, 0, 1, 1, 1], [0], [0]>} : vector<1x24x4xf32>, vector<1x24x4xf32>, vector<1x24x24xf32> -> vector<1x24x24xf32>
    "tpu.trace_stop"() : () -> ()
    %cst_38 = arith.constant dense<0xFF800000> : vector<1x24xf32>
    %143 = vector.multi_reduction <maximumf>, %142, %cst_38 [2] : vector<1x24x24xf32> to vector<1x24xf32>
    %144 = vector.shape_cast %143 : vector<1x24xf32> to vector<1x24x1xf32>
    %145 = vector.broadcast %144 : vector<1x24x1xf32> to vector<1x24x24xf32>
    %146 = arith.subf %142, %145 : vector<1x24x24xf32>
    %147 = math.exp %146 : vector<1x24x24xf32>
    %cst_39 = arith.constant dense<0.000000e+00> : vector<1x24xf32>
    %148 = vector.multi_reduction <add>, %147, %cst_39 [2] : vector<1x24x24xf32> to vector<1x24xf32>
    %149 = vector.shape_cast %148 : vector<1x24xf32> to vector<1x24x1xf32>
    %150 = tpu.reciprocal %149 {approx = true} : vector<1x24x1xf32> -> vector<1x24x1xf32>
    %151 = vector.broadcast %150 : vector<1x24x1xf32> to vector<1x24x24xf32>
    %152 = arith.mulf %147, %151 : vector<1x24x24xf32>
    "tpu.trace_start"() <{level = 10 : i32, message = "bqk,bkd->bqd"}> : () -> ()
    %cst_40 = arith.constant dense<0.000000e+00> : vector<1x24x4xf32>
    %153 = tpu.matmul %152, %139, %cst_40 {dimension_numbers = #tpu.dot_dimension_numbers<[2], [1], [1], [2], [0, 0, 0, 1, 1, 2], [0], [0]>} : vector<1x24x24xf32>, vector<1x24x4xf32>, vector<1x24x4xf32> -> vector<1x24x4xf32>
    "tpu.trace_stop"() : () -> ()
    %154 = vector.shape_cast %153 : vector<1x24x4xf32> to vector<24x4xf32>
    %155 = vector.extract_strided_slice %7 {offsets = [0, 28], sizes = [24, 4], strides = [1, 1]} : vector<24x96xf32> to vector<24x4xf32>
    %156 = vector.shape_cast %155 : vector<24x4xf32> to vector<1x24x4xf32>
    %157 = vector.extract_strided_slice %7 {offsets = [0, 60], sizes = [24, 4], strides = [1, 1]} : vector<24x96xf32> to vector<24x4xf32>
    %158 = vector.shape_cast %157 : vector<24x4xf32> to vector<1x24x4xf32>
    %159 = vector.extract_strided_slice %7 {offsets = [0, 92], sizes = [24, 4], strides = [1, 1]} : vector<24x96xf32> to vector<24x4xf32>
    %160 = vector.shape_cast %159 : vector<24x4xf32> to vector<1x24x4xf32>
    %cst_41 = arith.constant 5.000000e-01 : f32
    %161 = vector.broadcast %cst_41 : f32 to vector<1x24x4xf32>
    %162 = arith.mulf %156, %161 : vector<1x24x4xf32>
    "tpu.trace_start"() <{level = 10 : i32, message = "bqd,bkd->bqk"}> : () -> ()
    %cst_42 = arith.constant dense<0.000000e+00> : vector<1x24x24xf32>
    %163 = tpu.matmul %162, %158, %cst_42 {dimension_numbers = #tpu.dot_dimension_numbers<[2], [2], [1], [1], [0, 0, 0, 1, 1, 1], [0], [0]>} : vector<1x24x4xf32>, vector<1x24x4xf32>, vector<1x24x24xf32> -> vector<1x24x24xf32>
    "tpu.trace_stop"() : () -> ()
    %cst_43 = arith.constant dense<0xFF800000> : vector<1x24xf32>
    %164 = vector.multi_reduction <maximumf>, %163, %cst_43 [2] : vector<1x24x24xf32> to vector<1x24xf32>
    %165 = vector.shape_cast %164 : vector<1x24xf32> to vector<1x24x1xf32>
    %166 = vector.broadcast %165 : vector<1x24x1xf32> to vector<1x24x24xf32>
    %167 = arith.subf %163, %166 : vector<1x24x24xf32>
    %168 = math.exp %167 : vector<1x24x24xf32>
    %cst_44 = arith.constant dense<0.000000e+00> : vector<1x24xf32>
    %169 = vector.multi_reduction <add>, %168, %cst_44 [2] : vector<1x24x24xf32> to vector<1x24xf32>
    %170 = vector.shape_cast %169 : vector<1x24xf32> to vector<1x24x1xf32>
    %171 = tpu.reciprocal %170 {approx = true} : vector<1x24x1xf32> -> vector<1x24x1xf32>
    %172 = vector.broadcast %171 : vector<1x24x1xf32> to vector<1x24x24xf32>
    %173 = arith.mulf %168, %172 : vector<1x24x24xf32>
    "tpu.trace_start"() <{level = 10 : i32, message = "bqk,bkd->bqd"}> : () -> ()
    %cst_45 = arith.constant dense<0.000000e+00> : vector<1x24x4xf32>
    %174 = tpu.matmul %173, %160, %cst_45 {dimension_numbers = #tpu.dot_dimension_numbers<[2], [1], [1], [2], [0, 0, 0, 1, 1, 2], [0], [0]>} : vector<1x24x24xf32>, vector<1x24x4xf32>, vector<1x24x4xf32> -> vector<1x24x4xf32>
    "tpu.trace_stop"() : () -> ()
    %175 = vector.shape_cast %174 : vector<1x24x4xf32> to vector<24x4xf32>
    %176 = tpu.concatenate %28, %49, %70, %91, %112, %133, %154, %175 in 1 : vector<24x4xf32>, vector<24x4xf32>, vector<24x4xf32>, vector<24x4xf32>, vector<24x4xf32>, vector<24x4xf32>, vector<24x4xf32>, vector<24x4xf32> -> vector<24x32xf32>
    %177 = arith.truncf %176 : vector<24x32xf32> to vector<24x32xbf16>
    %c0_46 = arith.constant 0 : index
    %c0_47 = arith.constant 0 : index
    %178 = vector.load %arg4[%c0_46, %c0_47] : memref<32x32xbf16, #tpu.memory_space<vmem>>, vector<32x32xbf16>
    %cst_48 = arith.constant dense<0.000000e+00> : vector<24x32xf32>
    %179 = tpu.matmul %177, %178, %cst_48 {dimension_numbers = #tpu.dot_dimension_numbers<[1], [0], [0], [1], [0, 0, 1, 1], [], []>} : vector<24x32xbf16>, vector<32x32xbf16>, vector<24x32xf32> -> vector<24x32xf32>
    %c0_49 = arith.constant 0 : index
    %c0_50 = arith.constant 0 : index
    %180 = vector.load %arg5[%c0_49, %c0_50] : memref<1x32xf32, #tpu.memory_space<vmem>>, vector<1x32xf32>
    %181 = vector.broadcast %180 : vector<1x32xf32> to vector<24x32xf32>
    %182 = arith.addf %179, %181 : vector<24x32xf32>
    %183 = arith.addf %1, %182 : vector<24x32xf32>
    %cst_51 = arith.constant dense<0.000000e+00> : vector<24xf32>
    %184 = vector.multi_reduction <add>, %183, %cst_51 [1] : vector<24x32xf32> to vector<24xf32>
    %185 = vector.shape_cast %184 : vector<24xf32> to vector<24x1xf32>
    %cst_52 = arith.constant 3.200000e+01 : f32
    %186 = vector.broadcast %cst_52 : f32 to vector<24x1xf32>
    %187 = arith.divf %185, %186 : vector<24x1xf32>
    %188 = vector.broadcast %187 : vector<24x1xf32> to vector<24x32xf32>
    %189 = arith.subf %183, %188 : vector<24x32xf32>
    %190 = arith.mulf %189, %189 : vector<24x32xf32>
    %cst_53 = arith.constant dense<0.000000e+00> : vector<24xf32>
    %191 = vector.multi_reduction <add>, %190, %cst_53 [1] : vector<24x32xf32> to vector<24xf32>
    %192 = vector.shape_cast %191 : vector<24xf32> to vector<24x1xf32>
    %cst_54 = arith.constant 3.200000e+01 : f32
    %193 = vector.broadcast %cst_54 : f32 to vector<24x1xf32>
    %194 = arith.divf %192, %193 : vector<24x1xf32>
    %195 = vector.broadcast %187 : vector<24x1xf32> to vector<24x32xf32>
    %196 = arith.subf %183, %195 : vector<24x32xf32>
    %cst_55 = arith.constant 9.99999974E-6 : f32
    %197 = vector.broadcast %cst_55 : f32 to vector<24x1xf32>
    %198 = arith.addf %194, %197 : vector<24x1xf32>
    %199 = math.rsqrt %198 : vector<24x1xf32>
    %200 = vector.broadcast %199 : vector<24x1xf32> to vector<24x32xf32>
    %201 = arith.mulf %196, %200 : vector<24x32xf32>
    %c0_56 = arith.constant 0 : index
    %c0_57 = arith.constant 0 : index
    %202 = vector.load %arg6[%c0_56, %c0_57] : memref<1x32xf32, #tpu.memory_space<vmem>>, vector<1x32xf32>
    %203 = vector.broadcast %202 : vector<1x32xf32> to vector<24x32xf32>
    %204 = arith.mulf %201, %203 : vector<24x32xf32>
    %c0_58 = arith.constant 0 : index
    %c0_59 = arith.constant 0 : index
    %205 = vector.load %arg7[%c0_58, %c0_59] : memref<1x32xf32, #tpu.memory_space<vmem>>, vector<1x32xf32>
    %206 = vector.broadcast %205 : vector<1x32xf32> to vector<24x32xf32>
    %207 = arith.addf %204, %206 : vector<24x32xf32>
    %208 = arith.truncf %207 : vector<24x32xf32> to vector<24x32xbf16>
    %cst_60 = arith.constant 0.000000e+00 : f32
    %209 = vector.broadcast %cst_60 : f32 to vector<24x32xf32>
    %c0_i32 = arith.constant 0 : i32
    %c512_i32 = arith.constant 512 : i32
    %210 = arith.muli %c0_i32, %c512_i32 : i32
    %211 = tpu.assume_multiple %210, 512 : i32
    %c0_61 = arith.constant 0 : index
    %212 = arith.index_cast %211 : i32 to index
    %213 = vector.load %arg10[%c0_61, %212] : memref<32x2048xbf16, #tpu.memory_space<vmem>>, vector<32x512xbf16>
    %c0_62 = arith.constant 0 : index
    %214 = arith.index_cast %211 : i32 to index
    %215 = vector.load %arg11[%c0_62, %214] : memref<1x2048xf32, #tpu.memory_space<vmem>>, vector<1x512xf32>
    %216 = arith.index_cast %211 : i32 to index
    %c0_63 = arith.constant 0 : index
    %217 = vector.load %arg12[%216, %c0_63] : memref<2048x32xbf16, #tpu.memory_space<vmem>>, vector<512x32xbf16>
    %cst_64 = arith.constant dense<0.000000e+00> : vector<24x512xf32>
    %218 = tpu.matmul %208, %213, %cst_64 {dimension_numbers = #tpu.dot_dimension_numbers<[1], [0], [0], [1], [0, 0, 1, 1], [], []>} : vector<24x32xbf16>, vector<32x512xbf16>, vector<24x512xf32> -> vector<24x512xf32>
    %219 = vector.broadcast %215 : vector<1x512xf32> to vector<24x512xf32>
    %220 = arith.addf %218, %219 : vector<24x512xf32>
    %cst_65 = arith.constant 0.000000e+00 : f32
    %221 = vector.broadcast %cst_65 : f32 to vector<24x512xf32>
    %222 = arith.maximumf %220, %221 : vector<24x512xf32>
    %223 = arith.truncf %222 : vector<24x512xf32> to vector<24x512xbf16>
    %cst_66 = arith.constant dense<0.000000e+00> : vector<24x32xf32>
    %224 = tpu.matmul %223, %217, %cst_66 {dimension_numbers = #tpu.dot_dimension_numbers<[1], [0], [0], [1], [0, 0, 1, 1], [], []>} : vector<24x512xbf16>, vector<512x32xbf16>, vector<24x32xf32> -> vector<24x32xf32>
    %225 = arith.addf %209, %224 : vector<24x32xf32>
    %c1_i32 = arith.constant 1 : i32
    %c512_i32_67 = arith.constant 512 : i32
    %226 = arith.muli %c1_i32, %c512_i32_67 : i32
    %227 = tpu.assume_multiple %226, 512 : i32
    %c0_68 = arith.constant 0 : index
    %228 = arith.index_cast %227 : i32 to index
    %229 = vector.load %arg10[%c0_68, %228] : memref<32x2048xbf16, #tpu.memory_space<vmem>>, vector<32x512xbf16>
    %c0_69 = arith.constant 0 : index
    %230 = arith.index_cast %227 : i32 to index
    %231 = vector.load %arg11[%c0_69, %230] : memref<1x2048xf32, #tpu.memory_space<vmem>>, vector<1x512xf32>
    %232 = arith.index_cast %227 : i32 to index
    %c0_70 = arith.constant 0 : index
    %233 = vector.load %arg12[%232, %c0_70] : memref<2048x32xbf16, #tpu.memory_space<vmem>>, vector<512x32xbf16>
    %cst_71 = arith.constant dense<0.000000e+00> : vector<24x512xf32>
    %234 = tpu.matmul %208, %229, %cst_71 {dimension_numbers = #tpu.dot_dimension_numbers<[1], [0], [0], [1], [0, 0, 1, 1], [], []>} : vector<24x32xbf16>, vector<32x512xbf16>, vector<24x512xf32> -> vector<24x512xf32>
    %235 = vector.broadcast %231 : vector<1x512xf32> to vector<24x512xf32>
    %236 = arith.addf %234, %235 : vector<24x512xf32>
    %cst_72 = arith.constant 0.000000e+00 : f32
    %237 = vector.broadcast %cst_72 : f32 to vector<24x512xf32>
    %238 = arith.maximumf %236, %237 : vector<24x512xf32>
    %239 = arith.truncf %238 : vector<24x512xf32> to vector<24x512xbf16>
    %cst_73 = arith.constant dense<0.000000e+00> : vector<24x32xf32>
    %240 = tpu.matmul %239, %233, %cst_73 {dimension_numbers = #tpu.dot_dimension_numbers<[1], [0], [0], [1], [0, 0, 1, 1], [], []>} : vector<24x512xbf16>, vector<512x32xbf16>, vector<24x32xf32> -> vector<24x32xf32>
    %241 = arith.addf %225, %240 : vector<24x32xf32>
    %c2_i32 = arith.constant 2 : i32
    %c512_i32_74 = arith.constant 512 : i32
    %242 = arith.muli %c2_i32, %c512_i32_74 : i32
    %243 = tpu.assume_multiple %242, 512 : i32
    %c0_75 = arith.constant 0 : index
    %244 = arith.index_cast %243 : i32 to index
    %245 = vector.load %arg10[%c0_75, %244] : memref<32x2048xbf16, #tpu.memory_space<vmem>>, vector<32x512xbf16>
    %c0_76 = arith.constant 0 : index
    %246 = arith.index_cast %243 : i32 to index
    %247 = vector.load %arg11[%c0_76, %246] : memref<1x2048xf32, #tpu.memory_space<vmem>>, vector<1x512xf32>
    %248 = arith.index_cast %243 : i32 to index
    %c0_77 = arith.constant 0 : index
    %249 = vector.load %arg12[%248, %c0_77] : memref<2048x32xbf16, #tpu.memory_space<vmem>>, vector<512x32xbf16>
    %cst_78 = arith.constant dense<0.000000e+00> : vector<24x512xf32>
    %250 = tpu.matmul %208, %245, %cst_78 {dimension_numbers = #tpu.dot_dimension_numbers<[1], [0], [0], [1], [0, 0, 1, 1], [], []>} : vector<24x32xbf16>, vector<32x512xbf16>, vector<24x512xf32> -> vector<24x512xf32>
    %251 = vector.broadcast %247 : vector<1x512xf32> to vector<24x512xf32>
    %252 = arith.addf %250, %251 : vector<24x512xf32>
    %cst_79 = arith.constant 0.000000e+00 : f32
    %253 = vector.broadcast %cst_79 : f32 to vector<24x512xf32>
    %254 = arith.maximumf %252, %253 : vector<24x512xf32>
    %255 = arith.truncf %254 : vector<24x512xf32> to vector<24x512xbf16>
    %cst_80 = arith.constant dense<0.000000e+00> : vector<24x32xf32>
    %256 = tpu.matmul %255, %249, %cst_80 {dimension_numbers = #tpu.dot_dimension_numbers<[1], [0], [0], [1], [0, 0, 1, 1], [], []>} : vector<24x512xbf16>, vector<512x32xbf16>, vector<24x32xf32> -> vector<24x32xf32>
    %257 = arith.addf %241, %256 : vector<24x32xf32>
    %c3_i32 = arith.constant 3 : i32
    %c512_i32_81 = arith.constant 512 : i32
    %258 = arith.muli %c3_i32, %c512_i32_81 : i32
    %259 = tpu.assume_multiple %258, 512 : i32
    %c0_82 = arith.constant 0 : index
    %260 = arith.index_cast %259 : i32 to index
    %261 = vector.load %arg10[%c0_82, %260] : memref<32x2048xbf16, #tpu.memory_space<vmem>>, vector<32x512xbf16>
    %c0_83 = arith.constant 0 : index
    %262 = arith.index_cast %259 : i32 to index
    %263 = vector.load %arg11[%c0_83, %262] : memref<1x2048xf32, #tpu.memory_space<vmem>>, vector<1x512xf32>
    %264 = arith.index_cast %259 : i32 to index
    %c0_84 = arith.constant 0 : index
    %265 = vector.load %arg12[%264, %c0_84] : memref<2048x32xbf16, #tpu.memory_space<vmem>>, vector<512x32xbf16>
    %cst_85 = arith.constant dense<0.000000e+00> : vector<24x512xf32>
    %266 = tpu.matmul %208, %261, %cst_85 {dimension_numbers = #tpu.dot_dimension_numbers<[1], [0], [0], [1], [0, 0, 1, 1], [], []>} : vector<24x32xbf16>, vector<32x512xbf16>, vector<24x512xf32> -> vector<24x512xf32>
    %267 = vector.broadcast %263 : vector<1x512xf32> to vector<24x512xf32>
    %268 = arith.addf %266, %267 : vector<24x512xf32>
    %cst_86 = arith.constant 0.000000e+00 : f32
    %269 = vector.broadcast %cst_86 : f32 to vector<24x512xf32>
    %270 = arith.maximumf %268, %269 : vector<24x512xf32>
    %271 = arith.truncf %270 : vector<24x512xf32> to vector<24x512xbf16>
    %cst_87 = arith.constant dense<0.000000e+00> : vector<24x32xf32>
    %272 = tpu.matmul %271, %265, %cst_87 {dimension_numbers = #tpu.dot_dimension_numbers<[1], [0], [0], [1], [0, 0, 1, 1], [], []>} : vector<24x512xbf16>, vector<512x32xbf16>, vector<24x32xf32> -> vector<24x32xf32>
    %273 = arith.addf %257, %272 : vector<24x32xf32>
    %c4_i32 = arith.constant 4 : i32
    %c0_88 = arith.constant 0 : index
    %c0_89 = arith.constant 0 : index
    %274 = vector.load %arg13[%c0_88, %c0_89] : memref<1x32xf32, #tpu.memory_space<vmem>>, vector<1x32xf32>
    %275 = vector.broadcast %274 : vector<1x32xf32> to vector<24x32xf32>
    %276 = arith.addf %273, %275 : vector<24x32xf32>
    %277 = arith.addf %207, %276 : vector<24x32xf32>
    %cst_90 = arith.constant dense<0.000000e+00> : vector<24xf32>
    %278 = vector.multi_reduction <add>, %277, %cst_90 [1] : vector<24x32xf32> to vector<24xf32>
    %279 = vector.shape_cast %278 : vector<24xf32> to vector<24x1xf32>
    %cst_91 = arith.constant 3.200000e+01 : f32
    %280 = vector.broadcast %cst_91 : f32 to vector<24x1xf32>
    %281 = arith.divf %279, %280 : vector<24x1xf32>
    %282 = vector.broadcast %281 : vector<24x1xf32> to vector<24x32xf32>
    %283 = arith.subf %277, %282 : vector<24x32xf32>
    %284 = arith.mulf %283, %283 : vector<24x32xf32>
    %cst_92 = arith.constant dense<0.000000e+00> : vector<24xf32>
    %285 = vector.multi_reduction <add>, %284, %cst_92 [1] : vector<24x32xf32> to vector<24xf32>
    %286 = vector.shape_cast %285 : vector<24xf32> to vector<24x1xf32>
    %cst_93 = arith.constant 3.200000e+01 : f32
    %287 = vector.broadcast %cst_93 : f32 to vector<24x1xf32>
    %288 = arith.divf %286, %287 : vector<24x1xf32>
    %289 = vector.broadcast %281 : vector<24x1xf32> to vector<24x32xf32>
    %290 = arith.subf %277, %289 : vector<24x32xf32>
    %cst_94 = arith.constant 9.99999974E-6 : f32
    %291 = vector.broadcast %cst_94 : f32 to vector<24x1xf32>
    %292 = arith.addf %288, %291 : vector<24x1xf32>
    %293 = math.rsqrt %292 : vector<24x1xf32>
    %294 = vector.broadcast %293 : vector<24x1xf32> to vector<24x32xf32>
    %295 = arith.mulf %290, %294 : vector<24x32xf32>
    %c0_95 = arith.constant 0 : index
    %c0_96 = arith.constant 0 : index
    %296 = vector.load %arg8[%c0_95, %c0_96] : memref<1x32xf32, #tpu.memory_space<vmem>>, vector<1x32xf32>
    %297 = vector.broadcast %296 : vector<1x32xf32> to vector<24x32xf32>
    %298 = arith.mulf %295, %297 : vector<24x32xf32>
    %c0_97 = arith.constant 0 : index
    %c0_98 = arith.constant 0 : index
    %299 = vector.load %arg9[%c0_97, %c0_98] : memref<1x32xf32, #tpu.memory_space<vmem>>, vector<1x32xf32>
    %300 = vector.broadcast %299 : vector<1x32xf32> to vector<24x32xf32>
    %301 = arith.addf %298, %300 : vector<24x32xf32>
    %302 = vector.shape_cast %301 : vector<24x32xf32> to vector<1x24x32xf32>
    %cst_99 = arith.constant dense<0.000000e+00> : vector<1x32xf32>
    %303 = vector.multi_reduction <add>, %302, %cst_99 [1] : vector<1x24x32xf32> to vector<1x32xf32>
    %cst_100 = arith.constant 2.400000e+01 : f32
    %304 = vector.broadcast %cst_100 : f32 to vector<1x32xf32>
    %305 = arith.divf %303, %304 : vector<1x32xf32>
    %c0_101 = arith.constant 0 : index
    %c0_102 = arith.constant 0 : index
    %306 = vector.load %arg14[%c0_101, %c0_102] : memref<32x32xf32, #tpu.memory_space<vmem>>, vector<32x32xf32>
    %cst_103 = arith.constant dense<0.000000e+00> : vector<1x32xf32>
    %307 = tpu.matmul %305, %306, %cst_103 {dimension_numbers = #tpu.dot_dimension_numbers<[1], [0], [0], [1], [0, 0, 1, 1], [], []>} : vector<1x32xf32>, vector<32x32xf32>, vector<1x32xf32> -> vector<1x32xf32>
    %c0_104 = arith.constant 0 : index
    %c0_105 = arith.constant 0 : index
    %308 = vector.load %arg15[%c0_104, %c0_105] : memref<1x32xf32, #tpu.memory_space<vmem>>, vector<1x32xf32>
    %309 = arith.addf %307, %308 : vector<1x32xf32>
    %c0_106 = arith.constant 0 : index
    %c0_107 = arith.constant 0 : index
    %c0_108 = arith.constant 0 : index
    %310 = vector.load %arg16[%c0_106, %c0_107, %c0_108] : memref<1x1x32xf32, #tpu.memory_space<vmem>>, vector<1x1x32xf32>
    %311 = vector.shape_cast %310 : vector<1x1x32xf32> to vector<1x32xf32>
    %312 = vector.shape_cast %309 : vector<1x32xf32> to vector<1x1x32xf32>
    tpu.vector_store %arg16[%c0_106, %c0_107, %c0_108], %312 {strides = array<i32>} : memref<1x1x32xf32, #tpu.memory_space<vmem>>, vector<1x1x32xf32>,
    return
  }
  func.func @transform_0(%arg0: i32) -> (i32, i32, i32) {
    %c0_i32 = arith.constant 0 : i32
    %c0_i32_0 = arith.constant 0 : i32
    %c0_i32_1 = arith.constant 0 : i32
    return %arg0, %c0_i32, %c0_i32_0 : i32, i32, i32
  }
  func.func @transform_1(%arg0: i32) -> (i32, i32) {
    %c0_i32 = arith.constant 0 : i32
    %c0_i32_0 = arith.constant 0 : i32
    %c0_i32_1 = arith.constant 0 : i32
    return %c0_i32, %c0_i32_0 : i32, i32
  }
  func.func @transform_2(%arg0: i32) -> (i32, i32) {
    %c0_i32 = arith.constant 0 : i32
    %c0_i32_0 = arith.constant 0 : i32
    %c0_i32_1 = arith.constant 0 : i32
    return %c0_i32, %c0_i32_0 : i32, i32
  }
  func.func @transform_3(%arg0: i32) -> (i32, i32) {
    %c0_i32 = arith.constant 0 : i32
    %c0_i32_0 = arith.constant 0 : i32
    %c0_i32_1 = arith.constant 0 : i32
    return %c0_i32, %c0_i32_0 : i32, i32
  }
  func.func @transform_4(%arg0: i32) -> (i32, i32) {
    %c0_i32 = arith.constant 0 : i32
    %c0_i32_0 = arith.constant 0 : i32
    %c0_i32_1 = arith.constant 0 : i32
    return %c0_i32, %c0_i32_0 : i32, i32
  }
  func.func @transform_5(%arg0: i32) -> (i32, i32) {
    %c0_i32 = arith.constant 0 : i32
    %c0_i32_0 = arith.constant 0 : i32
    %c0_i32_1 = arith.constant 0 : i32
    return %c0_i32, %c0_i32_0 : i32, i32
  }
  func.func @transform_6(%arg0: i32) -> (i32, i32) {
    %c0_i32 = arith.constant 0 : i32
    %c0_i32_0 = arith.constant 0 : i32
    %c0_i32_1 = arith.constant 0 : i32
    return %c0_i32, %c0_i32_0 : i32, i32
  }
  func.func @transform_7(%arg0: i32) -> (i32, i32) {
    %c0_i32 = arith.constant 0 : i32
    %c0_i32_0 = arith.constant 0 : i32
    %c0_i32_1 = arith.constant 0 : i32
    return %c0_i32, %c0_i32_0 : i32, i32
  }
  func.func @transform_8(%arg0: i32) -> (i32, i32) {
    %c0_i32 = arith.constant 0 : i32
    %c0_i32_0 = arith.constant 0 : i32
    %c0_i32_1 = arith.constant 0 : i32
    return %c0_i32, %c0_i32_0 : i32, i32
  }
  func.func @transform_9(%arg0: i32) -> (i32, i32) {
    %c0_i32 = arith.constant 0 : i32
    %c0_i32_0 = arith.constant 0 : i32
    %c0_i32_1 = arith.constant 0 : i32
    return %c0_i32, %c0_i32_0 : i32, i32
  }
  func.func @transform_10(%arg0: i32) -> (i32, i32) {
    %c0_i32 = arith.constant 0 : i32
    %c0_i32_0 = arith.constant 0 : i32
    %c0_i32_1 = arith.constant 0 : i32
    return %c0_i32, %c0_i32_0 : i32, i32
  }
  func.func @transform_11(%arg0: i32) -> (i32, i32) {
    %c0_i32 = arith.constant 0 : i32
    %c0_i32_0 = arith.constant 0 : i32
    %c0_i32_1 = arith.constant 0 : i32
    return %c0_i32, %c0_i32_0 : i32, i32
  }
  func.func @transform_12(%arg0: i32) -> (i32, i32) {
    %c0_i32 = arith.constant 0 : i32
    %c0_i32_0 = arith.constant 0 : i32
    %c0_i32_1 = arith.constant 0 : i32
    return %c0_i32, %c0_i32_0 : i32, i32
  }
  func.func @transform_13(%arg0: i32) -> (i32, i32) {
    %c0_i32 = arith.constant 0 : i32
    %c0_i32_0 = arith.constant 0 : i32
    %c0_i32_1 = arith.constant 0 : i32
    return %c0_i32, %c0_i32_0 : i32, i32
  }
  func.func @transform_14(%arg0: i32) -> (i32, i32) {
    %c0_i32 = arith.constant 0 : i32
    %c0_i32_0 = arith.constant 0 : i32
    %c0_i32_1 = arith.constant 0 : i32
    return %c0_i32, %c0_i32_0 : i32, i32
  }
  func.func @transform_15(%arg0: i32) -> (i32, i32, i32) {
    %c0_i32 = arith.constant 0 : i32
    %c0_i32_0 = arith.constant 0 : i32
    %c0_i32_1 = arith.constant 0 : i32
    return %arg0, %c0_i32, %c0_i32_0 : i32, i32, i32
  }
}

</mosaic_0001>

<bundles_post_ra>
// kernel: tpu_custom_call.1
= control target key start
LH: loop header
LB: loop body
LE: loop exit
PB: predicated region body
PF: predicated region fallthrough
CT: control target
= control target key end

     0   :  { %s8256_s0 = inlined_call_operand.vmem [shape: f32[2,24,32], index: 0, kind: input, shape index: {}]   ;;  %s8257_s1 = inlined_call_operand.vmem [shape: bf16[32,96], index: 1, kind: input, shape index: {}]   ;;  %s8258_s2 = inlined_call_operand.vmem [shape: f32[1,96], index: 2, kind: input, shape index: {}]   ;;  %s8259_s3 = inlined_call_operand.vmem [shape: bf16[32,32], index: 3, kind: input, shape index: {}]   ;;  %s8260_s4 = inlined_call_operand.vmem [shape: f32[1,32], index: 4, kind: input, shape index: {}]   ;;  %s8261_s5 = inlined_call_operand.vmem [shape: f32[1,32], index: 5, kind: input, shape index: {}]   ;;  %s8262_s6 = inlined_call_operand.vmem [shape: f32[1,32], index: 6, kind: input, shape index: {}]   ;;  %s8263_s7 = inlined_call_operand.vmem [shape: f32[1,32], index: 7, kind: input, shape index: {}]   ;;  %s8264_s8 = inlined_call_operand.vmem [shape: f32[1,32], index: 8, kind: input, shape index: {}]   ;;  %s8265_s9 = inlined_call_operand.vmem [shape: bf16[32,2048], index: 9, kind: input, shape index: {}]   ;;  %s8266_s10 = inlined_call_operand.vmem [shape: f32[1,2048], index: 10, kind: input, shape index: {}]   ;;  %s8267_s11 = inlined_call_operand.vmem [shape: bf16[2048,32], index: 11, kind: input, shape index: {}]   ;;  %s8268_s12 = inlined_call_operand.vmem [shape: f32[1,32], index: 12, kind: input, shape index: {}]   ;;  %s8269_s13 = inlined_call_operand.vmem [shape: f32[32,32], index: 13, kind: input, shape index: {}]   ;;  %s8270_s14 = inlined_call_operand.vmem [shape: f32[1,32], index: 14, kind: input, shape index: {}]   ;;  %s8271_s15 = inlined_call_operand.hbm [shape: f32[2,1,32], index: 15, kind: output, shape index: {}]  }
   0x1   :  { %8275 = sst [smem:[#allocation8_spill]] %s8256_s0 }
   0x2   :  { %8276 = sst [smem:[#allocation9_spill]] %s8257_s1 }
   0x3   :  { %20 = vsyncpa [#allocation3], 0 }
   0x4   :  { %22 = vsyncpa [#allocation3 + $0x1], 0  ;;  %s6763_s18 = smov 0   ;;  %s6765_s19 = smov 0  }
   0x5   :  { %s6767_s20 = smov 0   ;;  %s6769_s21 = smov 0  }
   0x6 LB: > { %8277 = sst [smem:[#allocation5_spill]] %s6643_s20  ;;  %s6784_s22 = sadd.s32 4294967295, %s6647_s21   ;;  %s6647_s21 = sphi %s6769_s21, %s8284_s21   ;;  %s6643_s20 = sphi %s6767_s20, %s8289_s20   ;;  %s6639_s19 = sphi %s6765_s19, %s8288_s19   ;;  %s6635_s18 = sphi %s6763_s18, %s8287_s18  }
   0x7   : > { %s5145_s23 = sadd.s32 4294967294, %s6647_s21   ;;  %s6788_s24 = sadd.s32 1, %s6647_s21  }
   0x8   : > { %8278 = sst [smem:[#allocation6_spill]] %s6788_s24  ;;  %s355_s25 = sadd.s32 1, %s6643_s20 }
   0x9   : > { %s352_s26 = ssub.s32 %s6647_s21, %s6788_s24  ;;  %p365_p0 = scmp.ne.s32.totalorder %s6643_s20, %s6639_s19 }
   0xa   : > { %p353_p1 = scmp.eq.s32.totalorder %s352_s26, 0  ;;  %p366_p2 = scmp.eq.s32.totalorder %s6784_s22, 1 }
   0xb   : > { %p371_p3 = scmp.ne.s32.totalorder %s6639_s19, %s6635_s18  ;;  %p372_p4 = scmp.eq.s32.totalorder %s5145_s23, 1 }
   0xc   : > { %s6799_s27 = scalar_select %p353_p1, %s6643_s20, %s355_s25  }
   0xd   : > { %p6801_p5 = por %p366_p2, %p365_p0  ;;  %p6805_p6 = por %p372_p4, %p371_p3 }
   0xe   : > { %8279 = sst [smem:[#allocation7_spill]] %s6799_s27  ;;  %p5148_p7 = scmp.ge.s32.totalorder %s6647_s21, 1 }
   0xf   : > { %p440_p8 = scmp.lt.s32.totalorder %s6647_s21, 3 }
  0x11   : > { %p441_p9 = pnand %p5148_p7, %p440_p8 }
  0x12   : > { %s8282_s1 = sld [smem:[#allocation9_spill]] (!%p441_p9)  ;;  %p487_p10 = scmp.lt.s32.totalorder (!%p441_p9), %s6784_s22, 1 }
  0x13   : > { %444 = sbr.rel (%p441_p9) target bundleno = 3267 (0xcc3), region = 80  ;;  %s8283_s0 = sld [smem:[#allocation8_spill]] (!%p441_p9) }
  0x14   : > { %s6651_s30 = smov (!%p441_p9), 96   ;;  %s6652_s16 = smov (!%p441_p9), 92  }
  0x15   : > { %s6653_s17 = smov (!%p441_p9), 88   ;;  %s6654_s23 = smov (!%p441_p9), 124  }
  0x16   : > { %s6657_s20 = smov (!%p441_p9), 80   ;;  %s6658_s27 = smov (!%p441_p9), 116  }
  0x18   : > { %v6344_v0 = vld [vmem:[%s8282_s1 + $0x8] sm:$0xff]   ;;  %v6345_v1 = vld [vmem:[%s8282_s1] sm:$0xff]   ;;  %s488_s25 = scalar_select %p487_p10, %s6784_s22, 1  ;;  %vm521_vm0 = vcmask 261120   ;;  %v6649_v7 = vmov 0.0   ;;  %vm6650_vm1 = vmmov 0  }
  0x19   : > { %5969 = vmatprep.subr.bf16.mxu0 %v6344_v0  ;;  %5977 = vmatprep.subr.mxu1 %v6649_v7  ;;  %v5150_v8 = vld [vmem:[%s8258_s2] ss:$0 sm:$0xff]  ;;  %vm588_vm2 = vcmask 31744   ;;  %vm684_vm3 = vcmask 195584   ;;  %vm2548_vm4 = vcmask 64512   ;;  %vm2552_vm5 = vcmask 97280  }
  0x1a   : > { %5970 = vmatpush3.bf16.msra.mxu0 %v6344_v0  ;;  %s6236_s26 = smul.u32 24, %s488_s25  ;;  %5983 = vmatprep.mubr.msk.f32.mxu1 %vm6650_vm1, %v6649_v7  ;;  %s6655_s25 = smov 84   ;;  %vm2556_vm6 = vcmask 130048   ;;  %vm2560_vm7 = vcmask 162816   ;;  %vm2567_vm8 = vcmask 228352   ;;  %vm5075_vm9 = vcmask 253952  }
  0x1b   : > { %5971 = vmatprep.subr.bf16.mxu0 %v6345_v1 }
  0x1c   : > { %s6822_s24 = scalar_lea.vmem %s8283_s0, %s6236_s26  ;;  %s6656_s26 = smov 120  }
  0x1d   : > { %v493_v2 = vld [vmem:[%s6822_s24] sm:$0xff]  ;;  %v494_v3 = vld [vmem:[%s6822_s24 + $0x8] sm:$0xff]  ;;  %v495_v4 = vld [vmem:[%s6822_s24 + $0x10] sm:$0xff] }
  0x1e   : > { %5972 = vmatpush3.bf16.msra.mxu0 %v6345_v1  ;;  %v496_v5 = vpack.c.bf16 %v494_v3, %v493_v2  ;;  %v497_v6 = vpack.c.bf16 %v495_v4, %v495_v4 }
  0x1f   : > { %5992 = vmatprep.subr.mxu0 %v6649_v7 }
  0x20   : > { %5973 = vmatprep.mubr.msk.bf16.mxu0 %vm521_vm0, %v496_v5 }
  0x21   : > { %5974 = vmatmul.mubr.msk.bf16.vlgmr.msra.gmra.mxu0 %vm521_vm0, %v497_v6 }
  0x22   : > { %5998 = vmatprep.mubr.msk.f32.mxu0 %vm6650_vm1, %v6649_v7 }
  0xe1   : > { %v5975_v9 = vpop.f32.mrf.mxu0 }
  0xe2   : > { %v6834_v10 = vadd.f32 %v5975_v9, %v5150_v8 }
  0xe3   : > { %v562_v11 = vpop.f32.mrf.mxu0 }
  0xe4   : > { %v6840_v12 = vadd.f32 %v5150_v8, %v562_v11  ;;  %586 = vrot.lane.b32.xlu0 %v6834_v10, %s6651_s30  ;;  %v6861_v18 = vmul.f32 0.5, %v6834_v10 }
  0xe5   : > { %v5976_v13 = vpop.f32.mrf.mxu0 }
  0xe6   : > { %582 = vrot.lane.b32.xlu1 %v6840_v12, %s6651_s30  ;;  %v6851_v16 = vmul.f32 0.5, %v6840_v12 }
  0xe7   : > { %v565_v14 = vpop.f32.mrf.mxu0 }
  0xe8   : > { %v6844_v15 = vadd.f32 %v5150_v8, %v565_v14 }
  0xea   : > { %584 = vrot.lane.b32.xlu0 %v6844_v15, %s6651_s30  ;;  %826 = vrot.lane.b32.xlu1 %v6834_v10, %s6652_s16  ;;  %v6856_v17 = vmul.f32 0.5, %v6844_v15  ;;  %s6659_s30 = smov 76  }
  0xee   : > { %824 = vrot.lane.b32.xlu0 %v6844_v15, %s6652_s16  ;;  %822 = vrot.lane.b32.xlu1 %v6840_v12, %s6652_s16  ;;  %s6660_s16 = smov 112  }
  0xf2   : > { %1061 = vrot.lane.b32.xlu1 %v6834_v10, %s6653_s17  ;;  %816 = vrot.lane.b32.xlu0 %v6851_v16, %s6654_s23 }
  0xf6   : > { %1059 = vrot.lane.b32.xlu1 %v6844_v15, %s6653_s17  ;;  %818 = vrot.lane.b32.xlu0 %v6856_v17, %s6654_s23 }
  0xfa   : > { %1057 = vrot.lane.b32.xlu1 %v6840_v12, %s6653_s17  ;;  %820 = vrot.lane.b32.xlu0 %v6861_v18, %s6654_s23  ;;  %s6661_s17 = smov 72   ;;  %s6662_s23 = smov 108  }
  0xfe   : > { %1296 = vrot.lane.b32.xlu1 %v6834_v10, %s6655_s25  ;;  %1051 = vrot.lane.b32.xlu0 %v6851_v16, %s6656_s26 }
 0x102   : > { %1294 = vrot.lane.b32.xlu1 %v6844_v15, %s6655_s25  ;;  %1053 = vrot.lane.b32.xlu0 %v6856_v17, %s6656_s26 }
 0x106   : > { %1292 = vrot.lane.b32.xlu1 %v6840_v12, %s6655_s25  ;;  %1055 = vrot.lane.b32.xlu0 %v6861_v18, %s6656_s26  ;;  %s6663_s25 = smov 68   ;;  %s6664_s26 = smov 104  }
 0x10a   : > { %1531 = vrot.lane.b32.xlu1 %v6834_v10, %s6657_s20  ;;  %1286 = vrot.lane.b32.xlu0 %v6851_v16, %s6658_s27 }
 0x10e   : > { %1529 = vrot.lane.b32.xlu1 %v6844_v15, %s6657_s20  ;;  %1288 = vrot.lane.b32.xlu0 %v6856_v17, %s6658_s27 }
 0x112   : > { %1527 = vrot.lane.b32.xlu1 %v6840_v12, %s6657_s20  ;;  %1290 = vrot.lane.b32.xlu0 %v6861_v18, %s6658_s27  ;;  %s6665_s20 = smov 100   ;;  %s6666_s27 = smov 64  }
 0x116   : > { %1766 = vrot.lane.b32.xlu1 %v6834_v10, %s6659_s30  ;;  %1521 = vrot.lane.b32.xlu0 %v6851_v16, %s6660_s16 }
 0x11a   : > { %1764 = vrot.lane.b32.xlu1 %v6844_v15, %s6659_s30  ;;  %1523 = vrot.lane.b32.xlu0 %v6856_v17, %s6660_s16 }
 0x11e   : > { %1762 = vrot.lane.b32.xlu1 %v6840_v12, %s6659_s30  ;;  %1525 = vrot.lane.b32.xlu0 %v6861_v18, %s6660_s16  ;;  %s6667_s30 = smov 60   ;;  %s6668_s16 = smov 56  }
 0x122   : > { %2001 = vrot.lane.b32.xlu1 %v6834_v10, %s6661_s17  ;;  %1756 = vrot.lane.b32.xlu0 %v6851_v16, %s6662_s23 }
 0x126   : > { %1999 = vrot.lane.b32.xlu1 %v6844_v15, %s6661_s17  ;;  %1758 = vrot.lane.b32.xlu0 %v6856_v17, %s6662_s23 }
 0x12a   : > { %1997 = vrot.lane.b32.xlu1 %v6840_v12, %s6661_s17  ;;  %1760 = vrot.lane.b32.xlu0 %v6861_v18, %s6662_s23  ;;  %s6669_s17 = smov 52   ;;  %s6670_s23 = smov 48  }
 0x12e   : > { %2236 = vrot.lane.b32.xlu1 %v6834_v10, %s6663_s25  ;;  %1991 = vrot.lane.b32.xlu0 %v6851_v16, %s6664_s26 }
 0x132   : > { %2234 = vrot.lane.b32.xlu1 %v6844_v15, %s6663_s25  ;;  %1993 = vrot.lane.b32.xlu0 %v6856_v17, %s6664_s26 }
 0x136   : > { %2232 = vrot.lane.b32.xlu1 %v6840_v12, %s6663_s25  ;;  %1995 = vrot.lane.b32.xlu0 %v6861_v18, %s6664_s26  ;;  %s6671_s25 = smov 44   ;;  %s6672_s26 = smov 40  }
 0x13a   : > { %2228 = vrot.lane.b32.xlu1 %v6856_v17, %s6665_s20  ;;  %2226 = vrot.lane.b32.xlu0 %v6851_v16, %s6665_s20 }
 0x13e   : > { %720 = vrot.lane.b32.xlu1 %v6844_v15, %s6666_s27  ;;  %2230 = vrot.lane.b32.xlu0 %v6861_v18, %s6665_s20  ;;  %s6673_s20 = smov 36  }
 0x142   : > { %955 = vrot.lane.b32.xlu1 %v6844_v15, %s6667_s30  ;;  %722 = vrot.lane.b32.xlu0 %v6834_v10, %s6666_s27 }
 0x146   : > { %1190 = vrot.lane.b32.xlu1 %v6844_v15, %s6668_s16  ;;  %718 = vrot.lane.b32.xlu0 %v6840_v12, %s6666_s27  ;;  %s6674_s27 = smov 4  }
 0x14a   : > { %1425 = vrot.lane.b32.xlu1 %v6844_v15, %s6669_s17  ;;  %957 = vrot.lane.b32.xlu0 %v6834_v10, %s6667_s30 }
 0x14e   : > { %1660 = vrot.lane.b32.xlu1 %v6844_v15, %s6670_s23  ;;  %953 = vrot.lane.b32.xlu0 %v6840_v12, %s6667_s30  ;;  %s6675_s30 = smov 8  }
 0x152   : > { %1895 = vrot.lane.b32.xlu1 %v6844_v15, %s6671_s25  ;;  %1192 = vrot.lane.b32.xlu0 %v6834_v10, %s6668_s16 }
 0x156   : > { %v587_v19 = vpop.permute.xlu0 %586  ;;  %1188 = vrot.lane.b32.xlu0 %v6840_v12, %s6668_s16  ;;  %s6676_s16 = smov 12  }
 0x157   : > { %5978 = vmatpush3.xpose.msk.msra.mxu1 %vm588_vm2, %v587_v19 }
 0x158   : > { %v583_v20 = vpop.permute.xlu1 %582  ;;  %5979 = vmatprep.subr.mxu1 %v6649_v7 }
 0x15a   : > { %1427 = vrot.lane.b32.xlu0 %v6834_v10, %s6669_s17 }
 0x15c   : > { %v585_v21 = vpop.permute.xlu0 %584  ;;  %v827_v22 = vpop.permute.xlu1 %826 }
 0x15d   : > { %5980 = vmatpush3.xpose.msk.msra.mxu1 %vm588_vm2, %v585_v21 }
 0x15e   : > { %1423 = vrot.lane.b32.xlu0 %v6840_v12, %s6669_s17  ;;  %5981 = vmatprep.subr.mxu1 %v6649_v7  ;;  %s6677_s17 = smov 16  }
 0x160   : > { %v825_v23 = vpop.permute.xlu0 %824  ;;  %v823_v24 = vpop.permute.xlu1 %822 }
 0x161   : > { %5982 = vmatpush3.xpose.msk.msra.mxu1 %vm588_vm2, %v583_v20 }
 0x162   : > { %1662 = vrot.lane.b32.xlu0 %v6834_v10, %s6670_s23  ;;  %6007 = vmatprep.subr.mxu1 %v6649_v7 }
 0x164   : > { %v1062_v25 = vpop.permute.xlu1 %1061  ;;  %v817_v26 = vpop.permute.xlu0 %816  ;;  %5984 = vmatmul.mubr.msk.f32.vlgmr.msra.gmra.mxu1 %vm588_vm2, %v6851_v16 }
 0x165   : > { %6008 = vmatpush3.xpose.msk.msra.mxu1 %vm588_vm2, %v827_v22  ;;  %5986 = vmatprep.mubr.msk.f32.mxu1 %vm6650_vm1, %v6649_v7 }
 0x166   : > { %1658 = vrot.lane.b32.xlu0 %v6840_v12, %s6670_s23  ;;  %6009 = vmatprep.subr.mxu1 %v6649_v7  ;;  %s6678_s23 = smov 20  }
 0x168   : > { %v1060_v27 = vpop.permute.xlu1 %1059  ;;  %v819_v28 = vpop.permute.xlu0 %818  ;;  %5987 = vmatmul.mubr.msk.f32.gmra.mxu1 %vm588_vm2, %v6856_v17 }
 0x169   : > { %6010 = vmatpush3.xpose.msk.msra.mxu1 %vm588_vm2, %v825_v23  ;;  %5989 = vmatprep.mubr.msk.f32.mxu1 %vm6650_vm1, %v6649_v7 }
 0x16a   : > { %1897 = vrot.lane.b32.xlu0 %v6834_v10, %s6671_s25  ;;  %6011 = vmatprep.subr.mxu1 %v6649_v7 }
 0x16c   : > { %v1058_v29 = vpop.permute.xlu1 %1057  ;;  %v821_v30 = vpop.permute.xlu0 %820  ;;  %5990 = vmatmul.mubr.msk.f32.gmra.mxu1 %vm588_vm2, %v6861_v18 }
 0x16d   : > { %6012 = vmatpush3.xpose.msk.msra.mxu1 %vm588_vm2, %v823_v24  ;;  %6013 = vmatprep.mubr.msk.f32.mxu1 %vm6650_vm1, %v6649_v7 }
 0x16e   : > { %1893 = vrot.lane.b32.xlu0 %v6840_v12, %s6671_s25  ;;  %6037 = vmatprep.subr.mxu1 %v6649_v7  ;;  %s485_s25 = sand.u32 1, %s6639_s19  }
 0x170   : > { %v1297_v31 = vpop.permute.xlu1 %1296  ;;  %v1052_v32 = vpop.permute.xlu0 %1051  ;;  %6014 = vmatmul.mubr.msk.f32.vlgmr.msra.gmra.mxu1 %vm588_vm2, %v817_v26 }
 0x171   : > { %6038 = vmatpush3.xpose.msk.msra.mxu1 %vm588_vm2, %v1062_v25  ;;  %6016 = vmatprep.mubr.msk.f32.mxu1 %vm6650_vm1, %v6649_v7 }
 0x172   : > { %6039 = vmatprep.subr.mxu1 %v6649_v7 }
 0x174   : > { %v1295_v33 = vpop.permute.xlu1 %1294  ;;  %v1054_v34 = vpop.permute.xlu0 %1053  ;;  %6017 = vmatmul.mubr.msk.f32.gmra.mxu1 %vm588_vm2, %v819_v28 }
 0x175   : > { %6040 = vmatpush3.xpose.msk.msra.mxu1 %vm588_vm2, %v1060_v27  ;;  %6019 = vmatprep.mubr.msk.f32.mxu1 %vm6650_vm1, %v6649_v7 }
 0x176   : > { %6041 = vmatprep.subr.mxu1 %v6649_v7 }
 0x178   : > { %v1293_v35 = vpop.permute.xlu1 %1292  ;;  %v1056_v36 = vpop.permute.xlu0 %1055  ;;  %6020 = vmatmul.mubr.msk.f32.gmra.mxu1 %vm588_vm2, %v821_v30 }
 0x179   : > { %6042 = vmatpush3.xpose.msk.msra.mxu1 %vm588_vm2, %v1058_v29  ;;  %6043 = vmatprep.mubr.msk.f32.mxu1 %vm6650_vm1, %v6649_v7 }
 0x17a   : > { %6067 = vmatprep.subr.mxu1 %v6649_v7 }
 0x17c   : > { %v1532_v37 = vpop.permute.xlu1 %1531  ;;  %v1287_v38 = vpop.permute.xlu0 %1286  ;;  %6044 = vmatmul.mubr.msk.f32.vlgmr.msra.gmra.mxu1 %vm588_vm2, %v1052_v32 }
 0x17d   : > { %6068 = vmatpush3.xpose.msk.msra.mxu1 %vm588_vm2, %v1297_v31  ;;  %6046 = vmatprep.mubr.msk.f32.mxu1 %vm6650_vm1, %v6649_v7 }
 0x17e   : > { %6069 = vmatprep.subr.mxu1 %v6649_v7 }
 0x180   : > { %v1530_v39 = vpop.permute.xlu1 %1529  ;;  %v1289_v40 = vpop.permute.xlu0 %1288  ;;  %6047 = vmatmul.mubr.msk.f32.gmra.mxu1 %vm588_vm2, %v1054_v34 }
 0x181   : > { %6070 = vmatpush3.xpose.msk.msra.mxu1 %vm588_vm2, %v1295_v33  ;;  %6049 = vmatprep.mubr.msk.f32.mxu1 %vm6650_vm1, %v6649_v7 }
 0x182   : > { %6071 = vmatprep.subr.mxu1 %v6649_v7 }
 0x184   : > { %v1528_v41 = vpop.permute.xlu1 %1527  ;;  %v1291_v42 = vpop.permute.xlu0 %1290  ;;  %6050 = vmatmul.mubr.msk.f32.gmra.mxu1 %vm588_vm2, %v1056_v36 }
 0x185   : > { %6072 = vmatpush3.xpose.msk.msra.mxu1 %vm588_vm2, %v1293_v35  ;;  %6073 = vmatprep.mubr.msk.f32.mxu1 %vm6650_vm1, %v6649_v7 }
 0x186   : > { %6097 = vmatprep.subr.mxu1 %v6649_v7 }
 0x188   : > { %v1767_v43 = vpop.permute.xlu1 %1766  ;;  %v1522_v44 = vpop.permute.xlu0 %1521  ;;  %6074 = vmatmul.mubr.msk.f32.vlgmr.msra.gmra.mxu1 %vm588_vm2, %v1287_v38 }
 0x189   : > { %6098 = vmatpush3.xpose.msk.msra.mxu1 %vm588_vm2, %v1532_v37  ;;  %6076 = vmatprep.mubr.msk.f32.mxu1 %vm6650_vm1, %v6649_v7 }
 0x18a   : > { %6099 = vmatprep.subr.mxu1 %v6649_v7 }
 0x18c   : > { %v1765_v45 = vpop.permute.xlu1 %1764  ;;  %v1524_v46 = vpop.permute.xlu0 %1523  ;;  %6077 = vmatmul.mubr.msk.f32.gmra.mxu1 %vm588_vm2, %v1289_v40 }
 0x18d   : > { %6100 = vmatpush3.xpose.msk.msra.mxu1 %vm588_vm2, %v1530_v39  ;;  %6079 = vmatprep.mubr.msk.f32.mxu1 %vm6650_vm1, %v6649_v7 }
 0x18e   : > { %6101 = vmatprep.subr.mxu1 %v6649_v7 }
 0x190   : > { %v1763_v47 = vpop.permute.xlu1 %1762  ;;  %v1526_v48 = vpop.permute.xlu0 %1525  ;;  %6080 = vmatmul.mubr.msk.f32.gmra.mxu1 %vm588_vm2, %v1291_v42 }
 0x191   : > { %6102 = vmatpush3.xpose.msk.msra.mxu1 %vm588_vm2, %v1528_v41  ;;  %6103 = vmatprep.mubr.msk.f32.mxu1 %vm6650_vm1, %v6649_v7 }
 0x192   : > { %6127 = vmatprep.subr.mxu1 %v6649_v7 }
 0x194   : > { %v2002_v49 = vpop.permute.xlu1 %2001  ;;  %v1757_v50 = vpop.permute.xlu0 %1756  ;;  %6104 = vmatmul.mubr.msk.f32.vlgmr.msra.gmra.mxu1 %vm588_vm2, %v1522_v44 }
 0x195   : > { %6128 = vmatpush3.xpose.msk.msra.mxu1 %vm588_vm2, %v1767_v43  ;;  %6106 = vmatprep.mubr.msk.f32.mxu1 %vm6650_vm1, %v6649_v7 }
 0x196   : > { %6129 = vmatprep.subr.mxu1 %v6649_v7 }
 0x198   : > { %v2000_v51 = vpop.permute.xlu1 %1999  ;;  %v1759_v52 = vpop.permute.xlu0 %1758  ;;  %6107 = vmatmul.mubr.msk.f32.gmra.mxu1 %vm588_vm2, %v1524_v46 }
 0x199   : > { %6130 = vmatpush3.xpose.msk.msra.mxu1 %vm588_vm2, %v1765_v45  ;;  %6109 = vmatprep.mubr.msk.f32.mxu1 %vm6650_vm1, %v6649_v7 }
 0x19a   : > { %6131 = vmatprep.subr.mxu1 %v6649_v7 }
 0x19c   : > { %v1998_v53 = vpop.permute.xlu1 %1997  ;;  %v1761_v54 = vpop.permute.xlu0 %1760  ;;  %6110 = vmatmul.mubr.msk.f32.gmra.mxu1 %vm588_vm2, %v1526_v48 }
 0x19d   : > { %6132 = vmatpush3.xpose.msk.msra.mxu1 %vm588_vm2, %v1763_v47  ;;  %6133 = vmatprep.mubr.msk.f32.mxu1 %vm6650_vm1, %v6649_v7 }
 0x19e   : > { %6157 = vmatprep.subr.mxu1 %v6649_v7 }
 0x1a0   : > { %v2237_v55 = vpop.permute.xlu1 %2236  ;;  %v1992_v56 = vpop.permute.xlu0 %1991  ;;  %6134 = vmatmul.mubr.msk.f32.vlgmr.msra.gmra.mxu1 %vm588_vm2, %v1757_v50 }
 0x1a1   : > { %6158 = vmatpush3.xpose.msk.msra.mxu1 %vm588_vm2, %v2002_v49  ;;  %6136 = vmatprep.mubr.msk.f32.mxu1 %vm6650_vm1, %v6649_v7 }
 0x1a2   : > { %6159 = vmatprep.subr.mxu1 %v6649_v7 }
 0x1a4   : > { %v2235_v57 = vpop.permute.xlu1 %2234  ;;  %v1994_v58 = vpop.permute.xlu0 %1993  ;;  %6137 = vmatmul.mubr.msk.f32.gmra.mxu1 %vm588_vm2, %v1759_v52 }
 0x1a5   : > { %6160 = vmatpush3.xpose.msk.msra.mxu1 %vm588_vm2, %v2000_v51  ;;  %6139 = vmatprep.mubr.msk.f32.mxu1 %vm6650_vm1, %v6649_v7 }
 0x1a6   : > { %6161 = vmatprep.subr.mxu1 %v6649_v7 }
 0x1a8   : > { %v1996_v59 = vpop.permute.xlu0 %1995  ;;  %6140 = vmatmul.mubr.msk.f32.gmra.mxu1 %vm588_vm2, %v1761_v54  ;;  %v2233_v60 = vpop.permute.xlu1 %2232 }
 0x1a9   : > { %6162 = vmatpush3.xpose.msk.msra.mxu1 %vm588_vm2, %v1998_v53  ;;  %6163 = vmatprep.mubr.msk.f32.mxu1 %vm6650_vm1, %v6649_v7 }
 0x1aa   : > { %6187 = vmatprep.subr.mxu1 %v6649_v7 }
 0x1ac   : > { %v2227_v61 = vpop.permute.xlu0 %2226  ;;  %6164 = vmatmul.mubr.msk.f32.vlgmr.msra.gmra.mxu1 %vm588_vm2, %v1992_v56  ;;  %v2229_v62 = vpop.permute.xlu1 %2228 }
 0x1ad   : > { %6188 = vmatpush3.xpose.msk.msra.mxu1 %vm588_vm2, %v2237_v55  ;;  %6166 = vmatprep.mubr.msk.f32.mxu1 %vm6650_vm1, %v6649_v7 }
 0x1ae   : > { %6189 = vmatprep.subr.mxu1 %v6649_v7 }
 0x1b0   : > { %v2231_v63 = vpop.permute.xlu0 %2230  ;;  %6167 = vmatmul.mubr.msk.f32.gmra.mxu1 %vm588_vm2, %v1994_v58  ;;  %v721_v1 = vpop.permute.xlu1 %720 }
 0x1b1   : > { %6190 = vmatpush3.xpose.msk.msra.mxu1 %vm588_vm2, %v2235_v57  ;;  %6169 = vmatprep.mubr.msk.f32.mxu1 %vm6650_vm1, %v6649_v7 }
 0x1b2   : > { %6191 = vmatprep.subr.mxu1 %v6649_v7 }
 0x1b4   : > { %v723_v0 = vpop.permute.xlu0 %722  ;;  %6170 = vmatmul.mubr.msk.f32.gmra.mxu1 %vm588_vm2, %v1996_v59 }
 0x1b5   : > { %5993 = vmatpush3.msra.mxu0 %v723_v0  ;;  %6192 = vmatpush3.xpose.msk.msra.mxu1 %vm588_vm2, %v2233_v60 }
 0x1b6   : > { %5994 = vmatprep.subr.mxu0 %v6649_v7  ;;  %6193 = vmatprep.mubr.msk.f32.mxu1 %vm6650_vm1, %v6649_v7 }
 0x1b7   : > { %5995 = vmatpush3.msra.mxu0 %v721_v1 }
 0x1b8   : > { %5996 = vmatprep.subr.mxu0 %v6649_v7  ;;  %v719_v2 = vpop.permute.xlu0 %718  ;;  %6194 = vmatmul.mubr.msk.f32.vlgmr.msra.gmra.mxu1 %vm588_vm2, %v2227_v61 }
 0x1b9   : > { %5997 = vmatpush3.msra.mxu0 %v719_v2  ;;  %6196 = vmatprep.mubr.msk.f32.mxu1 %vm6650_vm1, %v6649_v7 }
 0x1ba   : > { %6022 = vmatprep.subr.mxu0 %v6649_v7 }
 0x1bc   : > { %6197 = vmatmul.mubr.msk.f32.gmra.mxu1 %vm588_vm2, %v2229_v62 }
 0x1bd   : > { %6199 = vmatprep.mubr.msk.f32.mxu1 %vm6650_vm1, %v6649_v7 }
 0x1c0   : > { %6200 = vmatmul.mubr.msk.f32.gmra.mxu1 %vm588_vm2, %v2231_v63 }
 0x224   : > { %v7042_v3 = vpop.f32.mrf.mxu1 }
 0x225   : > { %v685_v4 = vsel %vm684_vm3, %v7042_v3, -inf }
 0x226   : > { %686 = vmax.xlane.f32.xlu1 %v685_v4  ;;  %v5985_v5 = vpop.f32.mrf.mxu1 }
 0x228   : > { %v7046_v6 = vpop.f32.mrf.mxu1 }
 0x229   : > { %v688_v8 = vsel %vm684_vm3, %v7046_v6, -inf }
 0x22a   : > { %689 = vmax.xlane.f32.xlu0 %v688_v8  ;;  %v5988_v9 = vpop.f32.mrf.mxu1  ;;  %v7124_v8 = vpop.permute.xlu0 %957 }
 0x22c   : > { %v7050_v11 = vpop.f32.mrf.mxu1 }
 0x22d   : > { %v691_v13 = vsel %vm684_vm3, %v7050_v11, -inf }
 0x22e   : > { %692 = vmax.xlane.f32.xlu0 %v691_v13  ;;  %v5991_v14 = vpop.f32.mrf.mxu1 }
 0x230   : > { %v7054_v16 = vpop.f32.mrf.mxu1 }
 0x231   : > { %v920_v17 = vsel %vm684_vm3, %v7054_v16, -inf }
 0x232   : > { %921 = vmax.xlane.f32.xlu1 %v920_v17  ;;  %v6015_v18 = vpop.f32.mrf.mxu1  ;;  %v7130_v17 = vpop.permute.xlu0 %953 }
 0x234   : > { %v7058_v19 = vpop.f32.mrf.mxu1 }
 0x235   : > { %v923_v20 = vsel %vm684_vm3, %v7058_v19, -inf }
 0x236   : > { %924 = vmax.xlane.f32.xlu0 %v923_v20  ;;  %v6018_v21 = vpop.f32.mrf.mxu1 }
 0x237   : > { %v7136_v21 = vpop.permute.xlu0 %1192 }
 0x238   : > { %v7062_v22 = vpop.f32.mrf.mxu1 }
 0x239   : > { %v926_v23 = vsel %vm684_vm3, %v7062_v22, -inf }
 0x23a   : > { %927 = vmax.xlane.f32.xlu1 %v926_v23  ;;  %v6021_v24 = vpop.f32.mrf.mxu1 }
 0x23b   : > { %v7138_v23 = vpop.permute.xlu0 %1188 }
 0x23c   : > { %v7066_v25 = vpop.f32.mrf.mxu1 }
 0x23d   : > { %v1155_v26 = vsel %vm684_vm3, %v7066_v25, -inf }
 0x23e   : > { %1156 = vmax.xlane.f32.xlu0 %v1155_v26  ;;  %v6045_v27 = vpop.f32.mrf.mxu1  ;;  %v7142_v26 = vpop.permute.xlu1 %955 }
 0x23f   : > { %v7140_v24 = vpop.permute.xlu0 %1427 }
 0x240   : > { %v7070_v28 = vpop.f32.mrf.mxu1 }
 0x241   : > { %v1158_v29 = vsel %vm684_vm3, %v7070_v28, -inf }
 0x242   : > { %1159 = vmax.xlane.f32.xlu1 %v1158_v29  ;;  %v6048_v30 = vpop.f32.mrf.mxu1  ;;  %v7146_v29 = vpop.permute.xlu1 %1190 }
 0x243   : > { %v7144_v27 = vpop.permute.xlu0 %1423 }
 0x244   : > { %v7074_v31 = vpop.f32.mrf.mxu1 }
 0x245   : > { %v1161_v32 = vsel %vm684_vm3, %v7074_v31, -inf }
 0x246   : > { %1162 = vmax.xlane.f32.xlu0 %v1161_v32  ;;  %v6051_v33 = vpop.f32.mrf.mxu1 }
 0x247   : > { %v7148_v30 = vpop.permute.xlu0 %1662  ;;  %v7152_v33 = vpop.permute.xlu1 %1425 }
 0x248   : > { %v7078_v34 = vpop.f32.mrf.mxu1 }
 0x249   : > { %v1390_v35 = vsel %vm684_vm3, %v7078_v34, -inf }
 0x24a   : > { %1391 = vmax.xlane.f32.xlu1 %v1390_v35  ;;  %v6075_v36 = vpop.f32.mrf.mxu1 }
 0x24c   : > { %v7082_v37 = vpop.f32.mrf.mxu1 }
 0x24d   : > { %v1393_v38 = vsel %vm684_vm3, %v7082_v37, -inf }
 0x24e   : > { %1394 = vmax.xlane.f32.xlu0 %v1393_v38  ;;  %v6078_v39 = vpop.f32.mrf.mxu1  ;;  %v7158_v38 = vpop.permute.xlu0 %1658 }
 0x24f   : > { %v7160_v39 = vpop.permute.xlu1 %1660 }
 0x250   : > { %v7086_v40 = vpop.f32.mrf.mxu1 }
 0x251   : > { %v1396_v41 = vsel %vm684_vm3, %v7086_v40, -inf }
 0x252   : > { %1397 = vmax.xlane.f32.xlu1 %v1396_v41  ;;  %v6081_v42 = vpop.f32.mrf.mxu1 }
 0x253   : > { %v7164_v42 = vpop.permute.xlu0 %1897 }
 0x254   : > { %v7090_v43 = vpop.f32.mrf.mxu1 }
 0x255   : > { %v1625_v44 = vsel %vm684_vm3, %v7090_v43, -inf }
 0x256   : > { %1626 = vmax.xlane.f32.xlu0 %v1625_v44  ;;  %v6105_v45 = vpop.f32.mrf.mxu1 }
 0x257   : > { %v7168_v45 = vpop.permute.xlu1 %1895 }
 0x258   : > { %v7094_v46 = vpop.f32.mrf.mxu1 }
 0x259   : > { %v1628_v47 = vsel %vm684_vm3, %v7094_v46, -inf }
 0x25a   : > { %1629 = vmax.xlane.f32.xlu1 %v1628_v47  ;;  %v6108_v48 = vpop.f32.mrf.mxu1  ;;  %v7170_v47 = vpop.permute.xlu0 %1893 }
 0x25c   : > { %v7098_v49 = vpop.f32.mrf.mxu1 }
 0x25d   : > { %v1631_v50 = vsel %vm684_vm3, %v7098_v49, -inf }
 0x25e   : > { %1632 = vmax.xlane.f32.xlu0 %v1631_v50  ;;  %v6111_v51 = vpop.f32.mrf.mxu1 }
 0x260   : > { %v7102_v52 = vpop.f32.mrf.mxu1 }
 0x261   : > { %v1860_v53 = vsel %vm684_vm3, %v7102_v52, -inf }
 0x262   : > { %1861 = vmax.xlane.f32.xlu1 %v1860_v53  ;;  %v6135_v54 = vpop.f32.mrf.mxu1 }
 0x264   : > { %v7106_v55 = vpop.f32.mrf.mxu1 }
 0x265   : > { %v1863_v56 = vsel %vm684_vm3, %v7106_v55, -inf }
 0x266   : > { %1864 = vmax.xlane.f32.xlu0 %v1863_v56  ;;  %v6138_v57 = vpop.f32.mrf.mxu1 }
 0x268   : > { %v7110_v58 = vpop.f32.mrf.mxu1 }
 0x269   : > { %v1866_v59 = vsel %vm684_vm3, %v7110_v58, -inf }
 0x26a   : > { %1867 = vmax.xlane.f32.xlu1 %v1866_v59  ;;  %v6141_v60 = vpop.f32.mrf.mxu1 }
 0x26c   : > { %v7114_v61 = vpop.f32.mrf.mxu1 }
 0x26d   : > { %v2095_v62 = vsel %vm684_vm3, %v7114_v61, -inf }
 0x26e   : > { %2096 = vmax.xlane.f32.xlu0 %v2095_v62  ;;  %v6165_v63 = vpop.f32.mrf.mxu1 }
 0x270   : > { %v7118_v0 = vpop.f32.mrf.mxu1 }
 0x271   : > { %v2098_v32 = vsel %vm684_vm3, %v7118_v0, -inf }
 0x272   : > { %v6168_v1 = vpop.f32.mrf.mxu1 }
 0x274   : > { %v7120_v2 = vpop.f32.mrf.mxu1 }
 0x275   : > { %v2101_v35 = vsel %vm684_vm3, %v7120_v2, -inf }
 0x276   : > { %v6171_v4 = vpop.f32.mrf.mxu1 }
 0x278   : > { %v7122_v5 = vpop.f32.mrf.mxu1 }
 0x279   : > { %v2330_v36 = vsel %vm684_vm3, %v7122_v5, -inf }
 0x27a   : > { %v6195_v9 = vpop.f32.mrf.mxu1 }
 0x27b   : > { %2130 = vrot.lane.b32.xlu1 %v6844_v15, %s6672_s26 }
 0x27c   : > { %v7128_v13 = vpop.f32.mrf.mxu1 }
 0x27d   : > { %v2333_v41 = vsel %vm684_vm3, %v7128_v13, -inf }
 0x27e   : > { %v6198_v14 = vpop.f32.mrf.mxu1 }
 0x280   : > { %v7132_v18 = vpop.f32.mrf.mxu1 }
 0x281   : > { %v2336_v44 = vsel %vm684_vm3, %v7132_v18, -inf }
 0x282   : > { %v6201_v20 = vpop.f32.mrf.mxu1 }
 0x284   : > { %2132 = vrot.lane.b32.xlu0 %v6834_v10, %s6672_s26 }
 0x29f   : > { %2099 = vmax.xlane.f32.xlu1 %v2098_v32 }
 0x2a3   : > { %2102 = vmax.xlane.f32.xlu0 %v2101_v35  ;;  %2331 = vmax.xlane.f32.xlu1 %v2330_v36 }
 0x2a7   : > { %2334 = vmax.xlane.f32.xlu0 %v2333_v41 }
 0x2ab   : > { %2337 = vmax.xlane.f32.xlu0 %v2336_v44 }
 0x2af   : > { %v687_v48 = vpop.xlane.xlu1 %686 }
 0x2b0   : > { %v694_v50 = vsub.f32 %v7042_v3, %v687_v48 }
 0x2b2   : > { %v697_v51 = vmul.f32 1.442695, %v694_v50 }
 0x2b3   : > { %v690_v53 = vpop.xlane.xlu0 %689 }
 0x2b4   : > { %6476 = vpow2.f32 %v697_v51  ;;  %v695_v54 = vsub.f32 %v7046_v6, %v690_v53 }
 0x2b6   : > { %v699_v56 = vmul.f32 1.442695, %v695_v54 }
 0x2b7   : > { %v693_v57 = vpop.xlane.xlu0 %692 }
 0x2b8   : > { %6478 = vpow2.f32 %v699_v56  ;;  %v696_v59 = vsub.f32 %v7050_v11, %v693_v57 }
 0x2ba   : > { %v701_v60 = vmul.f32 1.442695, %v696_v59 }
 0x2bb   : > { %v922_v62 = vpop.xlane.xlu1 %921 }
 0x2bc   : > { %6480 = vpow2.f32 %v701_v60  ;;  %v929_v63 = vsub.f32 %v7054_v16, %v922_v62 }
 0x2be   : > { %v932_v1 = vmul.f32 1.442695, %v929_v63 }
 0x2bf   : > { %v925_v4 = vpop.xlane.xlu0 %924 }
 0x2c0   : > { %6482 = vpow2.f32 %v932_v1  ;;  %v930_v3 = vsub.f32 %v7058_v19, %v925_v4 }
 0x2c1   : > { %v7177_v9 = vpop.eup %6476 }
 0x2c2   : > { %v934_v14 = vmul.f32 1.442695, %v930_v3  ;;  %v703_v6 = vsel %vm684_vm3, %v7177_v9, 0.0 }
 0x2c3   : > { %v928_v20 = vpop.xlane.xlu1 %927  ;;  %704 = vadd.xlane.f32.xlu1 %v703_v6 }
 0x2c4   : > { %6484 = vpow2.f32 %v934_v14  ;;  %v931_v11 = vsub.f32 %v7062_v22, %v928_v20 }
 0x2c5   : > { %v7182_v32 = vpop.eup %6478 }
 0x2c6   : > { %v936_v35 = vmul.f32 1.442695, %v931_v11  ;;  %v706_v16 = vsel %vm684_vm3, %v7182_v32, 0.0 }
 0x2c7   : > { %v1157_v36 = vpop.xlane.xlu0 %1156  ;;  %707 = vadd.xlane.f32.xlu1 %v706_v16 }
 0x2c8   : > { %6486 = vpow2.f32 %v936_v35  ;;  %v1164_v19 = vsub.f32 %v7066_v25, %v1157_v36 }
 0x2c9   : > { %v7187_v41 = vpop.eup %6480 }
 0x2ca   : > { %v1167_v44 = vmul.f32 1.442695, %v1164_v19  ;;  %v709_v48 = vsel %vm684_vm3, %v7187_v41, 0.0 }
 0x2cb   : > { %v1160_v50 = vpop.xlane.xlu1 %1159  ;;  %710 = vadd.xlane.f32.xlu0 %v709_v48 }
 0x2cc   : > { %6488 = vpow2.f32 %v1167_v44  ;;  %v1165_v22 = vsub.f32 %v7070_v28, %v1160_v50 }
 0x2cd   : > { %v7192_v51 = vpop.eup %6482 }
 0x2ce   : > { %v1169_v53 = vmul.f32 1.442695, %v1165_v22  ;;  %v938_v54 = vsel %vm684_vm3, %v7192_v51, 0.0 }
 0x2cf   : > { %v1163_v56 = vpop.xlane.xlu0 %1162  ;;  %939 = vadd.xlane.f32.xlu1 %v938_v54 }
 0x2d0   : > { %6490 = vpow2.f32 %v1169_v53  ;;  %v1166_v25 = vsub.f32 %v7074_v31, %v1163_v56 }
 0x2d1   : > { %v7197_v57 = vpop.eup %6484 }
 0x2d2   : > { %v1171_v59 = vmul.f32 1.442695, %v1166_v25  ;;  %v941_v60 = vsel %vm684_vm3, %v7197_v57, 0.0 }
 0x2d3   : > { %v1392_v62 = vpop.xlane.xlu1 %1391  ;;  %942 = vadd.xlane.f32.xlu0 %v941_v60 }
 0x2d4   : > { %6492 = vpow2.f32 %v1171_v59  ;;  %v1399_v28 = vsub.f32 %v7078_v34, %v1392_v62 }
 0x2d5   : > { %v7202_v63 = vpop.eup %6486 }
 0x2d6   : > { %v1402_v1 = vmul.f32 1.442695, %v1399_v28  ;;  %v944_v4 = vsel %vm684_vm3, %v7202_v63, 0.0 }
 0x2d7   : > { %v1395_v3 = vpop.xlane.xlu0 %1394  ;;  %945 = vadd.xlane.f32.xlu1 %v944_v4 }
 0x2d8   : > { %6494 = vpow2.f32 %v1402_v1  ;;  %v1400_v31 = vsub.f32 %v7082_v37, %v1395_v3 }
 0x2d9   : > { %v7207_v14 = vpop.eup %6488 }
 0x2da   : > { %v1404_v6 = vmul.f32 1.442695, %v1400_v31  ;;  %v1173_v20 = vsel %vm684_vm3, %v7207_v14, 0.0 }
 0x2db   : > { %v1398_v11 = vpop.xlane.xlu1 %1397  ;;  %1174 = vadd.xlane.f32.xlu1 %v1173_v20 }
 0x2dc   : > { %6496 = vpow2.f32 %v1404_v6  ;;  %v1401_v34 = vsub.f32 %v7086_v40, %v1398_v11 }
 0x2dd   : > { %v7212_v35 = vpop.eup %6490 }
 0x2de   : > { %v1406_v16 = vmul.f32 1.442695, %v1401_v34  ;;  %v1176_v36 = vsel %vm684_vm3, %v7212_v35, 0.0 }
 0x2df   : > { %1177 = vadd.xlane.f32.xlu1 %v1176_v36  ;;  %v1627_v44 = vpop.xlane.xlu0 %1626 }
 0x2e0   : > { %6498 = vpow2.f32 %v1406_v16  ;;  %v1634_v20 = vsub.f32 %v7090_v43, %v1627_v44 }
 0x2e1   : > { %v7216_v37 = vpop.eup %6492 }
 0x2e2   : > { %v1179_v19 = vsel %vm684_vm3, %v7216_v37, 0.0 }
 0x2e3   : > { %1180 = vadd.xlane.f32.xlu0 %v1179_v19  ;;  %v1630_v25 = vpop.xlane.xlu1 %1629 }
 0x2e4   : > { %v1635_v11 = vsub.f32 %v7094_v46, %v1630_v25 }
 0x2e5   : > { %v7220_v48 = vpop.eup %6494 }
 0x2e6   : > { %v1408_v40 = vsel %vm684_vm3, %v7220_v48, 0.0  ;;  %v1639_v34 = vmul.f32 1.442695, %v1635_v11 }
 0x2e7   : > { %v1633_v50 = vpop.xlane.xlu0 %1632  ;;  %1409 = vadd.xlane.f32.xlu1 %v1408_v40 }
 0x2e8   : > { %v1636_v22 = vsub.f32 %v7098_v49, %v1633_v50 }
 0x2e9   : > { %v7225_v53 = vpop.eup %6496 }
 0x2ea   : > { %v1641_v54 = vmul.f32 1.442695, %v1636_v22  ;;  %v1411_v56 = vsel %vm684_vm3, %v7225_v53, 0.0 }
 0x2eb   : > { %1412 = vadd.xlane.f32.xlu1 %v1411_v56  ;;  %v1862_v62 = vpop.xlane.xlu1 %1861 }
 0x2ec   : > { %6500 = vpow2.f32 %v1641_v54  ;;  %v1869_v16 = vsub.f32 %v7102_v52, %v1862_v62 }
 0x2ed   : > { %v7229_v59 = vpop.eup %6498 }
 0x2ee   : > { %v1414_v60 = vsel %vm684_vm3, %v7229_v59, 0.0  ;;  %v1872_v19 = vmul.f32 1.442695, %v1869_v16 }
 0x2ef   : > { %1415 = vadd.xlane.f32.xlu0 %v1414_v60  ;;  %v1865_v36 = vpop.xlane.xlu0 %1864 }
 0x2f0   : > { %v1870_v40 = vsub.f32 %v7106_v55, %v1865_v36 }
 0x2f2   : > { %v1874_v22 = vmul.f32 1.442695, %v1870_v40 }
 0x2f3   : > { %v1868_v28 = vpop.xlane.xlu1 %1867 }
 0x2f4   : > { %v1871_v1 = vsub.f32 %v7110_v58, %v1868_v28  ;;  %v1637_v58 = vmul.f32 1.442695, %v1634_v20 }
 0x2f6   : > { %v1876_v49 = vmul.f32 1.442695, %v1871_v1 }
 0x2f7   : > { %v2097_v50 = vpop.xlane.xlu0 %2096 }
 0x2f8   : > { %6502 = vpow2.f32 %v1876_v49  ;;  %v2104_v54 = vsub.f32 %v7114_v61, %v2097_v50  ;;  %v7261_v61 = vpop.permute.xlu1 %2130 }
 0x2f9   : > { %v7234_v4 = vpop.eup %6500  ;;  %6504 = vpow2.f32 %v1637_v58 }
 0x2fa   : > { %v1649_v3 = vsel %vm684_vm3, %v7234_v4, 0.0  ;;  %6506 = vpow2.f32 %v1639_v34  ;;  %v2107_v43 = vmul.f32 1.442695, %v2104_v54 }
 0x2fb   : > { %1650 = vadd.xlane.f32.xlu0 %v1649_v3  ;;  %6508 = vpow2.f32 %v1872_v19 }
 0x2fc   : > { %2128 = vrot.lane.b32.xlu1 %v6840_v12, %s6672_s26  ;;  %6510 = vpow2.f32 %v1874_v22 }
 0x2fd   : > { %6512 = vpow2.f32 %v2107_v43 }
 0x305   : > { %v7240_v31 = vpop.eup %6502 }
 0x306   : > { %v1884_v6 = vsel %vm684_vm3, %v7240_v31, 0.0  ;;  %v7249_v44 = vpop.eup %6504 }
 0x307   : > { %1885 = vadd.xlane.f32.xlu0 %v1884_v6  ;;  %v1643_v46 = vsel %vm684_vm3, %v7249_v44, 0.0  ;;  %v7255_v52 = vpop.eup %6506 }
 0x308   : > { %v1646_v55 = vsel %vm684_vm3, %v7255_v52, 0.0  ;;  %v7259_v56 = vpop.eup %6508 }
 0x309   : > { %v1878_v25 = vsel %vm684_vm3, %v7259_v56, 0.0  ;;  %v7265_v60 = vpop.eup %6510 }
 0x30a   : > { %v1881_v49 = vsel %vm684_vm3, %v7265_v60, 0.0  ;;  %v7272_v3 = vpop.eup %6512 }
 0x30b   : > { %v2113_v36 = vsel %vm684_vm3, %v7272_v3, 0.0 }
 0x31d   : > { %2367 = vrot.lane.b32.xlu0 %v6834_v10, %s6673_s20  ;;  %v7267_v10 = vpop.permute.xlu0 %2132 }
 0x320   : > { %1644 = vadd.xlane.f32.xlu1 %v1643_v46 }
 0x324   : > { %1647 = vadd.xlane.f32.xlu1 %v1646_v55 }
 0x328   : > { %v2100_v62 = vpop.xlane.xlu1 %2099  ;;  %1879 = vadd.xlane.f32.xlu1 %v1878_v25 }
 0x329   : > { %v2105_v28 = vsub.f32 %v7118_v0, %v2100_v62 }
 0x32b   : > { %v2109_v1 = vmul.f32 1.442695, %v2105_v28 }
 0x32c   : > { %v2103_v6 = vpop.xlane.xlu0 %2102  ;;  %1882 = vadd.xlane.f32.xlu1 %v1881_v49  ;;  %v2332_v20 = vpop.xlane.xlu1 %2331 }
 0x32d   : > { %6514 = vpow2.f32 %v2109_v1  ;;  %v2106_v58 = vsub.f32 %v7120_v2, %v2103_v6  ;;  %v2339_v11 = vsub.f32 %v7122_v5, %v2332_v20 }
 0x32f   : > { %v2111_v34 = vmul.f32 1.442695, %v2106_v58  ;;  %v2342_v16 = vmul.f32 1.442695, %v2339_v11 }
 0x330   : > { %2114 = vadd.xlane.f32.xlu1 %v2113_v36  ;;  %v2335_v0 = vpop.xlane.xlu0 %2334 }
 0x331   : > { %6516 = vpow2.f32 %v2111_v34  ;;  %v2340_v19 = vsub.f32 %v7128_v13, %v2335_v0 }
 0x332   : > { %6518 = vpow2.f32 %v2342_v16 }
 0x333   : > { %v2344_v40 = vmul.f32 1.442695, %v2340_v19 }
 0x334   : > { %v2338_v50 = vpop.xlane.xlu0 %2337 }
 0x335   : > { %6520 = vpow2.f32 %v2344_v40  ;;  %v2341_v22 = vsub.f32 %v7132_v18, %v2338_v50 }
 0x337   : > { %v2346_v54 = vmul.f32 1.442695, %v2341_v22 }
 0x339   : > { %6522 = vpow2.f32 %v2346_v54 }
 0x33a   : > { %v7280_v2 = vpop.eup %6514 }
 0x33b   : > { %v2116_v5 = vsel %vm684_vm3, %v7280_v2, 0.0 }
 0x33c   : > { %2117 = vadd.xlane.f32.xlu1 %v2116_v5 }
 0x33e   : > { %v7284_v43 = vpop.eup %6516 }
 0x33f   : > { %v7286_v46 = vpop.eup %6518  ;;  %v2119_v13 = vsel %vm684_vm3, %v7284_v43, 0.0 }
 0x340   : > { %v2348_v55 = vsel %vm684_vm3, %v7286_v46, 0.0  ;;  %2120 = vadd.xlane.f32.xlu0 %v2119_v13 }
 0x341   : > { %2349 = vadd.xlane.f32.xlu1 %v2348_v55 }
 0x342   : > { %v7292_v18 = vpop.eup %6520 }
 0x343   : > { %v2351_v25 = vsel %vm684_vm3, %v7292_v18, 0.0 }
 0x345   : > { %2352 = vadd.xlane.f32.xlu1 %v2351_v25 }
 0x346   : > { %v7296_v62 = vpop.eup %6522 }
 0x347   : > { %v2354_v28 = vsel %vm684_vm3, %v7296_v62, 0.0 }
 0x348   : > { %2355 = vadd.xlane.f32.xlu0 %v2354_v28 }
 0x34c   : > { %v705_v1 = vpop.xlane.xlu1 %704 }
 0x34d   : > { %6524 = vrcp.f32 %v705_v1 }
 0x350   : > { %v708_v49 = vpop.xlane.xlu1 %707 }
 0x351   : > { %6526 = vrcp.f32 %v708_v49 }
 0x354   : > { %v711_v6 = vpop.xlane.xlu0 %710 }
 0x355   : > { %6528 = vrcp.f32 %v711_v6 }
 0x356   : > { %2365 = vrot.lane.b32.xlu1 %v6844_v15, %s6673_s20 }
 0x358   : > { %v940_v20 = vpop.xlane.xlu1 %939 }
 0x359   : > { %6530 = vrcp.f32 %v940_v20 }
 0x35a   : > { %v6525_v58 = vpop.eup %6524 }
 0x35b   : > { %v715_v11 = vmul.f32 %v6525_v58, %v7177_v9 }
 0x35c   : > { %v943_v34 = vpop.xlane.xlu0 %942 }
 0x35d   : > { %6532 = vrcp.f32 %v943_v34  ;;  %5999 = vmatmul.mubr.msk.f32.vlgmr.msra.gmra.mxu0 %vm684_vm3, %v715_v11 }
 0x35e   : > { %v6527_v16 = vpop.eup %6526  ;;  %6023 = vmatpush3.msra.mxu0 %v7124_v8  ;;  %2363 = vrot.lane.b32.xlu0 %v6840_v12, %s6673_s20 }
 0x35f   : > { %6024 = vmatprep.subr.mxu0 %v6649_v7  ;;  %6001 = vmatprep.mubr.msk.f32.mxu0 %vm6650_vm1, %v6649_v7  ;;  %v716_v15 = vmul.f32 %v6527_v16, %v7182_v32 }
 0x360   : > { %6025 = vmatpush3.msra.mxu0 %v7142_v26  ;;  %v946_v9 = vpop.xlane.xlu1 %945 }
 0x361   : > { %6026 = vmatprep.subr.mxu0 %v6649_v7  ;;  %6534 = vrcp.f32 %v946_v9  ;;  %6002 = vmatmul.mubr.msk.f32.gmra.mxu0 %vm684_vm3, %v716_v15 }
 0x362   : > { %v6529_v36 = vpop.eup %6528  ;;  %6027 = vmatpush3.msra.mxu0 %v7130_v17  ;;  %6004 = vmatprep.mubr.msk.f32.mxu0 %vm6650_vm1, %v6649_v7 }
 0x363   : > { %v717_v12 = vmul.f32 %v6529_v36, %v7187_v41  ;;  %6052 = vmatprep.subr.mxu0 %v6649_v7 }
 0x364   : > { %v1175_v8 = vpop.xlane.xlu1 %1174 }
 0x365   : > { %6536 = vrcp.f32 %v1175_v8  ;;  %6005 = vmatmul.mubr.msk.f32.gmra.mxu0 %vm684_vm3, %v717_v12 }
 0x366   : > { %v6531_v26 = vpop.eup %6530  ;;  %6028 = vmatprep.mubr.msk.f32.mxu0 %vm6650_vm1, %v6649_v7 }
 0x367   : > { %v950_v32 = vmul.f32 %v6531_v26, %v7192_v51 }
 0x368   : > { %v1178_v0 = vpop.xlane.xlu1 %1177 }
 0x369   : > { %6538 = vrcp.f32 %v1178_v0  ;;  %6029 = vmatmul.mubr.msk.f32.vlgmr.msra.gmra.mxu0 %vm684_vm3, %v950_v32 }
 0x36a   : > { %v6533_v17 = vpop.eup %6532  ;;  %6053 = vmatpush3.msra.mxu0 %v7136_v21  ;;  %6031 = vmatprep.mubr.msk.f32.mxu0 %vm6650_vm1, %v6649_v7 }
 0x36b   : > { %6054 = vmatprep.subr.mxu0 %v6649_v7  ;;  %v951_v41 = vmul.f32 %v6533_v17, %v7197_v57 }
 0x36c   : > { %6055 = vmatpush3.msra.mxu0 %v7146_v29  ;;  %v1181_v19 = vpop.xlane.xlu0 %1180 }
 0x36d   : > { %6056 = vmatprep.subr.mxu0 %v6649_v7  ;;  %6540 = vrcp.f32 %v1181_v19  ;;  %6032 = vmatmul.mubr.msk.f32.gmra.mxu0 %vm684_vm3, %v951_v41 }
 0x36e   : > { %v6535_v51 = vpop.eup %6534  ;;  %6057 = vmatpush3.msra.mxu0 %v7138_v23  ;;  %6034 = vmatprep.mubr.msk.f32.mxu0 %vm6650_vm1, %v6649_v7 }
 0x36f   : > { %v952_v21 = vmul.f32 %v6535_v51, %v7202_v63  ;;  %6082 = vmatprep.subr.mxu0 %v6649_v7 }
 0x370   : > { %v1410_v40 = vpop.xlane.xlu1 %1409 }
 0x371   : > { %6542 = vrcp.f32 %v1410_v40  ;;  %6035 = vmatmul.mubr.msk.f32.gmra.mxu0 %vm684_vm3, %v952_v21 }
 0x372   : > { %v6537_v29 = vpop.eup %6536  ;;  %6058 = vmatprep.mubr.msk.f32.mxu0 %vm6650_vm1, %v6649_v7 }
 0x373   : > { %v1185_v57 = vmul.f32 %v6537_v29, %v7207_v14 }
 0x374   : > { %v1413_v50 = vpop.xlane.xlu1 %1412 }
 0x375   : > { %6544 = vrcp.f32 %v1413_v50  ;;  %6059 = vmatmul.mubr.msk.f32.vlgmr.msra.gmra.mxu0 %vm684_vm3, %v1185_v57 }
 0x376   : > { %v6539_v23 = vpop.eup %6538  ;;  %6083 = vmatpush3.msra.mxu0 %v7140_v24  ;;  %6061 = vmatprep.mubr.msk.f32.mxu0 %vm6650_vm1, %v6649_v7 }
 0x377   : > { %6084 = vmatprep.subr.mxu0 %v6649_v7  ;;  %v1186_v63 = vmul.f32 %v6539_v23, %v7212_v35 }
 0x378   : > { %6085 = vmatpush3.msra.mxu0 %v7152_v33  ;;  %v1416_v22 = vpop.xlane.xlu0 %1415 }
 0x379   : > { %6086 = vmatprep.subr.mxu0 %v6649_v7  ;;  %6546 = vrcp.f32 %v1416_v22  ;;  %6062 = vmatmul.mubr.msk.f32.gmra.mxu0 %vm684_vm3, %v1186_v63 }
 0x37a   : > { %v6541_v14 = vpop.eup %6540  ;;  %6087 = vmatpush3.msra.mxu0 %v7144_v27  ;;  %6064 = vmatprep.mubr.msk.f32.mxu0 %vm6650_vm1, %v6649_v7 }
 0x37b   : > { %v1187_v24 = vmul.f32 %v6541_v14, %v7216_v37  ;;  %6112 = vmatprep.subr.mxu0 %v6649_v7 }
 0x37d   : > { %6065 = vmatmul.mubr.msk.f32.gmra.mxu0 %vm684_vm3, %v1187_v24 }
 0x37e   : > { %v6543_v35 = vpop.eup %6542  ;;  %6088 = vmatprep.mubr.msk.f32.mxu0 %vm6650_vm1, %v6649_v7 }
 0x37f   : > { %v1420_v33 = vmul.f32 %v6543_v35, %v7220_v48 }
 0x381   : > { %6089 = vmatmul.mubr.msk.f32.vlgmr.msra.gmra.mxu0 %vm684_vm3, %v1420_v33 }
 0x382   : > { %v6545_v54 = vpop.eup %6544  ;;  %6113 = vmatpush3.msra.mxu0 %v7148_v30  ;;  %6091 = vmatprep.mubr.msk.f32.mxu0 %vm6650_vm1, %v6649_v7 }
 0x383   : > { %6114 = vmatprep.subr.mxu0 %v6649_v7  ;;  %v1421_v27 = vmul.f32 %v6545_v54, %v7225_v53 }
 0x384   : > { %6115 = vmatpush3.msra.mxu0 %v7160_v39  ;;  %v2129_v39 = vpop.permute.xlu1 %2128  ;;  %v1651_v53 = vpop.xlane.xlu0 %1650 }
 0x385   : > { %6116 = vmatprep.subr.mxu0 %v6649_v7  ;;  %6092 = vmatmul.mubr.msk.f32.gmra.mxu0 %vm684_vm3, %v1421_v27 }
 0x386   : > { %v6547_v37 = vpop.eup %6546  ;;  %6117 = vmatpush3.msra.mxu0 %v7158_v38  ;;  %6094 = vmatprep.mubr.msk.f32.mxu0 %vm6650_vm1, %v6649_v7 }
 0x387   : > { %v1422_v30 = vmul.f32 %v6547_v37, %v7229_v59  ;;  %6142 = vmatprep.subr.mxu0 %v6649_v7 }
 0x389   : > { %6095 = vmatmul.mubr.msk.f32.gmra.mxu0 %vm684_vm3, %v1422_v30 }
 0x38a   : > { %6118 = vmatprep.mubr.msk.f32.mxu0 %vm6650_vm1, %v6649_v7 }
 0x390   : > { %v1886_v25 = vpop.xlane.xlu0 %1885 }
 0x394   : > { %v2368_v20 = vpop.permute.xlu0 %2367 }
 0x3a9   : > { %v1645_v48 = vpop.xlane.xlu1 %1644 }
 0x3aa   : > { %6548 = vrcp.f32 %v1645_v48 }
 0x3ad   : > { %v1648_v5 = vpop.xlane.xlu1 %1647 }
 0x3ae   : > { %6550 = vrcp.f32 %v1648_v5 }
 0x3af   : > { %6552 = vrcp.f32 %v1651_v53 }
 0x3b1   : > { %v1880_v38 = vpop.xlane.xlu1 %1879 }
 0x3b2   : > { %6554 = vrcp.f32 %v1880_v38 }
 0x3b5   : > { %v1883_v13 = vpop.xlane.xlu1 %1882 }
 0x3b6   : > { %6556 = vrcp.f32 %v1883_v13 }
 0x3b7   : > { %v6549_v55 = vpop.eup %6548  ;;  %6558 = vrcp.f32 %v1886_v25 }
 0x3b8   : > { %v1655_v59 = vmul.f32 %v6549_v55, %v7249_v44 }
 0x3b9   : > { %v2115_v6 = vpop.xlane.xlu1 %2114 }
 0x3ba   : > { %6119 = vmatmul.mubr.msk.f32.vlgmr.msra.gmra.mxu0 %vm684_vm3, %v1655_v59  ;;  %6560 = vrcp.f32 %v2115_v6 }
 0x3bb   : > { %v6551_v28 = vpop.eup %6550  ;;  %6143 = vmatpush3.msra.mxu0 %v7164_v42  ;;  %6121 = vmatprep.mubr.msk.f32.mxu0 %vm6650_vm1, %v6649_v7 }
 0x3bc   : > { %6144 = vmatprep.subr.mxu0 %v6649_v7  ;;  %v1656_v1 = vmul.f32 %v6551_v28, %v7255_v52  ;;  %v6553_v49 = vpop.eup %6552 }
 0x3bd   : > { %6145 = vmatpush3.msra.mxu0 %v7168_v45  ;;  %v1657_v42 = vmul.f32 %v6553_v49, %v7234_v4 }
 0x3be   : > { %6146 = vmatprep.subr.mxu0 %v6649_v7  ;;  %6122 = vmatmul.mubr.msk.f32.gmra.mxu0 %vm684_vm3, %v1656_v1 }
 0x3bf   : > { %6147 = vmatpush3.msra.mxu0 %v7170_v47  ;;  %6124 = vmatprep.mubr.msk.f32.mxu0 %vm6650_vm1, %v6649_v7  ;;  %v6555_v44 = vpop.eup %6554 }
 0x3c0   : > { %6172 = vmatprep.subr.mxu0 %v6649_v7  ;;  %v1890_v45 = vmul.f32 %v6555_v44, %v7259_v56 }
 0x3c2   : > { %6125 = vmatmul.mubr.msk.f32.gmra.mxu0 %vm684_vm3, %v1657_v42 }
 0x3c3   : > { %6148 = vmatprep.mubr.msk.f32.mxu0 %vm6650_vm1, %v6649_v7  ;;  %v6557_v52 = vpop.eup %6556 }
 0x3c4   : > { %v1891_v47 = vmul.f32 %v6557_v52, %v7265_v60  ;;  %v6559_v4 = vpop.eup %6558 }
 0x3c5   : > { %v2118_v58 = vpop.xlane.xlu1 %2117 }
 0x3c6   : > { %6562 = vrcp.f32 %v2118_v58  ;;  %6149 = vmatmul.mubr.msk.f32.vlgmr.msra.gmra.mxu0 %vm684_vm3, %v1890_v45 }
 0x3c7   : > { %6173 = vmatpush3.msra.mxu0 %v7267_v10  ;;  %6151 = vmatprep.mubr.msk.f32.mxu0 %vm6650_vm1, %v6649_v7  ;;  %v1892_v10 = vmul.f32 %v6559_v4, %v7240_v31  ;;  %v6561_v60 = vpop.eup %6560 }
 0x3c8   : > { %6174 = vmatprep.subr.mxu0 %v6649_v7 }
 0x3c9   : > { %6175 = vmatpush3.msra.mxu0 %v7261_v61  ;;  %v2121_v11 = vpop.xlane.xlu0 %2120  ;;  %v2125_v61 = vmul.f32 %v6561_v60, %v7272_v3  ;;  %v6347_v60 = vld [vmem:[%s8259_s3] sm:$0xff]  }
 0x3ca   : > { %v2350_v56 = vpop.xlane.xlu1 %2349  ;;  %6176 = vmatprep.subr.mxu0 %v6649_v7  ;;  %6564 = vrcp.f32 %v2121_v11  ;;  %6152 = vmatmul.mubr.msk.f32.gmra.mxu0 %vm684_vm3, %v1891_v47 }
 0x3cb   : > { %6177 = vmatpush3.msra.mxu0 %v2129_v39  ;;  %6154 = vmatprep.mubr.msk.f32.mxu0 %vm6650_vm1, %v6649_v7  ;;  %6566 = vrcp.f32 %v2350_v56 }
 0x3cc   : > { %6202 = vmatprep.subr.mxu0 %v6649_v7 }
 0x3ce   : > { %v2353_v34 = vpop.xlane.xlu1 %2352  ;;  %6155 = vmatmul.mubr.msk.f32.gmra.mxu0 %vm684_vm3, %v1892_v10 }
 0x3cf   : > { %6178 = vmatprep.mubr.msk.f32.mxu0 %vm6650_vm1, %v6649_v7  ;;  %6568 = vrcp.f32 %v2353_v34 }
 0x3d1   : > { %v2356_v16 = vpop.xlane.xlu0 %2355 }
 0x3d2   : > { %6179 = vmatmul.mubr.msk.f32.vlgmr.msra.gmra.mxu0 %vm684_vm3, %v2125_v61  ;;  %v2366_v31 = vpop.permute.xlu1 %2365  ;;  %6570 = vrcp.f32 %v2356_v16 }
 0x3d3   : > { %v6563_v15 = vpop.eup %6562  ;;  %6203 = vmatpush3.msra.mxu0 %v2368_v20  ;;  %6181 = vmatprep.mubr.msk.f32.mxu0 %vm6650_vm1, %v6649_v7  ;;  %v6346_v20 = vld [vmem:[%s8259_s3 + $0x8] sm:$0xff]  }
 0x3d4   : > { %6204 = vmatprep.subr.mxu0 %v6649_v7  ;;  %v2126_v9 = vmul.f32 %v6563_v15, %v7280_v2  ;;  %6217 = vmatprep.subr.bf16.mxu1 %v6346_v20 }
 0x3d5   : > { %6205 = vmatpush3.msra.mxu0 %v2366_v31  ;;  %v2364_v36 = vpop.permute.xlu0 %2363  ;;  %6218 = vmatpush3.bf16.msra.mxu1 %v6346_v20 }
 0x3d6   : > { %6206 = vmatprep.subr.mxu0 %v6649_v7  ;;  %6182 = vmatmul.mubr.msk.f32.gmra.mxu0 %vm684_vm3, %v2126_v9 }
 0x3d7   : > { %v6565_v3 = vpop.eup %6564  ;;  %6207 = vmatpush3.msra.mxu0 %v2364_v36  ;;  %6184 = vmatprep.mubr.msk.f32.mxu0 %vm6650_vm1, %v6649_v7 }
 0x3d8   : > { %v2127_v12 = vmul.f32 %v6565_v3, %v7284_v43  ;;  %v6567_v8 = vpop.eup %6566  ;;  %6219 = vmatprep.subr.bf16.mxu1 %v6347_v60 }
 0x3d9   : > { %v2360_v2 = vmul.f32 %v6567_v8, %v7286_v46  ;;  %6220 = vmatpush3.bf16.msra.mxu1 %v6347_v60 }
 0x3da   : > { %6185 = vmatmul.mubr.msk.f32.gmra.mxu0 %vm684_vm3, %v2127_v12 }
 0x3db   : > { %6208 = vmatprep.mubr.msk.f32.mxu0 %vm6650_vm1, %v6649_v7 }
 0x3dc   : > { %v6569_v26 = vpop.eup %6568 }
 0x3dd   : > { %v2361_v32 = vmul.f32 %v6569_v26, %v7292_v18 }
 0x3de   : > { %6209 = vmatmul.mubr.msk.f32.vlgmr.msra.gmra.mxu0 %vm684_vm3, %v2360_v2 }
 0x3df   : > { %6211 = vmatprep.mubr.msk.f32.mxu0 %vm6650_vm1, %v6649_v7  ;;  %v6571_v0 = vpop.eup %6570 }
 0x3e0   : > { %v2362_v43 = vmul.f32 %v6571_v0, %v7296_v62 }
 0x3e2   : > { %6212 = vmatmul.mubr.msk.f32.gmra.mxu0 %vm684_vm3, %v2361_v32 }
 0x3e3   : > { %6214 = vmatprep.mubr.msk.f32.mxu0 %vm6650_vm1, %v6649_v7 }
 0x3e6   : > { %6215 = vmatmul.mubr.msk.f32.gmra.mxu0 %vm684_vm3, %v2362_v43 }
 0x41d   : > { %v7435_v17 = vpop.f32.mrf.mxu0 }
 0x41f   : > { %v6000_v46 = vpop.f32.mrf.mxu0 }
 0x421   : > { %v7437_v41 = vpop.f32.mrf.mxu0 }
 0x423   : > { %v6003_v19 = vpop.f32.mrf.mxu0 }
 0x425   : > { %v7439_v51 = vpop.f32.mrf.mxu0 }
 0x427   : > { %v6006_v21 = vpop.f32.mrf.mxu0 }
 0x429   : > { %v1037_v18 = vpop.f32.mrf.mxu0 }
 0x42b   : > { %v6030_v40 = vpop.f32.mrf.mxu0 }
 0x42d   : > { %v1042_v29 = vpop.f32.mrf.mxu0 }
 0x42e   : > { %v6309_v57 = vpack.i.bf16 %v1042_v29, %v1037_v18 }
 0x42f   : > { %v6033_v50 = vpop.f32.mrf.mxu0 }
 0x430   : > { %6310 = vrot.lane.b32.xlu1 %v6309_v57, %s6674_s27 }
 0x431   : > { %v1047_v23 = vpop.f32.mrf.mxu0 }
 0x432   : > { %2468 = vrot.lane.b32.xlu0 %v1047_v23, %s6674_s27  ;;  %s5633_s27 = sshll.u32 %s6784_s22, 4  ;;  %s6682_s22 = smov [#allocation2]  }
 0x433   : > { %v6036_v62 = vpop.f32.mrf.mxu0  ;;  %s6591_s26 = sshll.u32 %s6682_s22, 4  ;;  %s6592_s26 = int_to_ptr.vmem [resolvable:$false] %s6591_s26 }
 0x434   : > { %s6593_s20 = scalar_lea.vmem %s6592_s26, 32 }
 0x435   : > { %v1272_v63 = vpop.f32.mrf.mxu0 }
 0x437   : > { %v6060_v22 = vpop.f32.mrf.mxu0 }
 0x439   : > { %v1277_v14 = vpop.f32.mrf.mxu0 }
 0x43a   : > { %v6314_v24 = vpack.i.bf16 %v1277_v14, %v1272_v63 }
 0x43b   : > { %v6063_v35 = vpop.f32.mrf.mxu0 }
 0x43c   : > { %6315 = vrot.lane.b32.xlu1 %v6314_v24, %s6675_s30 }
 0x43d   : > { %v1282_v33 = vpop.f32.mrf.mxu0 }
 0x43e   : > { %2480 = vrot.lane.b32.xlu0 %v1282_v33, %s6675_s30  ;;  %s6679_s30 = smov 24  }
 0x43f   : > { %v6066_v54 = vpop.f32.mrf.mxu0 }
 0x441   : > { %v1507_v27 = vpop.f32.mrf.mxu0 }
 0x443   : > { %v6090_v37 = vpop.f32.mrf.mxu0 }
 0x445   : > { %v1512_v30 = vpop.f32.mrf.mxu0 }
 0x446   : > { %v6319_v39 = vpack.i.bf16 %v1512_v30, %v1507_v27 }
 0x447   : > { %v6093_v48 = vpop.f32.mrf.mxu0 }
 0x448   : > { %6320 = vrot.lane.b32.xlu1 %v6319_v39, %s6676_s16 }
 0x449   : > { %v1517_v53 = vpop.f32.mrf.mxu0 }
 0x44a   : > { %2492 = vrot.lane.b32.xlu0 %v1517_v53, %s6676_s16  ;;  %s6680_s16 = smov 28  }
 0x44b   : > { %v6096_v5 = vpop.f32.mrf.mxu0 }
 0x47a   : > { %v1742_v38 = vpop.f32.mrf.mxu0 }
 0x47c   : > { %v6120_v13 = vpop.f32.mrf.mxu0 }
 0x47e   : > { %v1747_v55 = vpop.f32.mrf.mxu0 }
 0x47f   : > { %v6324_v59 = vpack.i.bf16 %v1747_v55, %v1742_v38 }
 0x480   : > { %v6123_v25 = vpop.f32.mrf.mxu0 }
 0x481   : > { %6325 = vrot.lane.b32.xlu1 %v6324_v59, %s6677_s17 }
 0x482   : > { %v1752_v28 = vpop.f32.mrf.mxu0 }
 0x483   : > { %2504 = vrot.lane.b32.xlu0 %v1752_v28, %s6677_s17 }
 0x484   : > { %v6126_v1 = vpop.f32.mrf.mxu0 }
 0x486   : > { %v1977_v49 = vpop.f32.mrf.mxu0 }
 0x488   : > { %v6150_v6 = vpop.f32.mrf.mxu0 }
 0x48a   : > { %v1982_v42 = vpop.f32.mrf.mxu0 }
 0x48b   : > { %v6329_v44 = vpack.i.bf16 %v1982_v42, %v1977_v49 }
 0x48c   : > { %v6153_v45 = vpop.f32.mrf.mxu0 }
 0x48d   : > { %6330 = vrot.lane.b32.xlu1 %v6329_v44, %s6678_s23 }
 0x48e   : > { %v1987_v52 = vpop.f32.mrf.mxu0 }
 0x48f   : > { %2516 = vrot.lane.b32.xlu0 %v1987_v52, %s6678_s23  ;;  %s8221_s23 = scalar_lea.hbm %s8271_s15, %s5633_s27 }
 0x490   : > { %v6156_v58 = vpop.f32.mrf.mxu0 }
 0x492   : > { %v2212_v47 = vpop.f32.mrf.mxu0 }
 0x494   : > { %v6180_v4 = vpop.f32.mrf.mxu0 }
 0x496   : > { %v2217_v11 = vpop.f32.mrf.mxu0 }
 0x497   : > { %v6334_v56 = vpack.i.bf16 %v2217_v11, %v2212_v47 }
 0x498   : > { %v6183_v10 = vpop.f32.mrf.mxu0 }
 0x499   : > { %6335 = vrot.lane.b32.xlu1 %v6334_v56, %s6679_s30  ;;  %v5227_v10 = vld [vmem:[%s8260_s4] ss:$0 sm:$0xff] }
 0x49a   : > { %v2222_v34 = vpop.f32.mrf.mxu0 }
 0x49b   : > { %2528 = vrot.lane.b32.xlu0 %v2222_v34, %s6679_s30  ;;  %s486_s30 = scalar_lea.vmem [#allocation2], %s485_s25 }
 0x49c   : > { %v6186_v61 = vpop.f32.mrf.mxu0 }
 0x49e   : > { %v2447_v16 = vpop.f32.mrf.mxu0 }
 0x4a0   : > { %v6210_v15 = vpop.f32.mrf.mxu0 }
 0x4a2   : > { %v2452_v31 = vpop.f32.mrf.mxu0  ;;  %v6311_v8 = vpop.permute.xlu1 %6310 }
 0x4a3   : > { %v6339_v9 = vpack.i.bf16 %v2452_v31, %v2447_v16  ;;  %v6313_v18 = vunpack.i.h.bf16 %v6311_v8  ;;  %v6312_v40 = vunpack.i.l.bf16 %v6311_v8  ;;  %v6584_v16 = vld [vmem:[%s6822_s24] sm:$0xff] }
 0x4a4   : > { %v6213_v36 = vpop.f32.mrf.mxu0  ;;  %v2469_v2 = vpop.permute.xlu0 %2468 }
 0x4a5   : > { %6340 = vrot.lane.b32.xlu1 %v6339_v9, %s6680_s16  ;;  %v2546_v14 = vsel %vm588_vm2, %v7437_v41, %v6313_v18  ;;  %v2545_v24 = vsel %vm588_vm2, %v7435_v17, %v6312_v40  ;;  %v2547_v54 = vsel %vm588_vm2, %v7439_v51, %v2469_v2  ;;  %v6586_v2 = vld [vmem:[%s6822_s24 + $0x10] sm:$0xff] }
 0x4a6   : > { %v2457_v3 = vpop.f32.mrf.mxu0 }
 0x4a7   : > { %2540 = vrot.lane.b32.xlu0 %v2457_v3, %s6680_s16  ;;  %s5090_s16 = sshll.u32 %s486_s30, 4  ;;  %s5091_s16 = int_to_ptr.vmem [resolvable:$true] %s5090_s16 }
 0x4a8   : > { %v6216_v12 = vpop.f32.mrf.mxu0  ;;  %s6587_s1 = scalar_lea.vmem %s5091_s16, 16  ;;  %p6594_p0 = scmp.lt.s32.totalorder %s5091_s16, %s6592_s26 }
 0x4a9   : > { %v6585_v12 = vld [vmem:[%s6822_s24 + $0x8] sm:$0xff]  ;;  %s5078_s24 = scalar_lea.sflag [#allocation3], %s485_s25  ;;  %p6588_p11 = scmp.ne.s32.totalorder %s5091_s16, %s6587_s1 }
 0x4aa   : > { %p6595_p1 = scmp.lt.s32.totalorder %s6593_s20, %s6587_s1 }
 0x4ab   : > { %p6589_p12 = pnand %p6588_p11, %p6801_p5 }
 0x4ac   : > { %p6596_p2 = por %p6595_p1, %p6594_p0 }
 0x4ad   : > { %p6590_p13 = pneg %p6589_p12 }
 0x4ae   : > { %v6316_v26 = vpop.permute.xlu1 %6315 }
 0x4af   : > { %v6318_v29 = vunpack.i.h.bf16 %v6316_v26  ;;  %v6317_v57 = vunpack.i.l.bf16 %v6316_v26  ;;  %p6597_p3 = pnand %p6596_p2, %p6590_p13 }
 0x4b0   : > { %v2481_v32 = vpop.permute.xlu0 %2480 }
 0x4b1   : > { %v2549_v27 = vsel %vm2548_vm4, %v2545_v24, %v6317_v57  ;;  %v2550_v37 = vsel %vm2548_vm4, %v2546_v14, %v6318_v29  ;;  %v2551_v39 = vsel %vm2548_vm4, %v2547_v54, %v2481_v32  ;;  %v2720_v54 = vld [vmem:[%s8265_s9 + $0x88] sm:$0xff] }
 0x4ba   : > { %v6321_v0 = vpop.permute.xlu1 %6320 }
 0x4bb   : > { %v6322_v50 = vunpack.i.l.bf16 %v6321_v0  ;;  %v6323_v62 = vunpack.i.h.bf16 %v6321_v0 }
 0x4bc   : > { %v2493_v43 = vpop.permute.xlu0 %2492 }
 0x4bd   : > { %v2553_v48 = vsel %vm2552_vm5, %v2549_v27, %v6322_v50  ;;  %v2554_v38 = vsel %vm2552_vm5, %v2550_v37, %v6323_v62  ;;  %v2555_v17 = vsel %vm2552_vm5, %v2551_v39, %v2493_v43  ;;  %v2722_v37 = vld [vmem:[%s8265_s9 + $0xc8] sm:$0xff] }
 0x4be   : > { %v5240_v39 = vcombine.low %v2720_v54, %v2722_v37 }
 0x4f3   : > { %v6326_v46 = vpop.permute.xlu1 %6325 }
 0x4f4   : > { %v6327_v63 = vunpack.i.l.bf16 %v6326_v46  ;;  %v6328_v35 = vunpack.i.h.bf16 %v6326_v46 }
 0x4f5   : > { %v2505_v19 = vpop.permute.xlu0 %2504 }
 0x4f6   : > { %v2557_v13 = vsel %vm2556_vm6, %v2553_v48, %v6327_v63  ;;  %v2558_v51 = vsel %vm2556_vm6, %v2554_v38, %v6328_v35  ;;  %v2559_v55 = vsel %vm2556_vm6, %v2555_v17, %v2505_v19  ;;  %v2719_v35 = vld [vmem:[%s8265_s9 + $0x80] sm:$0xff]  ;;  %v5241_v48 = vcombine.high %v2720_v54, %v2722_v37  ;;  %v2718_v17 = vld [vmem:[%s8265_s9 + $0x48] sm:$0xff]  ;;  %v6355_v54 = vld [vmem:[%s8267_s11 + $0x1b0] sm:$0xff]  }
 0x4f7   : > { %v6357_v37 = vld [vmem:[%s8267_s11 + $0x1e8] sm:$0xff]  }
 0x4f8   : > { %2918 = vmatprep.subr.bf16.mxu1 %v5241_v48  ;;  %v6360_v48 = vld [vmem:[%s8267_s11 + $0x160] sm:$0xff]  }
 0x4ff   : > { %v6331_v21 = vpop.permute.xlu1 %6330 }
 0x500   : > { %v6332_v33 = vunpack.i.l.bf16 %v6331_v21  ;;  %v6333_v30 = vunpack.i.h.bf16 %v6331_v21 }
 0x501   : > { %v2517_v23 = vpop.permute.xlu0 %2516 }
 0x502   : > { %v2561_v59 = vsel %vm2560_vm7, %v2557_v13, %v6332_v33  ;;  %v2562_v28 = vsel %vm2560_vm7, %v2558_v51, %v6333_v30  ;;  %v2563_v1 = vsel %vm2560_vm7, %v2559_v55, %v2517_v23  ;;  %v2721_v33 = vld [vmem:[%s8265_s9 + $0xc0] sm:$0xff] }
 0x503   : > { %v5239_v27 = vcombine.high %v2719_v35, %v2721_v33  ;;  %v5238_v30 = vcombine.low %v2719_v35, %v2721_v33  ;;  %v6353_v35 = vld [vmem:[%s8267_s11 + $0x1f0] sm:$0xff]  }
 0x504   : > { %v6354_v33 = vld [vmem:[%s8267_s11 + $0x130] sm:$0xff]  }
 0x505   : > { %2867 = vmatprep.subr.bf16.mxu0 %v5239_v27  ;;  %v6356_v27 = vld [vmem:[%s8267_s11 + $0x168] sm:$0xff]  }
 0x506   : > { %2868 = vmatpush1.bf16.msra.mxu0 %v5238_v30  ;;  %v6358_v30 = vld [vmem:[%s8267_s11 + $0x128] sm:$0xff]  }
 0x50b   : > { %v6336_v22 = vpop.permute.xlu1 %6335 }
 0x50c   : > { %v6338_v53 = vunpack.i.h.bf16 %v6336_v22  ;;  %v6337_v5 = vunpack.i.l.bf16 %v6336_v22 }
 0x50d   : > { %v2529_v41 = vpop.permute.xlu0 %2528 }
 0x50e   : > { %v2565_v42 = vsel %vm684_vm3, %v2562_v28, %v6338_v53  ;;  %v2564_v44 = vsel %vm684_vm3, %v2561_v59, %v6337_v5  ;;  %v2566_v45 = vsel %vm684_vm3, %v2563_v1, %v2529_v41  ;;  %v2715_v53 = vld [vmem:[%s8265_s9] sm:$0xff]  ;;  %v2716_v41 = vld [vmem:[%s8265_s9 + $0x8] sm:$0xff]  ;;  %v6681_v59 = vmov 0   ;;  %v5252_v28 = vld [vmem:[%s8265_s9 + $0xd0] sm:$0xff] }
 0x50f   : > { %v2717_v5 = vld [vmem:[%s8265_s9 + $0x40] sm:$0xff]  ;;  %v5236_v51 = vcombine.low %v2716_v41, %v2718_v17  ;;  %v5237_v55 = vcombine.high %v2716_v41, %v2718_v17  ;;  %2887 = vmatprep.mubr.bf16.mxu0 %v6681_v59  ;;  %v5251_v1 = vld [vmem:[%s8265_s9 + $0x98] sm:$0xff] }
 0x510   : > { %v5235_v38 = vcombine.high %v2715_v53, %v2717_v5  ;;  %v5234_v13 = vcombine.low %v2715_v53, %v2717_v5  ;;  %v6361_v53 = vld [vmem:[%s8267_s11 + $0x1e0] sm:$0xff]   ;;  %v6365_v17 = vld [vmem:[%s8267_s11 + $0x1d8] sm:$0xff]  }
 0x511   : > { %v6362_v5 = vld [vmem:[%s8267_s11 + $0x120] sm:$0xff]  }
 0x512   : > { %2869 = vmatprep.subr.bf16.mxu0 %v5235_v38  ;;  %v6363_v41 = vld [vmem:[%s8267_s11 + $0x1a0] sm:$0xff]   ;;  %v6364_v38 = vld [vmem:[%s8267_s11 + $0x158] sm:$0xff]  }
 0x513   : > { %2870 = vmatpush1.bf16.msra.mxu0 %v5234_v13  ;;  %v6366_v13 = vld [vmem:[%s8267_s11 + $0x118] sm:$0xff]  }
 0x517   : > { %v6341_v25 = vpop.permute.xlu1 %6340 }
 0x518   : > { %v6343_v49 = vunpack.i.h.bf16 %v6341_v25  ;;  %v6342_v6 = vunpack.i.l.bf16 %v6341_v25  ;;  %v5250_v25 = vld [vmem:[%s8265_s9 + $0x90] sm:$0xff] }
 0x519   : > { %v2541_v52 = vpop.permute.xlu0 %2540 }
 0x51a   : > { %v2568_v20 = vsel %vm2567_vm8, %v2564_v44, %v6342_v6  ;;  %v2569_v58 = vsel %vm2567_vm8, %v2565_v42, %v6343_v49  ;;  %v2570_v47 = vsel %vm2567_vm8, %v2566_v45, %v2541_v52  ;;  %v5323_v49 = vcombine.low %v5250_v25, %v5252_v28  ;;  %v5253_v42 = vld [vmem:[%s8265_s9 + $0xd8] sm:$0xff] }
 0x51b   : > { %v2571_v4 = vpack.c.bf16 %v2569_v58, %v2568_v20  ;;  %v2572_v11 = vpack.c.bf16 %v2570_v47, %v2570_v47  ;;  %v5324_v6 = vcombine.high %v5250_v25, %v5252_v28  ;;  %v5325_v44 = vcombine.low %v5251_v1, %v5253_v42  ;;  %v6369_v25 = vld [vmem:[%s8267_s11 + $0x1d0] sm:$0xff]  }
 0x51c   : > { %v5326_v45 = vcombine.high %v5251_v1, %v5253_v42  ;;  %v6370_v28 = vld [vmem:[%s8267_s11 + $0x110] sm:$0xff]   ;;  %v6374_v42 = vld [vmem:[%s8267_s11 + $0x108] sm:$0xff]  }
 0x51d   : > { %6221 = vmatprep.mubr.msk.bf16.mxu1 %vm521_vm0, %v2571_v4  ;;  %3126 = vmatprep.subr.bf16.mxu0 %v5324_v6  ;;  %v6371_v1 = vld [vmem:[%s8267_s11 + $0x190] sm:$0xff]   ;;  %v6373_v6 = vld [vmem:[%s8267_s11 + $0x1c8] sm:$0xff]  }
 0x51e   : > { %6222 = vmatmul.mubr.msk.bf16.vlgmr.msra.gmra.mxu1 %vm521_vm0, %v2572_v11 }
 0x51f   : > { %2919 = vmatpush1.bf16.msra.mxu1 %v5240_v39  ;;  %2938 = vmatprep.mubr.bf16.mxu1 %v6681_v59  ;;  %v6359_v39 = vld [vmem:[%s8267_s11 + $0x1a8] sm:$0xff]  }
 0x520   : > { %2920 = vmatprep.subr.bf16.mxu1 %v5237_v55  ;;  %v6368_v55 = vld [vmem:[%s8267_s11 + $0x150] sm:$0xff]  }
 0x523   : > { %2921 = vmatpush1.bf16.msra.mxu1 %v5236_v51  ;;  %v6367_v51 = vld [vmem:[%s8267_s11 + $0x198] sm:$0xff]  }
 0x524   : > { %3177 = vmatprep.subr.bf16.mxu1 %v5326_v45  ;;  %v6376_v45 = vld [vmem:[%s8267_s11 + $0x140] sm:$0xff]  }
 0x5de   : > { %v6223_v56 = vpop.f32.mrf.mxu1 }
 0x5df   : > { %v2645_v9 = vadd.f32 %v6223_v56, %v5227_v10 }
 0x5e0   : > { %v2636_v60 = vpop.f32.mrf.mxu1 }
 0x5e1   : > { %v2637_v34 = vadd.f32 %v5227_v10, %v2636_v60  ;;  %v2652_v26 = vadd.f32 %v6586_v2, %v2645_v9 }
 0x5e2   : > { %v6224_v61 = vpop.f32.mrf.mxu1 }
 0x5e3   : > { %v2650_v15 = vadd.f32 %v6584_v16, %v2637_v34  ;;  %v2659_v0 = vsel %vm521_vm0, %v2652_v26, 0.0  ;;  %v5232_v16 = vld [vmem:[%s8261_s5] ss:$0 sm:$0xff] }
 0x5e4   : > { %v2639_v31 = vpop.f32.mrf.mxu1 }
 0x5e5   : > { %v2640_v36 = vadd.f32 %v5227_v10, %v2639_v31  ;;  %v2653_v3 = vsel %vm521_vm0, %v2650_v15, 0.0 }
 0x5e6   : > { %2654 = vadd.xlane.f32.xlu1 %v2653_v3 }
 0x5e7   : > { %v2651_v8 = vadd.f32 %v6585_v12, %v2640_v36  ;;  %v5233_v36 = vld [vmem:[%s8262_s6] ss:$0 sm:$0xff] }
 0x5e9   : > { %v2656_v32 = vsel %vm521_vm0, %v2651_v8, 0.0 }
 0x5ea   : > { %2657 = vadd.xlane.f32.xlu0 %v2656_v32 }
 0x5ee   : > { %2660 = vadd.xlane.f32.xlu0 %v2659_v0  ;;  %v5248_v0 = vld [vmem:[%s8265_s9 + $0x50] sm:$0xff] }
 0x66f   : > { %v2655_v43 = vpop.xlane.xlu1 %2654 }
 0x670   : > { %v2663_v46 = vmul.f32 0.03125, %v2655_v43  ;;  %v5247_v43 = vld [vmem:[%s8265_s9 + $0x18] sm:$0xff] }
 0x672   : > { %v7479_v19 = vsub.f32 %v2650_v15, %v2663_v46  ;;  %v5249_v46 = vld [vmem:[%s8265_s9 + $0x58] sm:$0xff] }
 0x673   : > { %v2658_v21 = vpop.xlane.xlu0 %2657 }
 0x674   : > { %v2664_v18 = vmul.f32 0.03125, %v2658_v21  ;;  %v2669_v40 = vmul.f32 %v7479_v19, %v7479_v19 }
 0x676   : > { %v7483_v29 = vsub.f32 %v2651_v8, %v2664_v18  ;;  %v2672_v57 = vsel %vm521_vm0, %v2669_v40, 0.0  ;;  %v5246_v8 = vld [vmem:[%s8265_s9 + $0x10] sm:$0xff]  ;;  %v5322_v40 = vcombine.high %v5247_v43, %v5249_v46 }
 0x677   : > { %v2661_v50 = vpop.xlane.xlu0 %2660  ;;  %2673 = vadd.xlane.f32.xlu1 %v2672_v57  ;;  %v5320_v18 = vcombine.high %v5246_v8, %v5248_v0  ;;  %v5321_v57 = vcombine.low %v5247_v43, %v5249_v46 }
 0x678   : > { %v2665_v23 = vmul.f32 0.03125, %v2661_v50  ;;  %v2670_v62 = vmul.f32 %v7483_v29, %v7483_v29 }
 0x67a   : > { %v7488_v63 = vsub.f32 %v2652_v26, %v2665_v23  ;;  %v2675_v22 = vsel %vm521_vm0, %v2670_v62, 0.0  ;;  %v6348_v23 = vld [vmem:[%s8267_s11 + $0x178] sm:$0xff]  }
 0x67b   : > { %2676 = vadd.xlane.f32.xlu0 %v2675_v22  ;;  %v6349_v62 = vld [vmem:[%s8267_s11 + $0x1f8] sm:$0xff]  }
 0x67c   : > { %v2671_v14 = vmul.f32 %v7488_v63, %v7488_v63  ;;  %v6350_v22 = vld [vmem:[%s8267_s11 + $0x138] sm:$0xff]  }
 0x67e   : > { %v2678_v24 = vsel %vm521_vm0, %v2671_v14, 0.0  ;;  %v6351_v14 = vld [vmem:[%s8267_s11 + $0x1b8] sm:$0xff]  }
 0x67f   : > { %2679 = vadd.xlane.f32.xlu1 %v2678_v24  ;;  %v6352_v24 = vld [vmem:[%s8267_s11 + $0x170] sm:$0xff]  }
 0x700   : > { %v2674_v52 = vpop.xlane.xlu1 %2673 }
 0x701   : > { %v2681_v20 = vmul.f32 0.03125, %v2674_v52  ;;  %v6377_v52 = vld [vmem:[%s8267_s11 + $0x1c0] sm:$0xff]  }
 0x703   : > { %v2684_v58 = vadd.f32 1e-05, %v2681_v20  ;;  %v6378_v20 = vld [vmem:[%s8267_s11 + $0x100] sm:$0xff]  }
 0x704   : > { %v2677_v47 = vpop.xlane.xlu0 %2676 }
 0x705   : > { %6572 = vrsqrt.f32 %v2684_v58  ;;  %v2682_v4 = vmul.f32 0.03125, %v2677_v47  ;;  %v6379_v58 = vld [vmem:[%s8267_s11 + $0x180] sm:$0xff]   ;;  %v6380_v47 = vld [vmem:[%s8267_s11 + $0x78] sm:$0xff]  }
 0x707   : > { %v2685_v11 = vadd.f32 1e-05, %v2682_v4  ;;  %v6381_v4 = vld [vmem:[%s8267_s11 + $0xf8] sm:$0xff]  }
 0x708   : > { %v2680_v56 = vpop.xlane.xlu1 %2679 }
 0x709   : > { %6574 = vrsqrt.f32 %v2685_v11  ;;  %v2683_v10 = vmul.f32 0.03125, %v2680_v56 }
 0x70b   : > { %v2686_v60 = vadd.f32 1e-05, %v2683_v10 }
 0x70d   : > { %6576 = vrsqrt.f32 %v2686_v60 }
 0x712   : > { %v6573_v34 = vpop.eup %6572 }
 0x713   : > { %v2690_v61 = vmul.f32 %v6573_v34, %v7479_v19 }
 0x715   : > { %v2700_v31 = vmul.f32 %v5232_v16, %v2690_v61 }
 0x716   : > { %v6575_v15 = vpop.eup %6574 }
 0x717   : > { %v2691_v9 = vmul.f32 %v6575_v15, %v7483_v29  ;;  %v7543_v2 = vadd.f32 %v5233_v36, %v2700_v31  ;;  %v5319_v29 = vcombine.low %v5246_v8, %v5248_v0  ;;  %v2789_v31 = vlaneseq }
 0x719   : > { %v2701_v3 = vmul.f32 %v5232_v16, %v2691_v9  ;;  %v2790_v8 = vshrl.u32 %v2789_v31, 7 }
 0x71a   : > { %v6577_v12 = vpop.eup %6576 }
 0x71b   : > { %v7545_v26 = vadd.f32 %v5233_v36, %v2701_v3  ;;  %v2692_v32 = vmul.f32 %v6577_v12, %v7488_v63 }
 0x71d   : > { %v7559_v19 = vpack.c.bf16 %v7545_v26, %v7543_v2  ;;  %v2702_v21 = vmul.f32 %v5232_v16, %v2692_v32 }
 0x71f   : > { %5242 = vmatmul.mubr.msk.bf16.vlgmr.msra.gmra.mxu0 %vm521_vm0, %v7559_v19  ;;  %5244 = vmatmul.mubr.msk.bf16.vlgmr.msra.gmra.mxu1 %vm521_vm0, %v7559_v19  ;;  %v7565_v50 = vadd.f32 %v5233_v36, %v2702_v21  ;;  %v7715_v21 = vsub.s32 1, %v2790_v8 }
 0x720   : > { %3127 = vmatpush1.bf16.msra.mxu0 %v5323_v49  ;;  %3178 = vmatpush1.bf16.msra.mxu1 %v5325_v44  ;;  %v6372_v49 = vld [vmem:[%s8267_s11 + $0x148] sm:$0xff]  }
 0x721   : > { %2897 = vmatprep.mubr.bf16.mxu0 %v6681_v59  ;;  %2948 = vmatprep.mubr.bf16.mxu1 %v6681_v59  ;;  %v7577_v63 = vpack.c.bf16 %v7565_v50, %v7565_v50  ;;  %v6375_v44 = vld [vmem:[%s8267_s11 + $0x188] sm:$0xff]  }
 0x722   : > { %3128 = vmatprep.subr.bf16.mxu0 %v5320_v18  ;;  %3179 = vmatprep.subr.bf16.mxu1 %v5322_v40  ;;  %v7717_v18 = vsub.s32 3, %v2790_v8  ;;  %v5254_v40 = vld [vmem:[%s8266_s10 + $0x4] sm:$0xf] }
 0x724   : > { %3129 = vmatpush1.bf16.msra.mxu0 %v5319_v29  ;;  %3180 = vmatpush1.bf16.msra.mxu1 %v5321_v57  ;;  %v7722_v29 = vsub.s32 0, %v2790_v8  ;;  %v7724_v57 = vsub.s32 2, %v2790_v8 }
 0x725   : > { %5740 = vmatprep.subr.bf16.mxu0 %v6348_v23  ;;  %5768 = vmatprep.subr.bf16.mxu1 %v6349_v62 }
 0x727   : > { %5243 = vmatmul.mubr.msk.bf16.gmra.mxu0 %vm521_vm0, %v7577_v63  ;;  %5245 = vmatmul.mubr.msk.bf16.gmra.mxu1 %vm521_vm0, %v7577_v63 }
 0x728   : > { %3146 = vmatprep.mubr.bf16.mxu0 %v6681_v59  ;;  %3197 = vmatprep.mubr.bf16.mxu1 %v6681_v59 }
 0x72f   : > { %5327 = vmatmul.mubr.msk.bf16.vlgmr.msra.gmra.mxu0 %vm521_vm0, %v7559_v19  ;;  %5329 = vmatmul.mubr.msk.bf16.vlgmr.msra.gmra.mxu1 %vm521_vm0, %v7559_v19 }
 0x730   : > { %3156 = vmatprep.mubr.bf16.mxu0 %v6681_v59  ;;  %3207 = vmatprep.mubr.bf16.mxu1 %v6681_v59 }
 0x731   : > { %5741 = vmatpush3.bf16.msra.mxu0 %v6350_v22  ;;  %5769 = vmatpush3.bf16.msra.mxu1 %v6351_v14  ;;  %v3061_v22 = vrot.slane %v5254_v40, %v7715_v21  ;;  %v3069_v14 = vrot.slane %v5254_v40, %v7717_v18 }
 0x732   : > { %5742 = vmatprep.subr.bf16.mxu0 %v6352_v24  ;;  %5770 = vmatprep.subr.bf16.mxu1 %v6353_v35  ;;  %v3057_v24 = vrot.slane %v5254_v40, %v7722_v29  ;;  %v3065_v35 = vrot.slane %v5254_v40, %v7724_v57  ;;  %v6383_v40 = vld [vmem:[%s8267_s11 + $0xb8] sm:$0xff]  }
 0x735   : > { %5743 = vmatpush3.bf16.msra.mxu0 %v6354_v33  ;;  %5771 = vmatpush3.bf16.msra.mxu1 %v6355_v54 }
 0x736   : > { %5744 = vmatprep.subr.bf16.mxu0 %v6356_v27  ;;  %5772 = vmatprep.subr.bf16.mxu1 %v6357_v37 }
 0x737   : > { %5328 = vmatmul.mubr.msk.bf16.gmra.mxu0 %vm521_vm0, %v7577_v63  ;;  %5330 = vmatmul.mubr.msk.bf16.gmra.mxu1 %vm521_vm0, %v7577_v63 }
 0x739   : > { %5745 = vmatpush3.bf16.msra.mxu0 %v6358_v30  ;;  %5773 = vmatpush3.bf16.msra.mxu1 %v6359_v39 }
 0x73a   : > { %5746 = vmatprep.subr.bf16.mxu0 %v6360_v48  ;;  %5774 = vmatprep.subr.bf16.mxu1 %v6361_v53 }
 0x73d   : > { %5747 = vmatpush3.bf16.msra.mxu0 %v6362_v5  ;;  %5775 = vmatpush3.bf16.msra.mxu1 %v6363_v41 }
 0x73e   : > { %5748 = vmatprep.subr.bf16.mxu0 %v6364_v38  ;;  %5776 = vmatprep.subr.bf16.mxu1 %v6365_v17 }
 0x741   : > { %5749 = vmatpush3.bf16.msra.mxu0 %v6366_v13  ;;  %5777 = vmatpush3.bf16.msra.mxu1 %v6367_v51 }
 0x742   : > { %5750 = vmatprep.subr.bf16.mxu0 %v6368_v55  ;;  %5778 = vmatprep.subr.bf16.mxu1 %v6369_v25 }
 0x745   : > { %5751 = vmatpush3.bf16.msra.mxu0 %v6370_v28  ;;  %5779 = vmatpush3.bf16.msra.mxu1 %v6371_v1 }
 0x746   : > { %5752 = vmatprep.subr.bf16.mxu0 %v6372_v49  ;;  %5780 = vmatprep.subr.bf16.mxu1 %v6373_v6  ;;  %v7733_v49 = vld [vmem:[%s8266_s10] sm:$0xf] }
 0x749   : > { %5753 = vmatpush3.bf16.msra.mxu0 %v6374_v42  ;;  %5781 = vmatpush3.bf16.msra.mxu1 %v6375_v44 }
 0x74a   : > { %5754 = vmatprep.subr.bf16.mxu0 %v6376_v45  ;;  %5782 = vmatprep.subr.bf16.mxu1 %v6377_v52  ;;  %v7737_v52 = vrot.slane %v7733_v49, %v7715_v21 }
 0x74d   : > { %5755 = vmatpush3.bf16.msra.mxu0 %v6378_v20  ;;  %5783 = vmatpush3.bf16.msra.mxu1 %v6379_v58  ;;  %v7741_v20 = vrot.slane %v7733_v49, %v7717_v18 }
 0x74e   : > { %5796 = vmatprep.subr.bf16.mxu0 %v6380_v47  ;;  %5824 = vmatprep.subr.bf16.mxu1 %v6381_v4 }
 0x7df   : > { %v7691_v11 = vpop.f32.mrf.mxu0  ;;  %v7693_v56 = vpop.f32.mrf.mxu1 }
 0x7e1   : > { %v7695_v10 = vpop.f32.mrf.mxu0  ;;  %v7697_v60 = vpop.f32.mrf.mxu1 }
 0x7e3   : > { %v7699_v34 = vpop.f32.mrf.mxu0  ;;  %v7701_v61 = vpop.f32.mrf.mxu1 }
 0x7e5   : > { %v7703_v16 = vpop.f32.mrf.mxu0  ;;  %v7705_v15 = vpop.f32.mrf.mxu1 }
 0x7e7   : > { %v7707_v9 = vpop.f32.mrf.mxu0  ;;  %v7709_v36 = vpop.f32.mrf.mxu1 }
 0x7e9   : > { %v7711_v3 = vpop.f32.mrf.mxu0  ;;  %v7713_v12 = vpop.f32.mrf.mxu1 }
 0x7eb   : > { %v2903_v32 = vpop.f32.mrf.mxu0  ;;  %v2954_v0 = vpop.f32.mrf.mxu1 }
 0x7ed   : > { %v2904_v43 = vpop.f32.mrf.mxu0  ;;  %v2955_v46 = vpop.f32.mrf.mxu1 }
 0x7ee   : > { %v6382_v46 = vld [vmem:[%s8267_s11 + $0x38] sm:$0xff]  }
 0x7ef   : > { %v3148_v23 = vpop.f32.mrf.mxu0  ;;  %v3199_v62 = vpop.f32.mrf.mxu1 }
 0x7f0   : > { %v3149_v5 = vadd.f32 %v3148_v23, %v3057_v24  ;;  %v3200_v41 = vadd.f32 %v3199_v62, %v3065_v35 }
 0x7f1   : > { %v3150_v33 = vpop.f32.mrf.mxu0  ;;  %v3201_v54 = vpop.f32.mrf.mxu1 }
 0x7f2   : > { %v3151_v30 = vadd.f32 %v3150_v33, %v3061_v22  ;;  %v3202_v39 = vadd.f32 %v3201_v54, %v3069_v14  ;;  %v3216_v58 = vmax.f32 %v3149_v5, 0.0  ;;  %v3218_v47 = vmax.f32 %v3200_v41, 0.0 }
 0x7f3   : > { %v3152_v27 = vpop.f32.mrf.mxu0  ;;  %v3203_v37 = vpop.f32.mrf.mxu1 }
 0x7f4   : > { %v3153_v48 = vadd.f32 %v3152_v27, %v3057_v24  ;;  %v3204_v53 = vadd.f32 %v3203_v37, %v3065_v35  ;;  %v3217_v6 = vmax.f32 %v3151_v30, 0.0  ;;  %v3219_v42 = vmax.f32 %v3202_v39, 0.0  ;;  %v6384_v30 = vld [vmem:[%s8267_s11 + $0x70] sm:$0xff]  }
 0x7f5   : > { %v3154_v38 = vpop.f32.mrf.mxu0  ;;  %v3205_v17 = vpop.f32.mrf.mxu1 }
 0x7f6   : > { %v3155_v13 = vadd.f32 %v3154_v38, %v3061_v22  ;;  %v3206_v51 = vadd.f32 %v3205_v17, %v3069_v14  ;;  %v3220_v55 = vmax.f32 %v3153_v48, 0.0  ;;  %v3222_v25 = vmax.f32 %v3204_v53, 0.0  ;;  %v6386_v38 = vld [vmem:[%s8267_s11 + $0x30] sm:$0xff]  }
 0x7f7   : > { %v3158_v28 = vpop.f32.mrf.mxu0  ;;  %v3209_v1 = vpop.f32.mrf.mxu1  ;;  %v2896_v48 = vadd.f32 %v7703_v16, %v7737_v52  ;;  %v6387_v17 = vld [vmem:[%s8267_s11 + $0xb0] sm:$0xff]   ;;  %v2892_v16 = vadd.f32 %v7695_v10, %v7737_v52  ;;  %v6390_v10 = vld [vmem:[%s8267_s11 + $0x28] sm:$0xff]  }
 0x7f8   : > { %v3221_v44 = vmax.f32 %v3155_v13, 0.0  ;;  %v3223_v45 = vmax.f32 %v3206_v51, 0.0  ;;  %v3228_v23 = vpack.c.bf16 %v3220_v55, %v3216_v58  ;;  %v3230_v62 = vpack.c.bf16 %v3222_v25, %v3218_v47  ;;  %v6388_v55 = vld [vmem:[%s8267_s11 + $0x68] sm:$0xff]   ;;  %v6392_v58 = vld [vmem:[%s8267_s11 + $0x60] sm:$0xff]  }
 0x7f9   : > { %v3160_v4 = vpop.f32.mrf.mxu0  ;;  %v3211_v31 = vpop.f32.mrf.mxu1  ;;  %v3159_v33 = vadd.f32 %v3158_v28, %v3057_v24  ;;  %v3210_v54 = vadd.f32 %v3209_v1, %v3065_v35  ;;  %v2947_v24 = vadd.f32 %v7705_v15, %v7741_v20  ;;  %v2943_v15 = vadd.f32 %v7697_v60, %v7741_v20  ;;  %v6389_v25 = vld [vmem:[%s8267_s11 + $0xe8] sm:$0xff]   ;;  %v6393_v47 = vld [vmem:[%s8267_s11 + $0xe0] sm:$0xff]  }
 0x7fa   : > { %v3229_v8 = vpack.c.bf16 %v3221_v44, %v3217_v6  ;;  %v3231_v32 = vpack.c.bf16 %v3223_v45, %v3219_v42  ;;  %v3161_v0 = vadd.f32 %v3160_v4, %v3061_v22  ;;  %v3212_v43 = vadd.f32 %v3211_v31, %v3069_v14  ;;  %v6385_v22 = vld [vmem:[%s8267_s11 + $0xf0] sm:$0xff]   ;;  %v6391_v60 = vld [vmem:[%s8267_s11 + $0xa8] sm:$0xff]  }
 0x7fb   : > { %v3162_v27 = vpop.f32.mrf.mxu0  ;;  %v3213_v37 = vpop.f32.mrf.mxu1  ;;  %v3224_v13 = vmax.f32 %v3159_v33, 0.0  ;;  %v3226_v51 = vmax.f32 %v3210_v54, 0.0  ;;  %v2962_v28 = vmax.f32 %v2896_v48, 0.0  ;;  %v2964_v1 = vmax.f32 %v2947_v24, 0.0  ;;  %v6402_v33 = vld [vmem:[%s8267_s11 + $0x10] sm:$0xff]   ;;  %v6407_v48 = vld [vmem:[%s8267_s11 + $0x88] sm:$0xff]  }
 0x7fc   : > { %v3225_v14 = vmax.f32 %v3161_v0, 0.0  ;;  %v3227_v39 = vmax.f32 %v3212_v43, 0.0  ;;  %3460 = vmatprep.mubr.bf16.mxu0 %v3229_v8  ;;  %3508 = vmatprep.mubr.bf16.mxu1 %v3231_v32  ;;  %v2958_v6 = vmax.f32 %v2892_v16, 0.0  ;;  %v2960_v42 = vmax.f32 %v2943_v15, 0.0  ;;  %v6394_v8 = vld [vmem:[%s8267_s11 + $0x20] sm:$0xff]   ;;  %v6396_v0 = vld [vmem:[%s8267_s11 + $0x58] sm:$0xff]  }
 0x7fd   : > { %v3163_v35 = vpop.f32.mrf.mxu0  ;;  %v3214_v53 = vpop.f32.mrf.mxu1  ;;  %3461 = vmatmul.mubr.bf16.vlgmr.msra.gmra.mxu0 %v3228_v23  ;;  %3509 = vmatmul.mubr.bf16.vlgmr.msra.gmra.mxu1 %v3230_v62  ;;  %v3232_v44 = vpack.c.bf16 %v3224_v13, %v3224_v13  ;;  %v3234_v45 = vpack.c.bf16 %v3226_v51, %v3226_v51  ;;  %v6395_v32 = vld [vmem:[%s8267_s11 + $0xa0] sm:$0xff]   ;;  %v6397_v43 = vld [vmem:[%s8267_s11 + $0xd8] sm:$0xff]   ;;  %v6400_v23 = vld [vmem:[%s8267_s11 + $0x50] sm:$0xff]  }
 0x7fe   : > { %v3233_v5 = vpack.c.bf16 %v3225_v14, %v3225_v14  ;;  %v3235_v41 = vpack.c.bf16 %v3227_v39, %v3227_v39  ;;  %5797 = vmatpush3.bf16.msra.mxu0 %v6382_v46  ;;  %5825 = vmatpush3.bf16.msra.mxu1 %v6383_v40  ;;  %v2970_v4 = vpack.c.bf16 %v2962_v28, %v2958_v6  ;;  %v6398_v46 = vld [vmem:[%s8267_s11 + $0x18] sm:$0xff]   ;;  %v6401_v62 = vld [vmem:[%s8267_s11 + $0xd0] sm:$0xff]   ;;  %v6404_v27 = vld [vmem:[%s8267_s11 + $0x48] sm:$0xff]  }
 0x7ff   : > { %5798 = vmatprep.subr.bf16.mxu0 %v6384_v30  ;;  %5826 = vmatprep.subr.bf16.mxu1 %v6385_v22  ;;  %v2972_v31 = vpack.c.bf16 %v2964_v1, %v2960_v42  ;;  %v6399_v40 = vld [vmem:[%s8267_s11 + $0x98] sm:$0xff]   ;;  %v6403_v54 = vld [vmem:[%s8267_s11 + $0x90] sm:$0xff]   ;;  %v6405_v37 = vld [vmem:[%s8267_s11 + $0xc8] sm:$0xff]   ;;  %v2792_v30 = vrot.slane %v7733_v49, %v7722_v29  ;;  %v2800_v22 = vrot.slane %v7733_v49, %v7724_v57 }
 0x800   : > { %3468 = vmatprep.mubr.bf16.mxu0 %v3233_v5  ;;  %3516 = vmatprep.mubr.bf16.mxu1 %v3235_v41  ;;  %v6406_v39 = vld [vmem:[%s8267_s11 + $0x8] sm:$0xff]   ;;  %v6408_v49 = vld [vmem:[%s8267_s11 + $0x40] sm:$0xff]   ;;  %v2902_v5 = vadd.f32 %v7711_v3, %v7737_v52 }
 0x801   : > { %v2894_v14 = vadd.f32 %v7699_v34, %v2792_v30  ;;  %v2945_v24 = vadd.f32 %v7701_v61, %v2800_v22  ;;  %v6409_v34 = vld [vmem:[%s8267_s11 + $0xc0] sm:$0xff]   ;;  %v2890_v53 = vadd.f32 %v7691_v11, %v2792_v30  ;;  %v2953_v61 = vadd.f32 %v7713_v12, %v7741_v20  ;;  %v5396_v1 = vld [vmem:[%s8265_s9 + $0x28] sm:$0xff] }
 0x802   : > { %5799 = vmatpush3.bf16.msra.mxu0 %v6386_v38  ;;  %5827 = vmatpush3.bf16.msra.mxu1 %v6387_v17  ;;  %v5399_v35 = vld [vmem:[%s8265_s9 + $0xa0] sm:$0xff]  ;;  %v5400_v38 = vld [vmem:[%s8265_s9 + $0xa8] sm:$0xff]  ;;  %v2941_v11 = vadd.f32 %v7693_v56, %v2800_v22  ;;  %v2966_v51 = vmax.f32 %v2902_v5, 0.0  ;;  %v6429_v5 = vld [vmem:[%s8267_s11 + $0x2d8] sm:$0xff]  }
 0x803   : > { %5800 = vmatprep.subr.bf16.mxu0 %v6388_v55  ;;  %5828 = vmatprep.subr.bf16.mxu1 %v6389_v25  ;;  %v5401_v41 = vld [vmem:[%s8265_s9 + $0xe0] sm:$0xff]  ;;  %v5402_v17 = vld [vmem:[%s8265_s9 + $0xe8] sm:$0xff]  ;;  %v2961_v16 = vmax.f32 %v2894_v14, 0.0  ;;  %v2963_v52 = vmax.f32 %v2945_v24, 0.0  ;;  %v2957_v13 = vmax.f32 %v2890_v53, 0.0  ;;  %v2968_v55 = vmax.f32 %v2953_v61, 0.0 }
 0x804   : > { %v6410_v3 = vld [vmem:[%s8267_s11] sm:$0xff]   ;;  %v5473_v20 = vcombine.high %v5399_v35, %v5401_v41  ;;  %v5475_v15 = vcombine.high %v5400_v38, %v5402_v17  ;;  %v2959_v25 = vmax.f32 %v2941_v11, 0.0  ;;  %v5472_v6 = vcombine.low %v5399_v35, %v5401_v41  ;;  %v6421_v14 = vld [vmem:[%s8267_s11 + $0x2e8] sm:$0xff]   ;;  %v6428_v53 = vld [vmem:[%s8267_s11 + $0x258] sm:$0xff]  }
 0x805   : > { %3469 = vmatmul.mubr.bf16.gmra.mxu0 %v3232_v44  ;;  %3517 = vmatmul.mubr.bf16.gmra.mxu1 %v3234_v45  ;;  %v6411_v12 = vld [vmem:[%s8267_s11 + $0x80] sm:$0xff]   ;;  %v5474_v42 = vcombine.low %v5400_v38, %v5402_v17  ;;  %v2900_v45 = vadd.f32 %v7707_v9, %v2792_v30  ;;  %v6419_v30 = vld [vmem:[%s8267_s11 + $0x2b0] sm:$0xff]   ;;  %v6430_v61 = vld [vmem:[%s8267_s11 + $0x218] sm:$0xff]  }
 0x806   : > { %5801 = vmatpush3.bf16.msra.mxu0 %v6390_v10  ;;  %5829 = vmatpush3.bf16.msra.mxu1 %v6391_v60  ;;  %v5395_v56 = vld [vmem:[%s8265_s9 + $0x20] sm:$0xff]  ;;  %v5398_v10 = vld [vmem:[%s8265_s9 + $0x68] sm:$0xff]  ;;  %v2969_v60 = vpack.c.bf16 %v2961_v16, %v2957_v13  ;;  %v2971_v44 = vpack.c.bf16 %v2963_v52, %v2959_v25  ;;  %v6431_v41 = vld [vmem:[%s8267_s11 + $0x298] sm:$0xff]  }
 0x807   : > { %3748 = vmatprep.mubr.bf16.mxu0 %v2970_v4  ;;  %3796 = vmatprep.mubr.bf16.mxu1 %v2972_v31  ;;  %v5397_v28 = vld [vmem:[%s8265_s9 + $0x60] sm:$0xff]  ;;  %v2976_v4 = vpack.c.bf16 %v2968_v55, %v2968_v55  ;;  %v6432_v38 = vld [vmem:[%s8267_s11 + $0x250] sm:$0xff]   ;;  %v6438_v52 = vld [vmem:[%s8267_s11 + $0x208] sm:$0xff]  }
 0x808   : > { %5802 = vmatprep.subr.bf16.mxu0 %v6392_v58  ;;  %5830 = vmatprep.subr.bf16.mxu1 %v6393_v47  ;;  %v2951_v58 = vadd.f32 %v7709_v36, %v2800_v22  ;;  %v2974_v47 = vpack.c.bf16 %v2966_v51, %v2966_v51  ;;  %v5469_v31 = vcombine.high %v5395_v56, %v5397_v28  ;;  %v6420_v22 = vld [vmem:[%s8267_s11 + $0x268] sm:$0xff]   ;;  %v6424_v24 = vld [vmem:[%s8267_s11 + $0x260] sm:$0xff]   ;;  %v6433_v17 = vld [vmem:[%s8267_s11 + $0x2d0] sm:$0xff]  }
 0x809   : > { %v6427_v35 = vld [vmem:[%s8267_s11 + $0x2a0] sm:$0xff]   ;;  %v6434_v11 = vld [vmem:[%s8267_s11 + $0x210] sm:$0xff]  }
 0x80a   : > { %5803 = vmatpush3.bf16.msra.mxu0 %v6394_v8  ;;  %5831 = vmatpush3.bf16.msra.mxu1 %v6395_v32  ;;  %v5471_v8 = vcombine.high %v5396_v1, %v5398_v10  ;;  %v2965_v32 = vmax.f32 %v2900_v45, 0.0  ;;  %v6435_v16 = vld [vmem:[%s8267_s11 + $0x290] sm:$0xff]   ;;  %v6441_v13 = vld [vmem:[%s8267_s11 + $0x2c0] sm:$0xff]  }
 0x80b   : > { %5804 = vmatprep.subr.bf16.mxu0 %v6396_v0  ;;  %5832 = vmatprep.subr.bf16.mxu1 %v6397_v43  ;;  %v2967_v0 = vmax.f32 %v2951_v58, 0.0  ;;  %v5468_v43 = vcombine.low %v5395_v56, %v5397_v28  ;;  %v6442_v51 = vld [vmem:[%s8267_s11 + $0x200] sm:$0xff]   ;;  %v7990_v56 = vld [vmem:[%s8265_s9 + $0xb0] sm:$0xff]  ;;  %v8000_v28 = vld [vmem:[%s8265_s9 + $0xb8] sm:$0xff] }
 0x80c   : > { %v2973_v9 = vpack.c.bf16 %v2965_v32, %v2965_v32  ;;  %v6443_v55 = vld [vmem:[%s8267_s11 + $0x280] sm:$0xff]   ;;  %v7995_v25 = vld [vmem:[%s8265_s9 + $0xf0] sm:$0xff] }
 0x80d   : > { %v2975_v36 = vpack.c.bf16 %v2967_v0, %v2967_v0 }
 0x80e   : > { %5805 = vmatpush3.bf16.msra.mxu0 %v6398_v46  ;;  %5833 = vmatpush3.bf16.msra.mxu1 %v6399_v40  ;;  %v5470_v46 = vcombine.low %v5396_v1, %v5398_v10  ;;  %v6412_v40 = vld [vmem:[%s8267_s11 + $0x278] sm:$0xff]   ;;  %v5589_v1 = vcombine.low %v7990_v56, %v7995_v25  ;;  %v5590_v10 = vcombine.high %v7990_v56, %v7995_v25 }
 0x80f   : > { %5806 = vmatprep.subr.bf16.mxu0 %v6400_v23  ;;  %5834 = vmatprep.subr.bf16.mxu1 %v6401_v62  ;;  %v6413_v23 = vld [vmem:[%s8267_s11 + $0x2f8] sm:$0xff]  }
 0x810   : > { %v6414_v62 = vld [vmem:[%s8267_s11 + $0x238] sm:$0xff]  }
 0x812   : > { %5807 = vmatpush3.bf16.msra.mxu0 %v6402_v33  ;;  %5835 = vmatpush3.bf16.msra.mxu1 %v6403_v54  ;;  %v6415_v33 = vld [vmem:[%s8267_s11 + $0x2b8] sm:$0xff]   ;;  %v6416_v54 = vld [vmem:[%s8267_s11 + $0x270] sm:$0xff]  }
 0x813   : > { %5808 = vmatprep.subr.bf16.mxu0 %v6404_v27  ;;  %5836 = vmatprep.subr.bf16.mxu1 %v6405_v37  ;;  %v6417_v27 = vld [vmem:[%s8267_s11 + $0x2f0] sm:$0xff]  }
 0x814   : > { %v6418_v37 = vld [vmem:[%s8267_s11 + $0x230] sm:$0xff]  }
 0x816   : > { %5809 = vmatpush3.bf16.msra.mxu0 %v6406_v39  ;;  %5837 = vmatpush3.bf16.msra.mxu1 %v6407_v48  ;;  %v6422_v39 = vld [vmem:[%s8267_s11 + $0x228] sm:$0xff]  }
 0x817   : > { %5810 = vmatprep.subr.bf16.mxu0 %v6408_v49  ;;  %5838 = vmatprep.subr.bf16.mxu1 %v6409_v34  ;;  %v6423_v48 = vld [vmem:[%s8267_s11 + $0x2a8] sm:$0xff]   ;;  %v6425_v49 = vld [vmem:[%s8267_s11 + $0x2e0] sm:$0xff]  }
 0x818   : > { %v6426_v34 = vld [vmem:[%s8267_s11 + $0x220] sm:$0xff]  }
 0x81a   : > { %5811 = vmatpush3.bf16.msra.mxu0 %v6410_v3  ;;  %5839 = vmatpush3.bf16.msra.mxu1 %v6411_v12  ;;  %v6436_v3 = vld [vmem:[%s8267_s11 + $0x248] sm:$0xff]  }
 0x81b   : > { %3961 = vmatprep.subr.bf16.mxu0 %v5473_v20  ;;  %4012 = vmatprep.subr.bf16.mxu1 %v5475_v15  ;;  %v6437_v12 = vld [vmem:[%s8267_s11 + $0x2c8] sm:$0xff]   ;;  %v6440_v15 = vld [vmem:[%s8267_s11 + $0x240] sm:$0xff]  }
 0x81c   : > { %v6439_v20 = vld [vmem:[%s8267_s11 + $0x288] sm:$0xff]  }
 0x81d   : > { %3749 = vmatmul.mubr.bf16.vlgmr.msra.gmra.mxu0 %v2969_v60  ;;  %3797 = vmatmul.mubr.bf16.vlgmr.msra.gmra.mxu1 %v2971_v44  ;;  %v8009_v60 = vld [vmem:[%s8265_s9 + $0xf8] sm:$0xff] }
 0x81e   : > { %3756 = vmatprep.mubr.bf16.mxu0 %v2974_v47  ;;  %3804 = vmatprep.mubr.bf16.mxu1 %v2976_v4 }
 0x81f   : > { %3962 = vmatpush1.bf16.msra.mxu0 %v5472_v6  ;;  %4013 = vmatpush1.bf16.msra.mxu1 %v5474_v42  ;;  %v5591_v6 = vcombine.low %v8000_v28, %v8009_v60  ;;  %v5592_v42 = vcombine.high %v8000_v28, %v8009_v60  ;;  %v6446_v28 = vld [vmem:[%s8267_s11 + $0x338] sm:$0xff]   ;;  %v6448_v60 = vld [vmem:[%s8267_s11 + $0x370] sm:$0xff]  }
 0x820   : > { %3963 = vmatprep.subr.bf16.mxu0 %v5469_v31  ;;  %4014 = vmatprep.subr.bf16.mxu1 %v5471_v8 }
 0x823   : > { %3964 = vmatpush1.bf16.msra.mxu0 %v5468_v43  ;;  %4015 = vmatpush1.bf16.msra.mxu1 %v5470_v46 }
 0x824   : > { %5852 = vmatprep.subr.bf16.mxu0 %v6412_v40  ;;  %5880 = vmatprep.subr.bf16.mxu1 %v6413_v23 }
 0x825   : > { %3757 = vmatmul.mubr.bf16.gmra.mxu0 %v2973_v9  ;;  %3805 = vmatmul.mubr.bf16.gmra.mxu1 %v2975_v36 }
 0x826   : > { %3981 = vmatprep.mubr.bf16.mxu0 %v6681_v59  ;;  %4032 = vmatprep.mubr.bf16.mxu1 %v6681_v59 }
 0x82d   : > { %5476 = vmatmul.mubr.msk.bf16.vlgmr.msra.gmra.mxu0 %vm521_vm0, %v7559_v19  ;;  %5478 = vmatmul.mubr.msk.bf16.vlgmr.msra.gmra.mxu1 %vm521_vm0, %v7559_v19 }
 0x82e   : > { %3991 = vmatprep.mubr.bf16.mxu0 %v6681_v59  ;;  %4042 = vmatprep.mubr.bf16.mxu1 %v6681_v59 }
 0x82f   : > { %5853 = vmatpush3.bf16.msra.mxu0 %v6414_v62  ;;  %5881 = vmatpush3.bf16.msra.mxu1 %v6415_v33 }
 0x830   : > { %5854 = vmatprep.subr.bf16.mxu0 %v6416_v54  ;;  %5882 = vmatprep.subr.bf16.mxu1 %v6417_v27 }
 0x833   : > { %5855 = vmatpush3.bf16.msra.mxu0 %v6418_v37  ;;  %5883 = vmatpush3.bf16.msra.mxu1 %v6419_v30 }
 0x834   : > { %5856 = vmatprep.subr.bf16.mxu0 %v6420_v22  ;;  %5884 = vmatprep.subr.bf16.mxu1 %v6421_v14 }
 0x835   : > { %5477 = vmatmul.mubr.msk.bf16.gmra.mxu0 %vm521_vm0, %v7577_v63  ;;  %5479 = vmatmul.mubr.msk.bf16.gmra.mxu1 %vm521_vm0, %v7577_v63 }
 0x837   : > { %5857 = vmatpush3.bf16.msra.mxu0 %v6422_v39  ;;  %5885 = vmatpush3.bf16.msra.mxu1 %v6423_v48 }
 0x838   : > { %5858 = vmatprep.subr.bf16.mxu0 %v6424_v24  ;;  %5886 = vmatprep.subr.bf16.mxu1 %v6425_v49 }
 0x83b   : > { %5859 = vmatpush3.bf16.msra.mxu0 %v6426_v34  ;;  %5887 = vmatpush3.bf16.msra.mxu1 %v6427_v35 }
 0x83c   : > { %5860 = vmatprep.subr.bf16.mxu0 %v6428_v53  ;;  %5888 = vmatprep.subr.bf16.mxu1 %v6429_v5 }
 0x83f   : > { %5861 = vmatpush3.bf16.msra.mxu0 %v6430_v61  ;;  %5889 = vmatpush3.bf16.msra.mxu1 %v6431_v41 }
 0x840   : > { %5862 = vmatprep.subr.bf16.mxu0 %v6432_v38  ;;  %5890 = vmatprep.subr.bf16.mxu1 %v6433_v17 }
 0x843   : > { %5863 = vmatpush3.bf16.msra.mxu0 %v6434_v11  ;;  %5891 = vmatpush3.bf16.msra.mxu1 %v6435_v16 }
 0x844   : > { %5864 = vmatprep.subr.bf16.mxu0 %v6436_v3  ;;  %5892 = vmatprep.subr.bf16.mxu1 %v6437_v12 }
 0x847   : > { %5865 = vmatpush3.bf16.msra.mxu0 %v6438_v52  ;;  %5893 = vmatpush3.bf16.msra.mxu1 %v6439_v20 }
 0x848   : > { %5866 = vmatprep.subr.bf16.mxu0 %v6440_v15  ;;  %5894 = vmatprep.subr.bf16.mxu1 %v6441_v13 }
 0x84b   : > { %5867 = vmatpush3.bf16.msra.mxu0 %v6442_v51  ;;  %5895 = vmatpush3.bf16.msra.mxu1 %v6443_v55 }
 0x84c   : > { %4511 = vmatprep.subr.bf16.mxu0 %v5590_v10  ;;  %4562 = vmatprep.subr.bf16.mxu1 %v5592_v42 }
 0x8bd   : > { %v5756_v44 = vpop.f32.mrf.mxu0  ;;  %v5784_v45 = vpop.f32.mrf.mxu1 }
 0x8bf   : > { %v5757_v58 = vpop.f32.mrf.mxu0  ;;  %v5785_v47 = vpop.f32.mrf.mxu1 }
 0x8c0   : > { %v5758_v4 = vadd.f32 %v5757_v58, %v5756_v44  ;;  %v5786_v31 = vadd.f32 %v5785_v47, %v5784_v45 }
 0x8c1   : > { %v5759_v8 = vpop.f32.mrf.mxu0  ;;  %v5787_v32 = vpop.f32.mrf.mxu1 }
 0x8c2   : > { %v3511_v0 = vadd.f32 %v5786_v31, %v5758_v4 }
 0x8c3   : > { %v5760_v43 = vpop.f32.mrf.mxu0  ;;  %v5788_v46 = vpop.f32.mrf.mxu1 }
 0x8c4   : > { %v5761_v9 = vadd.f32 %v5760_v43, %v5759_v8  ;;  %v5789_v36 = vadd.f32 %v5788_v46, %v5787_v32  ;;  %v5403_v8 = vld [vmem:[%s8266_s10 + $0x8] sm:$0xf] }
 0x8c5   : > { %v5762_v40 = vpop.f32.mrf.mxu0  ;;  %v5790_v23 = vpop.f32.mrf.mxu1  ;;  %v3896_v43 = vrot.slane %v5403_v8, %v7715_v21  ;;  %v3904_v46 = vrot.slane %v5403_v8, %v7717_v18 }
 0x8c6   : > { %v3514_v62 = vadd.f32 %v5789_v36, %v5761_v9  ;;  %v3892_v9 = vrot.slane %v5403_v8, %v7722_v29  ;;  %v3900_v36 = vrot.slane %v5403_v8, %v7724_v57 }
 0x8c7   : > { %v5763_v33 = vpop.f32.mrf.mxu0  ;;  %v5791_v54 = vpop.f32.mrf.mxu1 }
 0x8c8   : > { %v5764_v27 = vadd.f32 %v5763_v33, %v5762_v40  ;;  %v5792_v37 = vadd.f32 %v5791_v54, %v5790_v23 }
 0x8c9   : > { %v5765_v30 = vpop.f32.mrf.mxu0  ;;  %v5793_v22 = vpop.f32.mrf.mxu1 }
 0x8ca   : > { %v3519_v14 = vadd.f32 %v5792_v37, %v5764_v27 }
 0x8cb   : > { %v5766_v39 = vpop.f32.mrf.mxu0  ;;  %v5794_v48 = vpop.f32.mrf.mxu1 }
 0x8dd   : > { %v5812_v24 = vpop.f32.mrf.mxu0  ;;  %v5840_v49 = vpop.f32.mrf.mxu1 }
 0x8df   : > { %v5813_v34 = vpop.f32.mrf.mxu0  ;;  %v5841_v35 = vpop.f32.mrf.mxu1 }
 0x8e0   : > { %v5814_v53 = vadd.f32 %v5813_v34, %v5812_v24  ;;  %v5842_v5 = vadd.f32 %v5841_v35, %v5840_v49  ;;  %v5512_v24 = vld [vmem:[%s8265_s9 + $0x30] sm:$0xff] }
 0x8e1   : > { %v5815_v61 = vpop.f32.mrf.mxu0  ;;  %v5843_v41 = vpop.f32.mrf.mxu1  ;;  %v5514_v35 = vld [vmem:[%s8265_s9 + $0x70] sm:$0xff] }
 0x8e2   : > { %v3751_v38 = vadd.f32 %v5814_v53, %v3511_v0  ;;  %v5513_v53 = vld [vmem:[%s8265_s9 + $0x38] sm:$0xff] }
 0x8e3   : > { %v5816_v17 = vpop.f32.mrf.mxu0  ;;  %v5844_v11 = vpop.f32.mrf.mxu1 }
 0x8e4   : > { %v8015_v16 = vadd.f32 %v5842_v5, %v3751_v38  ;;  %v5817_v3 = vadd.f32 %v5816_v17, %v5815_v61  ;;  %v5845_v12 = vadd.f32 %v5844_v11, %v5843_v41  ;;  %v5515_v5 = vld [vmem:[%s8265_s9 + $0x78] sm:$0xff] }
 0x8e5   : > { %v5818_v52 = vpop.f32.mrf.mxu0  ;;  %v5846_v20 = vpop.f32.mrf.mxu1 }
 0x8e6   : > { %v3754_v15 = vadd.f32 %v5817_v3, %v3514_v62 }
 0x8e7   : > { %v5819_v13 = vpop.f32.mrf.mxu0  ;;  %v5847_v51 = vpop.f32.mrf.mxu1 }
 0x8e8   : > { %v8017_v55 = vadd.f32 %v5845_v12, %v3754_v15  ;;  %v5820_v10 = vadd.f32 %v5819_v13, %v5818_v52  ;;  %v5848_v42 = vadd.f32 %v5847_v51, %v5846_v20 }
 0x8e9   : > { %v5821_v44 = vpop.f32.mrf.mxu0  ;;  %v5849_v45 = vpop.f32.mrf.mxu1 }
 0x8ea   : > { %v3759_v58 = vadd.f32 %v5820_v10, %v3519_v14  ;;  %v5586_v10 = vcombine.high %v5512_v24, %v5514_v35 }
 0x8eb   : > { %v5822_v47 = vpop.f32.mrf.mxu0  ;;  %v5850_v4 = vpop.f32.mrf.mxu1 }
 0x8ec   : > { %v8019_v31 = vadd.f32 %v5848_v42, %v3759_v58  ;;  %v5588_v42 = vcombine.high %v5513_v53, %v5515_v5 }
 0x8ed   : > { %v3983_v32 = vpop.f32.mrf.mxu0  ;;  %v4034_v0 = vpop.f32.mrf.mxu1 }
 0x8ee   : > { %v3984_v22 = vadd.f32 %v3983_v32, %v3892_v9  ;;  %v4035_v14 = vadd.f32 %v4034_v0, %v3900_v36 }
 0x8ef   : > { %v3985_v40 = vpop.f32.mrf.mxu0  ;;  %v4036_v23 = vpop.f32.mrf.mxu1 }
 0x8f0   : > { %v3986_v54 = vadd.f32 %v3985_v40, %v3896_v43  ;;  %v4037_v27 = vadd.f32 %v4036_v23, %v3904_v46  ;;  %v4051_v20 = vmax.f32 %v3984_v22, 0.0  ;;  %v4053_v15 = vmax.f32 %v4035_v14, 0.0  ;;  %v6445_v14 = vld [vmem:[%s8267_s11 + $0x3f8] sm:$0xff]  }
 0x8f1   : > { %v3987_v62 = vpop.f32.mrf.mxu0  ;;  %v4038_v33 = vpop.f32.mrf.mxu1 }
 0x8f2   : > { %v3988_v37 = vadd.f32 %v3987_v62, %v3892_v9  ;;  %v4039_v30 = vadd.f32 %v4038_v33, %v3900_v36  ;;  %v4052_v11 = vmax.f32 %v3986_v54, 0.0  ;;  %v4054_v3 = vmax.f32 %v4037_v27, 0.0 }
 0x8f3   : > { %v3989_v39 = vpop.f32.mrf.mxu0  ;;  %v4040_v48 = vpop.f32.mrf.mxu1 }
 0x8f4   : > { %v3990_v49 = vadd.f32 %v3989_v39, %v3896_v43  ;;  %v4041_v34 = vadd.f32 %v4040_v48, %v3904_v46  ;;  %v4055_v61 = vmax.f32 %v3988_v37, 0.0  ;;  %v4057_v41 = vmax.f32 %v4039_v30, 0.0  ;;  %v6453_v39 = vld [vmem:[%s8267_s11 + $0x3e8] sm:$0xff]  }
 0x8f5   : > { %v3993_v38 = vpop.f32.mrf.mxu0  ;;  %v4044_v17 = vpop.f32.mrf.mxu1  ;;  %v5585_v37 = vcombine.low %v5512_v24, %v5514_v35  ;;  %v6454_v48 = vld [vmem:[%s8267_s11 + $0x328] sm:$0xff]   ;;  %v6458_v35 = vld [vmem:[%s8267_s11 + $0x320] sm:$0xff]  }
 0x8f6   : > { %v4056_v12 = vmax.f32 %v3990_v49, 0.0  ;;  %v4058_v52 = vmax.f32 %v4041_v34, 0.0  ;;  %v4063_v4 = vpack.c.bf16 %v4055_v61, %v4051_v20  ;;  %v4065_v8 = vpack.c.bf16 %v4057_v41, %v4053_v15  ;;  %v6455_v24 = vld [vmem:[%s8267_s11 + $0x3a8] sm:$0xff]   ;;  %v6456_v49 = vld [vmem:[%s8267_s11 + $0x360] sm:$0xff]   ;;  %v6461_v61 = vld [vmem:[%s8267_s11 + $0x3d8] sm:$0xff]  }
 0x8f7   : > { %v3995_v13 = vpop.f32.mrf.mxu0  ;;  %v4046_v51 = vpop.f32.mrf.mxu1  ;;  %v3994_v32 = vadd.f32 %v3993_v38, %v3892_v9  ;;  %v4045_v0 = vadd.f32 %v4044_v17, %v3900_v36  ;;  %v6444_v36 = vld [vmem:[%s8267_s11 + $0x378] sm:$0xff]   ;;  %v6457_v34 = vld [vmem:[%s8267_s11 + $0x3e0] sm:$0xff]   ;;  %v6464_v17 = vld [vmem:[%s8267_s11 + $0x350] sm:$0xff]  }
 0x8f8   : > { %v4064_v44 = vpack.c.bf16 %v4056_v12, %v4052_v11  ;;  %v4066_v45 = vpack.c.bf16 %v4058_v52, %v4054_v3  ;;  %v3996_v58 = vadd.f32 %v3995_v13, %v3896_v43  ;;  %v4047_v47 = vadd.f32 %v4046_v51, %v3904_v46  ;;  %v6462_v41 = vld [vmem:[%s8267_s11 + $0x318] sm:$0xff]   ;;  %v6465_v11 = vld [vmem:[%s8267_s11 + $0x3d0] sm:$0xff]   ;;  %v6468_v52 = vld [vmem:[%s8267_s11 + $0x348] sm:$0xff]  }
 0x8f9   : > { %v3997_v40 = vpop.f32.mrf.mxu0  ;;  %v4048_v23 = vpop.f32.mrf.mxu1  ;;  %v5587_v43 = vcombine.low %v5513_v53, %v5515_v5  ;;  %v4059_v46 = vmax.f32 %v3994_v32, 0.0  ;;  %v4061_v9 = vmax.f32 %v4045_v0, 0.0  ;;  %v6459_v53 = vld [vmem:[%s8267_s11 + $0x3a0] sm:$0xff]   ;;  %v6460_v5 = vld [vmem:[%s8267_s11 + $0x358] sm:$0xff]   ;;  %v6466_v3 = vld [vmem:[%s8267_s11 + $0x310] sm:$0xff]  }
 0x8fa   : > { %v4060_v62 = vmax.f32 %v3996_v58, 0.0  ;;  %v4062_v33 = vmax.f32 %v4047_v47, 0.0  ;;  %4295 = vmatprep.mubr.bf16.mxu0 %v4064_v44  ;;  %4343 = vmatprep.mubr.bf16.mxu1 %v4066_v45  ;;  %v6463_v38 = vld [vmem:[%s8267_s11 + $0x398] sm:$0xff]   ;;  %v6467_v12 = vld [vmem:[%s8267_s11 + $0x390] sm:$0xff]   ;;  %v6469_v20 = vld [vmem:[%s8267_s11 + $0x3c8] sm:$0xff]  }
 0x8fb   : > { %v3998_v54 = vpop.f32.mrf.mxu0  ;;  %v4049_v27 = vpop.f32.mrf.mxu1  ;;  %4296 = vmatmul.mubr.bf16.vlgmr.msra.gmra.mxu0 %v4063_v4  ;;  %4344 = vmatmul.mubr.bf16.vlgmr.msra.gmra.mxu1 %v4065_v8  ;;  %v4067_v56 = vpack.c.bf16 %v4059_v46, %v4059_v46  ;;  %v4069_v25 = vpack.c.bf16 %v4061_v9, %v4061_v9  ;;  %v6470_v15 = vld [vmem:[%s8267_s11 + $0x308] sm:$0xff]   ;;  %v6472_v51 = vld [vmem:[%s8267_s11 + $0x340] sm:$0xff]  }
 0x8fc   : > { %v4068_v30 = vpack.c.bf16 %v4060_v62, %v4060_v62  ;;  %v4070_v22 = vpack.c.bf16 %v4062_v33, %v4062_v33  ;;  %4512 = vmatpush1.bf16.msra.mxu0 %v5589_v1  ;;  %4563 = vmatpush1.bf16.msra.mxu1 %v5591_v6  ;;  %v6447_v1 = vld [vmem:[%s8267_s11 + $0x3b8] sm:$0xff]   ;;  %v6451_v6 = vld [vmem:[%s8267_s11 + $0x3b0] sm:$0xff]   ;;  %v6471_v13 = vld [vmem:[%s8267_s11 + $0x388] sm:$0xff]  }
 0x8fd   : > { %4513 = vmatprep.subr.bf16.mxu0 %v5586_v10  ;;  %4564 = vmatprep.subr.bf16.mxu1 %v5588_v42  ;;  %v6473_v10 = vld [vmem:[%s8267_s11 + $0x3c0] sm:$0xff]  }
 0x8fe   : > { %4303 = vmatprep.mubr.bf16.mxu0 %v4068_v30  ;;  %4351 = vmatprep.mubr.bf16.mxu1 %v4070_v22  ;;  %v6474_v42 = vld [vmem:[%s8267_s11 + $0x300] sm:$0xff]  }
 0x8ff   : > { %v6475_v44 = vld [vmem:[%s8267_s11 + $0x380] sm:$0xff]  }
 0x900   : > { %4514 = vmatpush1.bf16.msra.mxu0 %v5585_v37  ;;  %4565 = vmatpush1.bf16.msra.mxu1 %v5587_v43 }
 0x901   : > { %5908 = vmatprep.subr.bf16.mxu0 %v6444_v36  ;;  %5936 = vmatprep.subr.bf16.mxu1 %v6445_v14 }
 0x903   : > { %4304 = vmatmul.mubr.bf16.gmra.mxu0 %v4067_v56  ;;  %4352 = vmatmul.mubr.bf16.gmra.mxu1 %v4069_v25 }
 0x904   : > { %4531 = vmatprep.mubr.bf16.mxu0 %v6681_v59  ;;  %4582 = vmatprep.mubr.bf16.mxu1 %v6681_v59 }
 0x90b   : > { %5593 = vmatmul.mubr.msk.bf16.vlgmr.msra.gmra.mxu0 %vm521_vm0, %v7559_v19  ;;  %5595 = vmatmul.mubr.msk.bf16.vlgmr.msra.gmra.mxu1 %vm521_vm0, %v7559_v19  ;;  %v6449_v19 = vld [vmem:[%s8267_s11 + $0x3f0] sm:$0xff]  }
 0x90c   : > { %4541 = vmatprep.mubr.bf16.mxu0 %v6681_v59  ;;  %4592 = vmatprep.mubr.bf16.mxu1 %v6681_v59  ;;  %v6450_v59 = vld [vmem:[%s8267_s11 + $0x330] sm:$0xff]  }
 0x90d   : > { %5909 = vmatpush3.bf16.msra.mxu0 %v6446_v28  ;;  %5937 = vmatpush3.bf16.msra.mxu1 %v6447_v1 }
 0x90e   : > { %5910 = vmatprep.subr.bf16.mxu0 %v6448_v60  ;;  %5938 = vmatprep.subr.bf16.mxu1 %v6449_v19 }
 0x911   : > { %5911 = vmatpush3.bf16.msra.mxu0 %v6450_v59  ;;  %5939 = vmatpush3.bf16.msra.mxu1 %v6451_v6  ;;  %v5520_v59 = vld [vmem:[%s8266_s10 + $0xc] sm:$0xf] }
 0x912   : > { %5940 = vmatprep.subr.bf16.mxu1 %v6453_v39  ;;  %v4446_v39 = vrot.slane %v5520_v59, %v7715_v21 }
 0x913   : > { %5594 = vmatmul.mubr.msk.bf16.gmra.mxu0 %vm521_vm0, %v7577_v63  ;;  %5596 = vmatmul.mubr.msk.bf16.gmra.mxu1 %vm521_vm0, %v7577_v63  ;;  %v6452_v63 = vld [vmem:[%s8267_s11 + $0x368] sm:$0xff]  }
 0x914   : > { %5912 = vmatprep.subr.bf16.mxu0 %v6452_v63 }
 0x915   : > { %5913 = vmatpush3.bf16.msra.mxu0 %v6454_v48  ;;  %5941 = vmatpush3.bf16.msra.mxu1 %v6455_v24  ;;  %v4442_v48 = vrot.slane %v5520_v59, %v7722_v29  ;;  %v4450_v24 = vrot.slane %v5520_v59, %v7724_v57 }
 0x916   : > { %5914 = vmatprep.subr.bf16.mxu0 %v6456_v49  ;;  %5942 = vmatprep.subr.bf16.mxu1 %v6457_v34 }
 0x919   : > { %5915 = vmatpush3.bf16.msra.mxu0 %v6458_v35  ;;  %5943 = vmatpush3.bf16.msra.mxu1 %v6459_v53 }
 0x91a   : > { %5916 = vmatprep.subr.bf16.mxu0 %v6460_v5  ;;  %5944 = vmatprep.subr.bf16.mxu1 %v6461_v61 }
 0x91d   : > { %5917 = vmatpush3.bf16.msra.mxu0 %v6462_v41  ;;  %5945 = vmatpush3.bf16.msra.mxu1 %v6463_v38 }
 0x91e   : > { %5918 = vmatprep.subr.bf16.mxu0 %v6464_v17  ;;  %5946 = vmatprep.subr.bf16.mxu1 %v6465_v11 }
 0x921   : > { %5919 = vmatpush3.bf16.msra.mxu0 %v6466_v3  ;;  %5947 = vmatpush3.bf16.msra.mxu1 %v6467_v12 }
 0x922   : > { %5920 = vmatprep.subr.bf16.mxu0 %v6468_v52  ;;  %5948 = vmatprep.subr.bf16.mxu1 %v6469_v20 }
 0x925   : > { %5921 = vmatpush3.bf16.msra.mxu0 %v6470_v15  ;;  %5949 = vmatpush3.bf16.msra.mxu1 %v6471_v13 }
 0x926   : > { %5922 = vmatprep.subr.bf16.mxu0 %v6472_v51  ;;  %5950 = vmatprep.subr.bf16.mxu1 %v6473_v10 }
 0x929   : > { %5923 = vmatpush3.bf16.msra.mxu0 %v6474_v42  ;;  %5951 = vmatpush3.bf16.msra.mxu1 %v6475_v44 }
 0x92a   : > { %6225 = vmatprep.subr.mxu0 %v6649_v7 }
 0x9bb   : > { %v5868_v45 = vpop.f32.mrf.mxu0  ;;  %v5896_v58 = vpop.f32.mrf.mxu1 }
 0x9bd   : > { %v5869_v47 = vpop.f32.mrf.mxu0  ;;  %v5897_v4 = vpop.f32.mrf.mxu1 }
 0x9be   : > { %v5870_v8 = vadd.f32 %v5869_v47, %v5868_v45  ;;  %v5898_v32 = vadd.f32 %v5897_v4, %v5896_v58 }
 0x9bf   : > { %v5871_v0 = vpop.f32.mrf.mxu0  ;;  %v5899_v40 = vpop.f32.mrf.mxu1 }
 0x9c0   : > { %v4346_v23 = vadd.f32 %v5898_v32, %v5870_v8 }
 0x9c1   : > { %v5872_v62 = vpop.f32.mrf.mxu0  ;;  %v5900_v33 = vpop.f32.mrf.mxu1 }
 0x9c2   : > { %v8156_v54 = vadd.f32 %v4346_v23, %v8015_v16  ;;  %v5873_v27 = vadd.f32 %v5872_v62, %v5871_v0  ;;  %v5901_v37 = vadd.f32 %v5900_v33, %v5899_v40 }
 0x9c3   : > { %v5874_v30 = vpop.f32.mrf.mxu0  ;;  %v5902_v22 = vpop.f32.mrf.mxu1 }
 0x9c4   : > { %v4349_v43 = vadd.f32 %v5901_v37, %v5873_v27 }
 0x9c5   : > { %v5875_v46 = vpop.f32.mrf.mxu0  ;;  %v5903_v9 = vpop.f32.mrf.mxu1 }
 0x9c6   : > { %v8159_v36 = vadd.f32 %v4349_v43, %v8017_v55  ;;  %v5876_v14 = vadd.f32 %v5875_v46, %v5874_v30  ;;  %v5904_v56 = vadd.f32 %v5903_v9, %v5902_v22  ;;  %v4454_v55 = vrot.slane %v5520_v59, %v7717_v18 }
 0x9c7   : > { %v5877_v25 = vpop.f32.mrf.mxu0  ;;  %v5905_v28 = vpop.f32.mrf.mxu1 }
 0x9c8   : > { %v4354_v1 = vadd.f32 %v5904_v56, %v5876_v14 }
 0x9c9   : > { %v5878_v60 = vpop.f32.mrf.mxu0  ;;  %v5906_v19 = vpop.f32.mrf.mxu1 }
 0x9ca   : > { %v8162_v16 = vadd.f32 %v4354_v1, %v8019_v31 }
 0x9cb   : > { %v4533_v6 = vpop.f32.mrf.mxu0  ;;  %v4584_v63 = vpop.f32.mrf.mxu1 }
 0x9cc   : > { %v4534_v38 = vadd.f32 %v4533_v6, %v4442_v48  ;;  %v4585_v17 = vadd.f32 %v4584_v63, %v4450_v24 }
 0x9cd   : > { %v4535_v49 = vpop.f32.mrf.mxu0  ;;  %v4586_v34 = vpop.f32.mrf.mxu1 }
 0x9ce   : > { %v4536_v31 = vadd.f32 %v4535_v49, %v4446_v39  ;;  %v4587_v5 = vadd.f32 %v4586_v34, %v4454_v55  ;;  %v4601_v10 = vmax.f32 %v4534_v38, 0.0  ;;  %v4603_v42 = vmax.f32 %v4585_v17, 0.0  ;;  %v5629_v49 = vld [vmem:[%s8268_s12] ss:$0 sm:$0xff] }
 0x9cf   : > { %v4537_v35 = vpop.f32.mrf.mxu0  ;;  %v4588_v53 = vpop.f32.mrf.mxu1 }
 0x9d0   : > { %v4538_v61 = vadd.f32 %v4537_v35, %v4442_v48  ;;  %v4589_v41 = vadd.f32 %v4588_v53, %v4450_v24  ;;  %v4602_v15 = vmax.f32 %v4536_v31, 0.0  ;;  %v4604_v57 = vmax.f32 %v4587_v5, 0.0 }
 0x9d1   : > { %v4539_v11 = vpop.f32.mrf.mxu0  ;;  %v4590_v3 = vpop.f32.mrf.mxu1 }
 0x9d2   : > { %v4540_v12 = vadd.f32 %v4539_v11, %v4446_v39  ;;  %v4591_v21 = vadd.f32 %v4590_v3, %v4454_v55  ;;  %v4605_v52 = vmax.f32 %v4538_v61, 0.0  ;;  %v4607_v18 = vmax.f32 %v4589_v41, 0.0 }
 0x9d3   : > { %v4543_v20 = vpop.f32.mrf.mxu0  ;;  %v4594_v29 = vpop.f32.mrf.mxu1 }
 0x9d4   : > { %v4606_v13 = vmax.f32 %v4540_v12, 0.0  ;;  %v4608_v51 = vmax.f32 %v4591_v21, 0.0  ;;  %v4613_v32 = vpack.c.bf16 %v4605_v52, %v4601_v10  ;;  %v4615_v0 = vpack.c.bf16 %v4607_v18, %v4603_v42 }
 0x9d5   : > { %v4545_v44 = vpop.f32.mrf.mxu0  ;;  %v4596_v45 = vpop.f32.mrf.mxu1  ;;  %v4544_v40 = vadd.f32 %v4543_v20, %v4442_v48  ;;  %v4595_v23 = vadd.f32 %v4594_v29, %v4450_v24 }
 0x9d6   : > { %v4614_v58 = vpack.c.bf16 %v4606_v13, %v4602_v15  ;;  %v4616_v47 = vpack.c.bf16 %v4608_v51, %v4604_v57  ;;  %v4546_v4 = vadd.f32 %v4545_v44, %v4446_v39  ;;  %v4597_v8 = vadd.f32 %v4596_v45, %v4454_v55 }
 0x9d7   : > { %v4547_v62 = vpop.f32.mrf.mxu0  ;;  %v4598_v33 = vpop.f32.mrf.mxu1  ;;  %v4609_v9 = vmax.f32 %v4544_v40, 0.0  ;;  %v4611_v14 = vmax.f32 %v4595_v23, 0.0 }
 0x9d8   : > { %v4610_v27 = vmax.f32 %v4546_v4, 0.0  ;;  %v4612_v37 = vmax.f32 %v4597_v8, 0.0  ;;  %4845 = vmatprep.mubr.bf16.mxu0 %v4614_v58  ;;  %4893 = vmatprep.mubr.bf16.mxu1 %v4616_v47 }
 0x9d9   : > { %v4548_v30 = vpop.f32.mrf.mxu0  ;;  %v4599_v22 = vpop.f32.mrf.mxu1  ;;  %4846 = vmatmul.mubr.bf16.vlgmr.msra.gmra.mxu0 %v4613_v32  ;;  %4894 = vmatmul.mubr.bf16.vlgmr.msra.gmra.mxu1 %v4615_v0  ;;  %v4617_v56 = vpack.c.bf16 %v4609_v9, %v4609_v9  ;;  %v4619_v25 = vpack.c.bf16 %v4611_v14, %v4611_v14 }
 0x9da   : > { %v4618_v43 = vpack.c.bf16 %v4610_v27, %v4610_v27  ;;  %v4620_v46 = vpack.c.bf16 %v4612_v37, %v4612_v37  ;;  %v5000_v27 = vld [vmem:[%s8269_s13 + $0x18] sm:$0xff]  ;;  %v4999_v37 = vld [vmem:[%s8269_s13 + $0x10] sm:$0xff]  ;;  %v4998_v30 = vld [vmem:[%s8269_s13 + $0x8] sm:$0xff] }
 0x9db   : > { %6226 = vmatpush3.msra.mxu0 %v5000_v27  ;;  %v4997_v22 = vld [vmem:[%s8269_s13] sm:$0xff] }
 0x9dc   : > { %4853 = vmatprep.mubr.bf16.mxu0 %v4618_v43  ;;  %4901 = vmatprep.mubr.bf16.mxu1 %v4620_v46 }
 0x9dd   : > { %6227 = vmatprep.subr.mxu0 %v6649_v7 }
 0x9de   : > { %6228 = vmatpush3.msra.mxu0 %v4999_v37 }
 0x9df   : > { %6229 = vmatprep.subr.mxu0 %v6649_v7 }
 0x9e0   : > { %6230 = vmatpush3.msra.mxu0 %v4998_v30 }
 0x9e1   : > { %4854 = vmatmul.mubr.bf16.gmra.mxu0 %v4617_v56  ;;  %4902 = vmatmul.mubr.bf16.gmra.mxu1 %v4619_v25 }
 0x9e2   : > { %6233 = vmatprep.mubr.msk.f32.mxu0 %vm6650_vm1, %v6649_v7  ;;  %6231 = vmatprep.subr.mxu0 %v6649_v7 }
 0x9e3   : > { %6232 = vmatpush3.msra.mxu0 %v4997_v22 }
 0xa99   : > { %v5924_v28 = vpop.f32.mrf.mxu0  ;;  %v5952_v1 = vpop.f32.mrf.mxu1 }
 0xa9b   : > { %v5925_v60 = vpop.f32.mrf.mxu0  ;;  %v5953_v19 = vpop.f32.mrf.mxu1 }
 0xa9c   : > { %v5926_v59 = vadd.f32 %v5925_v60, %v5924_v28  ;;  %v5954_v6 = vadd.f32 %v5953_v19, %v5952_v1 }
 0xa9d   : > { %v5927_v63 = vpop.f32.mrf.mxu0  ;;  %v5955_v39 = vpop.f32.mrf.mxu1 }
 0xa9e   : > { %v4896_v55 = vadd.f32 %v5954_v6, %v5926_v59  ;;  %v5630_v6 = vld [vmem:[%s8263_s7] ss:$0 sm:$0xff] }
 0xa9f   : > { %v5928_v48 = vpop.f32.mrf.mxu0  ;;  %v5956_v24 = vpop.f32.mrf.mxu1 }
 0xaa0   : > { %v4909_v34 = vadd.f32 %v4896_v55, %v8156_v54  ;;  %v5929_v35 = vadd.f32 %v5928_v48, %v5927_v63  ;;  %v5957_v53 = vadd.f32 %v5956_v24, %v5955_v39  ;;  %v5631_v55 = vld [vmem:[%s8264_s8] ss:$0 sm:$0xff] }
 0xaa1   : > { %v5930_v31 = vpop.f32.mrf.mxu0  ;;  %v5958_v5 = vpop.f32.mrf.mxu1 }
 0xaa2   : > { %v4899_v61 = vadd.f32 %v5957_v53, %v5929_v35  ;;  %v4919_v41 = vadd.f32 %v5629_v49, %v4909_v34 }
 0xaa3   : > { %v5931_v38 = vpop.f32.mrf.mxu0  ;;  %v5959_v17 = vpop.f32.mrf.mxu1 }
 0xaa4   : > { %v4910_v11 = vadd.f32 %v4899_v61, %v8159_v36  ;;  %v5932_v3 = vadd.f32 %v5931_v38, %v5930_v31  ;;  %v5960_v12 = vadd.f32 %v5959_v17, %v5958_v5  ;;  %v4922_v21 = vadd.f32 %v4919_v41, %v7543_v2 }
 0xaa5   : > { %v5933_v52 = vpop.f32.mrf.mxu0  ;;  %v5961_v18 = vpop.f32.mrf.mxu1 }
 0xaa6   : > { %v4904_v20 = vadd.f32 %v5960_v12, %v5932_v3  ;;  %v4925_v29 = vsel %vm521_vm0, %v4922_v21, 0.0  ;;  %v4920_v54 = vadd.f32 %v5629_v49, %v4910_v11 }
 0xaa7   : > { %v5934_v15 = vpop.f32.mrf.mxu0  ;;  %v5962_v57 = vpop.f32.mrf.mxu1  ;;  %4926 = vadd.xlane.f32.xlu0 %v4925_v29  ;;  %v5001_v29 = vld [vmem:[%s8270_s14] sm:$0x1] }
 0xaa8   : > { %v4911_v13 = vadd.f32 %v4904_v20, %v8162_v16  ;;  %v4923_v51 = vadd.f32 %v4920_v54, %v7545_v26 }
 0xaaa   : > { %v4928_v10 = vsel %vm521_vm0, %v4923_v51, 0.0  ;;  %v4921_v36 = vadd.f32 %v5629_v49, %v4911_v13 }
 0xaab   : > { %4929 = vadd.xlane.f32.xlu1 %v4928_v10 }
 0xaac   : > { %v4924_v42 = vadd.f32 %v4921_v36, %v7565_v50 }
 0xaae   : > { %v4931_v2 = vsel %vm521_vm0, %v4924_v42, 0.0 }
 0xaaf   : > { %4932 = vadd.xlane.f32.xlu0 %v4931_v2 }
 0xb30   : > { %v4927_v44 = vpop.xlane.xlu0 %4926 }
 0xb31   : > { %v4934_v45 = vmul.f32 0.03125, %v4927_v44 }
 0xb33   : > { %v4937_v58 = vsub.f32 %v4922_v21, %v4934_v45 }
 0xb34   : > { %v4930_v47 = vpop.xlane.xlu1 %4929 }
 0xb35   : > { %v4935_v4 = vmul.f32 0.03125, %v4930_v47  ;;  %v4940_v8 = vmul.f32 %v4937_v58, %v4937_v58 }
 0xb37   : > { %v4938_v32 = vsub.f32 %v4923_v51, %v4935_v4  ;;  %v4943_v16 = vsel %vm521_vm0, %v4940_v8, 0.0 }
 0xb38   : > { %4944 = vadd.xlane.f32.xlu1 %v4943_v16  ;;  %v4933_v26 = vpop.xlane.xlu0 %4932 }
 0xb39   : > { %v4936_v0 = vmul.f32 0.03125, %v4933_v26  ;;  %v4941_v40 = vmul.f32 %v4938_v32, %v4938_v32 }
 0xb3b   : > { %v4939_v23 = vsub.f32 %v4924_v42, %v4936_v0  ;;  %v4946_v62 = vsel %vm521_vm0, %v4941_v40, 0.0 }
 0xb3c   : > { %4947 = vadd.xlane.f32.xlu0 %v4946_v62 }
 0xb3d   : > { %v4942_v50 = vmul.f32 %v4939_v23, %v4939_v23 }
 0xb3f   : > { %v4949_v33 = vsel %vm521_vm0, %v4942_v50, 0.0 }
 0xb40   : > { %4950 = vadd.xlane.f32.xlu1 %v4949_v33 }
 0xbc1   : > { %v4945_v43 = vpop.xlane.xlu1 %4944 }
 0xbc2   : > { %v4952_v46 = vmul.f32 0.03125, %v4945_v43 }
 0xbc4   : > { %v4955_v9 = vadd.f32 1e-05, %v4952_v46 }
 0xbc5   : > { %v4948_v14 = vpop.xlane.xlu0 %4947 }
 0xbc6   : > { %6578 = vrsqrt.f32 %v4955_v9  ;;  %v4953_v56 = vmul.f32 0.03125, %v4948_v14 }
 0xbc8   : > { %v4956_v25 = vadd.f32 1e-05, %v4953_v56 }
 0xbc9   : > { %v4951_v28 = vpop.xlane.xlu1 %4950 }
 0xbca   : > { %6580 = vrsqrt.f32 %v4956_v25  ;;  %v4954_v1 = vmul.f32 0.03125, %v4951_v28 }
 0xbcc   : > { %v4957_v60 = vadd.f32 1e-05, %v4954_v1 }
 0xbce   : > { %6582 = vrsqrt.f32 %v4957_v60 }
 0xbd3   : > { %v6579_v19 = vpop.eup %6578 }
 0xbd4   : > { %v4961_v59 = vmul.f32 %v6579_v19, %v4937_v58 }
 0xbd6   : > { %v4971_v63 = vmul.f32 %v5630_v6, %v4961_v59 }
 0xbd7   : > { %v6581_v7 = vpop.eup %6580 }
 0xbd8   : > { %v4962_v39 = vmul.f32 %v6581_v7, %v4938_v32  ;;  %v4981_v49 = vadd.f32 %v5631_v55, %v4971_v63 }
 0xbda   : > { %v4972_v48 = vmul.f32 %v5630_v6, %v4962_v39  ;;  %v4984_v5 = vsel %vm521_vm0, %v4981_v49, 0.0 }
 0xbdb   : > { %v6583_v24 = vpop.eup %6582 }
 0xbdc   : > { %v4982_v34 = vadd.f32 %v5631_v55, %v4972_v48  ;;  %v4963_v35 = vmul.f32 %v6583_v24, %v4939_v23 }
 0xbde   : > { %v4985_v53 = vsel %vm521_vm0, %v4982_v34, 0.0  ;;  %v4973_v31 = vmul.f32 %v5630_v6, %v4963_v35 }
 0xbdf   : > { %v4986_v41 = vadd.f32 %v4985_v53, %v4984_v5 }
 0xbe0   : > { %v4983_v61 = vadd.f32 %v5631_v55, %v4973_v31 }
 0xbe2   : > { %v4987_v38 = vsel %vm521_vm0, %v4983_v61, 0.0 }
 0xbe3   : > { %v4988_v17 = vadd.f32 %v4987_v38, %v4986_v41 }
 0xbe5   : > { %v4989_v11 = vrot.slane %v4988_v17, 4 }
 0xbe7   : > { %v4990_v3 = vadd.f32 %v4989_v11, %v4988_v17 }
 0xbe9   : > { %v4991_v12 = vrot.slane %v4990_v3, 2 }
 0xbeb   : > { %v4992_v21 = vadd.f32 %v4991_v12, %v4990_v3 }
 0xbed   : > { %v4993_v52 = vrot.slane %v4992_v21, 1 }
 0xbef   : > { %v4994_v18 = vadd.f32 %v4993_v52, %v4992_v21 }
 0xbf1   : > { %v4996_v20 = vmul.f32 0.041666668, %v4994_v18 }
 0xbf3   : > { %6234 = vmatmul.mubr.msk.f32.vlgmr.msra.gmra.mxu0 %vm521_vm0, %v4996_v20 }
 0xcb3   : > { %v5071_v54 = vpop.f32.mrf.mxu0 }
 0xcb4   : > { %v5072_v15 = vadd.f32 %v5071_v54, %v5001_v29 }
 0xcb5   : > { %v6235_v57 = vpop.f32.mrf.mxu0 }
 0xcb6   : > { %5076 = vst.msk [vmem:[%s486_s30] sm:$0x1] %vm5075_vm9, %v5072_v15 }
 0xcb7   : > { %6600 = shalt.err (!%p6597_p3)
}
 0xcb8   : > { %s6601_s27 = scalar_lea.hbm %s8221_s23, 16  ;;  %s6605_s0 = scalar_lea.hbm %s8271_s15, 32 }
 0xcb9   : > { %p6602_p4 = scmp.ne.s32.totalorder %s8221_s23, %s6601_s27  ;;  %p6606_p9 = scmp.lt.s32.totalorder %s8221_s23, %s8271_s15 }
 0xcba   : > { %p6607_p10 = scmp.lt.s32.totalorder %s6605_s0, %s6601_s27 }
 0xcbb   : > { %p6603_p7 = pnand %p6602_p4, %p6801_p5 }
 0xcbc   : > { %p6608_p11 = por %p6607_p10, %p6606_p9 }
 0xcbd   : > { %p6604_p8 = pneg %p6603_p7 }
 0xcbf   : > { %p6609_p12 = pnand %p6608_p11, %p6604_p8 }
 0xcc1   : > { %6612 = shalt.err (!%p6609_p12)
}
 0xcc2   : > { %6237 = dma.vmem_to_hbm [thread:$0]  (%p6801_p5), %s5091_s16, 16, %s8221_s23, %s5078_s24  }
 0xcc3 PF: > { %p6243_p13 = scmp.ge.s32.totalorder %s6647_s21, 2  ;;  %s5102_s1 = sand.u32 1, %s6635_s18  }
 0xcc4   : > { %s5103_s26 = scalar_lea.sflag [#allocation3], %s5102_s1 }
 0xcc5   : > { %p6240_p0 = pnand %p6243_p13, %p6805_p6 }
 0xcc7   : > { %p6241_p1 = pneg %p6240_p0 }
 0xcc9   : > { %6630 = dma.done.wait (%p6241_p1), %s5103_s26, 16  }
 0xcca   : > { %6632 = vsyncadd (%p6241_p1), %s5103_s26, 4294967280  ;;  %s8284_s21 = sld [smem:[#allocation6_spill]]  ;;  %s8287_s18 = smov %s6639_s19 }
 0xccb   : > { %s8285_s20 = sld [smem:[#allocation5_spill]] }
 0xccc   : > { %s8286_s27 = sld [smem:[#allocation7_spill]] }
 0xcd0   : > { %p25_p2 = scmp.ge.s32.totalorder %s8284_s21, 4  }
 0xcd1   : > { %s8288_s19 = smov %s8285_s20 }
 0xcd2   : > { %s8289_s20 = smov %s8286_s27  ;;  %27 = sbr.rel (!%p25_p2) target bundleno = 6 (0x6), region = 124 }
 0xcd7   :  { %5107 = vsyncpa [#allocation3], 1 }
 0xcd8   :  { %5109 = vsyncpa [#allocation3 + $0x1], 1 }

</bundles_post_ra>
